<compile_context>
chip_gen: v5e
topology: v5e:2x2
jax: 0.10.0
libtpu: 0.0.40
codegen_flags: <defaults>
</compile_context>

<pallas_src>
import math
import functools

import jax
import jax.numpy as jnp
from jax import lax
from jax.experimental import pallas as pl
from jax.experimental.pallas import tpu as pltpu


def attention_block_kernel(x_ref, g_gc_ref, g_cg_ref, gn_w_ref, gn_b_ref,
                           qkv_w_ref, qkv_b_ref, proj_w_ref, proj_b_ref,
                           o_ref, q_scr, k_scr, v_scr, att_scr, *,
                           num_heads, ch, gch, eps, q_tile, l_chunk, exp_dtype):
    C, L = x_ref.shape
    n_chunks = L // l_chunk
    n_qtiles = L // q_tile

    # ---------------- GroupNorm statistics: chunked streaming reduction (f32) ----------------
    def stats_body(ci, carry):
        s1, s2 = carry
        c0 = pl.multiple_of(ci * l_chunk, l_chunk)
        xc = x_ref[:, pl.ds(c0, l_chunk)]
        return (s1 + jnp.sum(xc, axis=-1, keepdims=True),
                s2 + jnp.sum(xc * xc, axis=-1, keepdims=True))

    s1, s2 = lax.fori_loop(0, n_chunks, stats_body,
                           (jnp.zeros((C, 1), jnp.float32),
                            jnp.zeros((C, 1), jnp.float32)))
    n_elem = jnp.float32(gch * L)
    # per-group sums via two skinny matmuls ((G,C) then (C,G)); no (C,C) membership matrix
    mean = jnp.dot(g_cg_ref[...],
                   jnp.dot(g_gc_ref[...], s1, preferred_element_type=jnp.float32),
                   preferred_element_type=jnp.float32) / n_elem
    ex2 = jnp.dot(g_cg_ref[...],
                  jnp.dot(g_gc_ref[...], s2, preferred_element_type=jnp.float32),
                  preferred_element_type=jnp.float32) / n_elem
    var = jnp.maximum(ex2 - mean * mean, 0.0)       # clamp: E[x^2]-m^2 can cancel negative
    inv_std = lax.rsqrt(var + eps)
    scale = gn_w_ref[...] * inv_std                 # fold affine: xn = x * scale + shift
    shift = gn_b_ref[...] - mean * scale

    # ------ GroupNorm apply + qkv 1x1 conv, tiled along L, written straight into Q/K/V ------
    @pl.loop(0, n_chunks)
    def _(ci):
        c0 = pl.multiple_of(ci * l_chunk, l_chunk)
        xn_c = (x_ref[:, pl.ds(c0, l_chunk)] * scale + shift).astype(jnp.bfloat16)   # (C, lc)
        qkv_c = (jnp.dot(qkv_w_ref[...], xn_c, preferred_element_type=jnp.float32)
                 + qkv_b_ref[...]).astype(jnp.bfloat16)                               # (3C, lc)
        q_scr[:, pl.ds(c0, l_chunk)] = qkv_c[:C]          # Q rows carry folded 1/sqrt(ch)
        k_scr[:, pl.ds(c0, l_chunk)] = qkv_c[C:2 * C]
        v_scr[:, pl.ds(c0, l_chunk)] = qkv_c[2 * C:]

    # ---- query-tiled multi-head attention; head outputs staged into a (C, Tq) slab so the ----
    # ---- projection is ONE (C,C)x(C,Tq) GEMM per tile (contraction dim C, not ch)         ----
    @pl.loop(0, n_qtiles)
    def _(qt):
        t0 = pl.multiple_of(qt * q_tile, q_tile)
        for h in range(num_heads):                      # static head loop -> static offsets
            r0 = h * ch
            q = q_scr[r0:r0 + ch, pl.ds(t0, q_tile)]    # (ch, Tq) bf16 (pre-scaled)
            k = k_scr[r0:r0 + ch, :]                    # (ch, L)  bf16
            v = v_scr[r0:r0 + ch, :]                    # (ch, L)  bf16
            # scores[t, s] = sum_c q[c, t] * k[c, s]
            s = lax.dot_general(q, k, (((0,), (0,)), ((), ())),
                                preferred_element_type=jnp.float32)          # (Tq, L) f32
            s = s - jnp.max(s, axis=-1, keepdims=True)
            p = jnp.exp(s.astype(exp_dtype))            # bf16 exp on v6e/v7x, f32 on v5e
            denom = jnp.sum(p.astype(jnp.float32), axis=-1, keepdims=True)   # f32 row sums
            w = (p * pl.reciprocal(denom, approx=True).astype(exp_dtype)
                 ).astype(jnp.bfloat16)
            # a[c, t] = sum_s v[c, s] * w[t, s]
            a = lax.dot_general(v, w, (((1,), (1,)), ((), ())),
                                preferred_element_type=jnp.float32)          # (ch, Tq) f32
            att_scr[r0:r0 + ch, :] = a.astype(jnp.bfloat16)
        out = jnp.dot(proj_w_ref[...], att_scr[...],
                      preferred_element_type=jnp.float32) + proj_b_ref[...]  # (C, Tq) f32
        # residual read from the ref at store time (input tile already resident in VMEM)
        o_ref[:, pl.ds(t0, q_tile)] = x_ref[:, pl.ds(t0, q_tile)] + out


def _tpu_kind():
    try:
        return jax.devices()[0].device_kind.lower()
    except Exception:
        return ""


def _default_exp_dtype():
    # bf16 exp roughly doubles EUP throughput on v6e/v7x; v5e has no bf16 EUP/VPU.
    kind = _tpu_kind()
    return jnp.bfloat16 if ("v6" in kind or "v7" in kind) else jnp.float32


def attention_block(x_nchw, params, *, num_groups, num_heads, eps=1e-5,
                    q_tile=None, exp_dtype=None):
    B, C, H, W = x_nchw.shape
    L = H * W
    assert C % num_groups == 0 and C % num_heads == 0
    ch = C // num_heads
    gch = C // num_groups
    # TODO(synk): pad L to a multiple of 128 and mask padded softmax keys for odd spatial sizes.
    assert L % 128 == 0, "H*W must be a multiple of 128 for lane-dense tiles"
    # TODO(synk): key-tiled online-softmax path that streams K/V from HBM when the resident
    # bf16 Q/K/V slabs (6*C*L bytes) + x/out blocks no longer fit v7x's 64 MiB VMEM.

    kind = _tpu_kind()
    try:
        vmem_phys = int(pltpu.get_tpu_info().vmem_capacity_bytes)
    except Exception:
        vmem_phys = 128 * 1024 * 1024
    vmem_limit = min(int(vmem_phys * 0.68), 96 * 1024 * 1024)

    if exp_dtype is None:
        exp_dtype = _default_exp_dtype()

    if q_tile is None:
        # (q_tile, L) f32 score-slab budget: tighter on v7x (64 MiB physical VMEM)
        score_budget = (4 << 20) if vmem_phys <= (64 << 20) else (8 << 20)
        cands = [t for t in (512, 256, 128) if L % t == 0]
        fitting = [t for t in cands if t * L * 4 <= score_budget]
        q_tile = max(fitting) if fitting else min(cands)
    assert L % q_tile == 0
    l_chunk = q_tile       # qkv-stage L chunking reuses the same tile size

    x = x_nchw.reshape(B, C, L).astype(jnp.float32)
    gn_w, gn_b, qkv_w, qkv_b, proj_w, proj_b = params
    gn_w = gn_w.reshape(C, 1).astype(jnp.float32)
    gn_b = gn_b.reshape(C, 1).astype(jnp.float32)

    # Permute qkv conv rows (head, [q|k|v], ch) -> ([q|k|v], head, ch) so Q/K/V form contiguous
    # slabs, and fold the full attention scale (scale on q AND k => 1/sqrt(ch)) into the Q rows.
    perm = jnp.arange(3 * C).reshape(num_heads, 3, ch).transpose(1, 0, 2).reshape(3 * C)
    row_scale = jnp.concatenate([jnp.full((C,), 1.0 / math.sqrt(ch), jnp.float32),
                                 jnp.ones((2 * C,), jnp.float32)])
    qkv_w_p = (qkv_w.reshape(3 * C, C).astype(jnp.float32)[perm]
               * row_scale[:, None]).astype(jnp.bfloat16)                    # MXU operand
    qkv_b_p = (qkv_b.reshape(3 * C).astype(jnp.float32)[perm] * row_scale).reshape(3 * C, 1)

    # Unsplit proj weight: one (C,C) GEMM per query tile (contraction dim C).
    proj_w_p = proj_w.reshape(C, C).astype(jnp.bfloat16)
    proj_b_p = proj_b.reshape(C, 1).astype(jnp.float32)

    # Skinny GroupNorm group-membership matrices (G,C) and (C,G), built once wrapper-side.
    grp = jnp.arange(C, dtype=jnp.int32) // gch
    g_gc = (jnp.arange(num_groups, dtype=jnp.int32)[:, None] == grp[None, :]).astype(jnp.float32)
    g_cg = g_gc.T

    kernel = functools.partial(attention_block_kernel, num_heads=num_heads, ch=ch, gch=gch,
                               eps=eps, q_tile=q_tile, l_chunk=l_chunk, exp_dtype=exp_dtype)

    # Shard the batch grid across v7x's two TensorCores; plain parallel elsewhere.
    batch_sem = pltpu.CORE_PARALLEL if "v7" in kind else "parallel"

    out = pl.pallas_call(
        kernel,
        out_shape=jax.ShapeDtypeStruct((B, C, L), jnp.float32),
        grid=(B,),
        in_specs=[
            pl.BlockSpec((None, C, L), lambda b: (b, 0, 0)),     # x, one batch element / step
            pl.BlockSpec((num_groups, C), lambda b: (0, 0)),     # group membership (G, C)
            pl.BlockSpec((C, num_groups), lambda b: (0, 0)),     # group membership (C, G)
            pl.BlockSpec((C, 1), lambda b: (0, 0)),              # groupnorm weight
            pl.BlockSpec((C, 1), lambda b: (0, 0)),              # groupnorm bias
            pl.BlockSpec((3 * C, C), lambda b: (0, 0)),          # qkv weight (bf16, permuted+scaled)
            pl.BlockSpec((3 * C, 1), lambda b: (0, 0)),          # qkv bias   (f32, permuted+scaled)
            pl.BlockSpec((C, C), lambda b: (0, 0)),              # proj weight (bf16)
            pl.BlockSpec((C, 1), lambda b: (0, 0)),              # proj bias
        ],
        out_specs=pl.BlockSpec((None, C, L), lambda b: (b, 0, 0)),
        scratch_shapes=[
            pltpu.VMEM((C, L), jnp.bfloat16),          # Q (pre-scaled), heads stacked on sublanes
            pltpu.VMEM((C, L), jnp.bfloat16),          # K
            pltpu.VMEM((C, L), jnp.bfloat16),          # V
            pltpu.VMEM((C, q_tile), jnp.bfloat16),     # per-tile head-output staging (proj input)
        ],
        compiler_params=pltpu.CompilerParams(
            dimension_semantics=(batch_sem,),
            vmem_limit_bytes=vmem_limit),
    )(x, g_gc, g_cg, gn_w, gn_b, qkv_w_p, qkv_b_p, proj_w_p, proj_b_p)
    return out.reshape(B, C, H, W)


def reference_forward(x_nchw, params, *, num_groups, num_heads, eps=1e-5,
                      mxu_dtype=jnp.float32, exp_dtype=jnp.float32):
    """Pure-JAX reference of the PyTorch forward.  mxu_dtype / exp_dtype mirror the kernel's
    MXU-operand and softmax-exp precision (f32 accumulation) for a tight numerical check."""
    B, C, H, W = x_nchw.shape
    L = H * W
    ch = C // num_heads
    gn_w, gn_b, qkv_w, qkv_b, proj_w, proj_b = params
    c = lambda a: a.astype(mxu_dtype)

    x = x_nchw.reshape(B, C, L).astype(jnp.float32)
    xg = x.reshape(B, num_groups, -1)
    mean = xg.mean(-1, keepdims=True)
    var = xg.var(-1, keepdims=True)
    xn = ((xg - mean) / jnp.sqrt(var + eps)).reshape(B, C, L)
    xn = xn * gn_w.reshape(1, C, 1) + gn_b.reshape(1, C, 1)

    qkv = jnp.einsum('oc,bcl->bol', c(qkv_w.reshape(3 * C, C)), c(xn),
                     preferred_element_type=jnp.float32) + qkv_b.reshape(1, 3 * C, 1)
    qkv = qkv.reshape(B * num_heads, 3 * ch, L)
    q, k, v = qkv[:, :ch], qkv[:, ch:2 * ch], qkv[:, 2 * ch:]
    q = q * (1.0 / math.sqrt(ch))            # scale folded onto q only (matches kernel)
    s = jnp.einsum('bct,bcs->bts', c(q), c(k), preferred_element_type=jnp.float32)
    s = s - s.max(-1, keepdims=True)
    p = jnp.exp(s.astype(exp_dtype)).astype(jnp.float32)
    w = p / p.sum(-1, keepdims=True)
    a = jnp.einsum('bts,bcs->bct', c(w), c(v),
                   preferred_element_type=jnp.float32).reshape(B, C, L)
    h = jnp.einsum('oc,bcl->bol', c(proj_w.reshape(C, C)), c(a),
                   preferred_element_type=jnp.float32) + proj_b.reshape(1, C, 1)
    return (x + h).reshape(B, C, H, W)


def make_params(key, channels):
    C = channels
    k1, k2, k3, k4 = jax.random.split(key, 4)
    gn_w = jnp.ones((C,), jnp.float32) + 0.1 * jax.random.normal(k1, (C,), jnp.float32)
    gn_b = 0.1 * jax.random.normal(k2, (C,), jnp.float32)
    qkv_w = jax.random.normal(k3, (3 * C, C), jnp.float32) / math.sqrt(C)
    qkv_b = 0.1 * jax.random.normal(k4, (3 * C,), jnp.float32)
    # zero_module(proj_out): weights and bias zeroed
    proj_w = jnp.zeros((C, C), jnp.float32)
    proj_b = jnp.zeros((C,), jnp.float32)
    return (gn_w, gn_b, qkv_w, qkv_b, proj_w, proj_b)


if __name__ == "__main__":
    B, C, H, W = 2, 8, 16, 16          # channels=8, spatial=16x16 (L = 256)
    num_heads = 2
    block_list_base_channels = 4       # GroupNorm num_groups

    key = jax.random.PRNGKey(0)
    kx, kp = jax.random.split(key)
    x = jax.random.normal(kx, (B, C, H, W), jnp.float32)
    params = make_params(kp, C)

    out = jax.block_until_ready(
        attention_block(x, params, num_groups=block_list_base_channels, num_heads=num_heads))
    # zero-initialized proj_out -> the block is exactly the identity (residual only)
    assert jnp.allclose(out, x, atol=1e-5)

    # Exercise the full attention math with non-zero proj weights.
    kpw, kpb = jax.random.split(jax.random.PRNGKey(1))
    params_nz = params[:4] + (jax.random.normal(kpw, (C, C), jnp.float32) / math.sqrt(C),
                              0.1 * jax.random.normal(kpb, (C,), jnp.float32))
    out_nz = jax.block_until_ready(
        attention_block(x, params_nz, num_groups=block_list_base_channels, num_heads=num_heads))

    exp_dt = _default_exp_dtype()
    ref_bf16 = reference_forward(x, params_nz, num_groups=block_list_base_channels,
                                 num_heads=num_heads, mxu_dtype=jnp.bfloat16, exp_dtype=exp_dt)
    ref_f32 = reference_forward(x, params_nz, num_groups=block_list_base_channels,
                                num_heads=num_heads)
    # tight check against the precision-matched reference, loose sanity check against pure f32
    assert jnp.allclose(out_nz, ref_bf16, rtol=2e-2, atol=2e-2), \
        float(jnp.max(jnp.abs(out_nz - ref_bf16)))
    assert jnp.allclose(out_nz, ref_f32, rtol=7e-2, atol=7e-2), \
        float(jnp.max(jnp.abs(out_nz - ref_f32)))

    print("KERNEL_OK")
</pallas_src>

<mosaic_0001>
module attributes {stable_mosaic.version = 11 : i64} {
  func.func @attention_block_kernel(%arg0: i32, %arg1: memref<1x8x256xf32, #tpu.memory_space<vmem>>, %arg2: memref<4x8xf32, #tpu.memory_space<vmem>>, %arg3: memref<8x4xf32, #tpu.memory_space<vmem>>, %arg4: memref<8x1xf32, #tpu.memory_space<vmem>>, %arg5: memref<8x1xf32, #tpu.memory_space<vmem>>, %arg6: memref<24x8xbf16, #tpu.memory_space<vmem>>, %arg7: memref<24x1xf32, #tpu.memory_space<vmem>>, %arg8: memref<8x8xbf16, #tpu.memory_space<vmem>>, %arg9: memref<8x1xf32, #tpu.memory_space<vmem>>, %arg10: memref<1x8x256xf32, #tpu.memory_space<vmem>>, %arg11: memref<8x256xbf16, #tpu.memory_space<vmem>>, %arg12: memref<8x256xbf16, #tpu.memory_space<vmem>>, %arg13: memref<8x256xbf16, #tpu.memory_space<vmem>>, %arg14: memref<8x256xbf16, #tpu.memory_space<vmem>>) attributes {dimension_semantics = [#tpu.dimension_semantics<parallel>], iteration_bounds = array<i64: 2>, scalar_prefetch = 0 : i64, scratch_operands = 4 : i64, tpu.core_type = #tpu.core_type<tc>, window_params = [{transform_indices = @transform_0, window_bounds = array<i64: 1, 8, 256>}, {pipeline_mode = #tpu.pipeline_mode<synchronous>, transform_indices = @transform_1, window_bounds = array<i64: 4, 8>}, {pipeline_mode = #tpu.pipeline_mode<synchronous>, transform_indices = @transform_2, window_bounds = array<i64: 8, 4>}, {pipeline_mode = #tpu.pipeline_mode<synchronous>, transform_indices = @transform_3, window_bounds = array<i64: 8, 1>}, {pipeline_mode = #tpu.pipeline_mode<synchronous>, transform_indices = @transform_4, window_bounds = array<i64: 8, 1>}, {pipeline_mode = #tpu.pipeline_mode<synchronous>, transform_indices = @transform_5, window_bounds = array<i64: 24, 8>}, {pipeline_mode = #tpu.pipeline_mode<synchronous>, transform_indices = @transform_6, window_bounds = array<i64: 24, 1>}, {pipeline_mode = #tpu.pipeline_mode<synchronous>, transform_indices = @transform_7, window_bounds = array<i64: 8, 8>}, {pipeline_mode = #tpu.pipeline_mode<synchronous>, transform_indices = @transform_8, window_bounds = array<i64: 8, 1>}, {transform_indices = @transform_9, window_bounds = array<i64: 1, 8, 256>}]} {
    %cst = arith.constant 0.000000e+00 : f32
    %0 = vector.broadcast %cst : f32 to vector<8x1xf32>
    %cst_0 = arith.constant 0.000000e+00 : f32
    %1 = vector.broadcast %cst_0 : f32 to vector<8x1xf32>
    %c0_i32 = arith.constant 0 : i32
    %c256_i32 = arith.constant 256 : i32
    %2 = arith.muli %c0_i32, %c256_i32 : i32
    %3 = tpu.assume_multiple %2, 256 : i32
    %c0 = arith.constant 0 : index
    %c0_1 = arith.constant 0 : index
    %4 = arith.index_cast %3 : i32 to index
    %5 = vector.load %arg1[%c0, %c0_1, %4] : memref<1x8x256xf32, #tpu.memory_space<vmem>>, vector<1x8x256xf32>
    %6 = vector.shape_cast %5 : vector<1x8x256xf32> to vector<8x256xf32>
    %cst_2 = arith.constant dense<0.000000e+00> : vector<8xf32>
    %7 = vector.multi_reduction <add>, %6, %cst_2 [1] : vector<8x256xf32> to vector<8xf32>
    %8 = vector.shape_cast %7 : vector<8xf32> to vector<8x1xf32>
    %9 = arith.addf %0, %8 : vector<8x1xf32>
    %10 = arith.mulf %6, %6 : vector<8x256xf32>
    %cst_3 = arith.constant dense<0.000000e+00> : vector<8xf32>
    %11 = vector.multi_reduction <add>, %10, %cst_3 [1] : vector<8x256xf32> to vector<8xf32>
    %12 = vector.shape_cast %11 : vector<8xf32> to vector<8x1xf32>
    %13 = arith.addf %1, %12 : vector<8x1xf32>
    %c1_i32 = arith.constant 1 : i32
    %c0_4 = arith.constant 0 : index
    %c0_5 = arith.constant 0 : index
    %14 = vector.load %arg3[%c0_4, %c0_5] : memref<8x4xf32, #tpu.memory_space<vmem>>, vector<8x4xf32>
    %c0_6 = arith.constant 0 : index
    %c0_7 = arith.constant 0 : index
    %15 = vector.load %arg2[%c0_6, %c0_7] : memref<4x8xf32, #tpu.memory_space<vmem>>, vector<4x8xf32>
    %cst_8 = arith.constant dense<0.000000e+00> : vector<4x1xf32>
    %16 = tpu.matmul %15, %9, %cst_8 {dimension_numbers = #tpu.dot_dimension_numbers<[1], [0], [0], [1], [0, 0, 1, 1], [], []>} : vector<4x8xf32>, vector<8x1xf32>, vector<4x1xf32> -> vector<4x1xf32>
    %cst_9 = arith.constant dense<0.000000e+00> : vector<8x1xf32>
    %17 = tpu.matmul %14, %16, %cst_9 {dimension_numbers = #tpu.dot_dimension_numbers<[1], [0], [0], [1], [0, 0, 1, 1], [], []>} : vector<8x4xf32>, vector<4x1xf32>, vector<8x1xf32> -> vector<8x1xf32>
    %cst_10 = arith.constant 5.120000e+02 : f32
    %18 = vector.broadcast %cst_10 : f32 to vector<8x1xf32>
    %19 = arith.divf %17, %18 : vector<8x1xf32>
    %c0_11 = arith.constant 0 : index
    %c0_12 = arith.constant 0 : index
    %20 = vector.load %arg3[%c0_11, %c0_12] : memref<8x4xf32, #tpu.memory_space<vmem>>, vector<8x4xf32>
    %c0_13 = arith.constant 0 : index
    %c0_14 = arith.constant 0 : index
    %21 = vector.load %arg2[%c0_13, %c0_14] : memref<4x8xf32, #tpu.memory_space<vmem>>, vector<4x8xf32>
    %cst_15 = arith.constant dense<0.000000e+00> : vector<4x1xf32>
    %22 = tpu.matmul %21, %13, %cst_15 {dimension_numbers = #tpu.dot_dimension_numbers<[1], [0], [0], [1], [0, 0, 1, 1], [], []>} : vector<4x8xf32>, vector<8x1xf32>, vector<4x1xf32> -> vector<4x1xf32>
    %cst_16 = arith.constant dense<0.000000e+00> : vector<8x1xf32>
    %23 = tpu.matmul %20, %22, %cst_16 {dimension_numbers = #tpu.dot_dimension_numbers<[1], [0], [0], [1], [0, 0, 1, 1], [], []>} : vector<8x4xf32>, vector<4x1xf32>, vector<8x1xf32> -> vector<8x1xf32>
    %cst_17 = arith.constant 5.120000e+02 : f32
    %24 = vector.broadcast %cst_17 : f32 to vector<8x1xf32>
    %25 = arith.divf %23, %24 : vector<8x1xf32>
    %26 = arith.mulf %19, %19 : vector<8x1xf32>
    %27 = arith.subf %25, %26 : vector<8x1xf32>
    %cst_18 = arith.constant 0.000000e+00 : f32
    %28 = vector.broadcast %cst_18 : f32 to vector<8x1xf32>
    %29 = arith.maximumf %27, %28 : vector<8x1xf32>
    %cst_19 = arith.constant 9.99999974E-6 : f32
    %30 = vector.broadcast %cst_19 : f32 to vector<8x1xf32>
    %31 = arith.addf %29, %30 : vector<8x1xf32>
    %32 = math.rsqrt %31 : vector<8x1xf32>
    %c0_20 = arith.constant 0 : index
    %c0_21 = arith.constant 0 : index
    %33 = vector.load %arg4[%c0_20, %c0_21] : memref<8x1xf32, #tpu.memory_space<vmem>>, vector<8x1xf32>
    %34 = arith.mulf %33, %32 : vector<8x1xf32>
    %c0_22 = arith.constant 0 : index
    %c0_23 = arith.constant 0 : index
    %35 = vector.load %arg5[%c0_22, %c0_23] : memref<8x1xf32, #tpu.memory_space<vmem>>, vector<8x1xf32>
    %36 = arith.mulf %19, %34 : vector<8x1xf32>
    %37 = arith.subf %35, %36 : vector<8x1xf32>
    %c0_i32_24 = arith.constant 0 : i32
    %c1_i32_25 = arith.constant 1 : i32
    %38 = arith.muli %c0_i32_24, %c1_i32_25 : i32
    %c0_i32_26 = arith.constant 0 : i32
    %39 = arith.addi %c0_i32_26, %38 : i32
    %c256_i32_27 = arith.constant 256 : i32
    %40 = arith.muli %39, %c256_i32_27 : i32
    %41 = tpu.assume_multiple %40, 256 : i32
    %c0_28 = arith.constant 0 : index
    %c0_29 = arith.constant 0 : index
    %42 = arith.index_cast %41 : i32 to index
    %43 = vector.load %arg1[%c0_28, %c0_29, %42] : memref<1x8x256xf32, #tpu.memory_space<vmem>>, vector<1x8x256xf32>
    %44 = vector.shape_cast %43 : vector<1x8x256xf32> to vector<8x256xf32>
    %45 = vector.broadcast %34 : vector<8x1xf32> to vector<8x256xf32>
    %46 = arith.mulf %44, %45 : vector<8x256xf32>
    %47 = vector.broadcast %37 : vector<8x1xf32> to vector<8x256xf32>
    %48 = arith.addf %46, %47 : vector<8x256xf32>
    %49 = arith.truncf %48 : vector<8x256xf32> to vector<8x256xbf16>
    %c0_30 = arith.constant 0 : index
    %c0_31 = arith.constant 0 : index
    %50 = vector.load %arg6[%c0_30, %c0_31] : memref<24x8xbf16, #tpu.memory_space<vmem>>, vector<24x8xbf16>
    %cst_32 = arith.constant dense<0.000000e+00> : vector<24x256xf32>
    %51 = tpu.matmul %50, %49, %cst_32 {dimension_numbers = #tpu.dot_dimension_numbers<[1], [0], [0], [1], [0, 0, 1, 1], [], []>} : vector<24x8xbf16>, vector<8x256xbf16>, vector<24x256xf32> -> vector<24x256xf32>
    %c0_33 = arith.constant 0 : index
    %c0_34 = arith.constant 0 : index
    %52 = vector.load %arg7[%c0_33, %c0_34] : memref<24x1xf32, #tpu.memory_space<vmem>>, vector<24x1xf32>
    %53 = vector.broadcast %52 : vector<24x1xf32> to vector<24x256xf32>
    %54 = arith.addf %51, %53 : vector<24x256xf32>
    %55 = arith.truncf %54 : vector<24x256xf32> to vector<24x256xbf16>
    %56 = vector.extract_strided_slice %55 {offsets = [0, 0], sizes = [8, 256], strides = [1, 1]} : vector<24x256xbf16> to vector<8x256xbf16>
    %c0_35 = arith.constant 0 : index
    %57 = arith.index_cast %41 : i32 to index
    %58 = vector.load %arg11[%c0_35, %57] : memref<8x256xbf16, #tpu.memory_space<vmem>>, vector<8x256xbf16>
    tpu.vector_store %arg11[%c0_35, %57], %56 {strides = array<i32>} : memref<8x256xbf16, #tpu.memory_space<vmem>>, vector<8x256xbf16>,
    %59 = vector.extract_strided_slice %55 {offsets = [8, 0], sizes = [8, 256], strides = [1, 1]} : vector<24x256xbf16> to vector<8x256xbf16>
    %c0_36 = arith.constant 0 : index
    %60 = arith.index_cast %41 : i32 to index
    %61 = vector.load %arg12[%c0_36, %60] : memref<8x256xbf16, #tpu.memory_space<vmem>>, vector<8x256xbf16>
    tpu.vector_store %arg12[%c0_36, %60], %59 {strides = array<i32>} : memref<8x256xbf16, #tpu.memory_space<vmem>>, vector<8x256xbf16>,
    %62 = vector.extract_strided_slice %55 {offsets = [16, 0], sizes = [8, 256], strides = [1, 1]} : vector<24x256xbf16> to vector<8x256xbf16>
    %c0_37 = arith.constant 0 : index
    %63 = arith.index_cast %41 : i32 to index
    %64 = vector.load %arg13[%c0_37, %63] : memref<8x256xbf16, #tpu.memory_space<vmem>>, vector<8x256xbf16>
    tpu.vector_store %arg13[%c0_37, %63], %62 {strides = array<i32>} : memref<8x256xbf16, #tpu.memory_space<vmem>>, vector<8x256xbf16>,
    %c1_i32_38 = arith.constant 1 : i32
    %c0_i32_39 = arith.constant 0 : i32
    %c1_i32_40 = arith.constant 1 : i32
    %65 = arith.muli %c0_i32_39, %c1_i32_40 : i32
    %c0_i32_41 = arith.constant 0 : i32
    %66 = arith.addi %c0_i32_41, %65 : i32
    %c256_i32_42 = arith.constant 256 : i32
    %67 = arith.muli %66, %c256_i32_42 : i32
    %68 = tpu.assume_multiple %67, 256 : i32
    %c0_43 = arith.constant 0 : index
    %69 = arith.index_cast %68 : i32 to index
    %70 = vector.load %arg11[%c0_43, %69] : memref<8x256xbf16, #tpu.memory_space<vmem>>, vector<4x256xbf16>
    %c0_44 = arith.constant 0 : index
    %c0_45 = arith.constant 0 : index
    %71 = vector.load %arg12[%c0_44, %c0_45] : memref<8x256xbf16, #tpu.memory_space<vmem>>, vector<4x256xbf16>
    %c0_46 = arith.constant 0 : index
    %c0_47 = arith.constant 0 : index
    %72 = vector.load %arg13[%c0_46, %c0_47] : memref<8x256xbf16, #tpu.memory_space<vmem>>, vector<4x256xbf16>
    %cst_48 = arith.constant dense<0.000000e+00> : vector<256x256xf32>
    %73 = tpu.matmul %70, %71, %cst_48 {dimension_numbers = #tpu.dot_dimension_numbers<[0], [0], [1], [1], [0, 1, 1, 1], [], []>} : vector<4x256xbf16>, vector<4x256xbf16>, vector<256x256xf32> -> vector<256x256xf32>
    %cst_49 = arith.constant dense<0xFF800000> : vector<256xf32>
    %74 = vector.multi_reduction <maximumf>, %73, %cst_49 [1] : vector<256x256xf32> to vector<256xf32>
    %75 = vector.shape_cast %74 : vector<256xf32> to vector<256x1xf32>
    %76 = vector.broadcast %75 : vector<256x1xf32> to vector<256x256xf32>
    %77 = arith.subf %73, %76 : vector<256x256xf32>
    %78 = math.exp %77 : vector<256x256xf32>
    %cst_50 = arith.constant dense<0.000000e+00> : vector<256xf32>
    %79 = vector.multi_reduction <add>, %78, %cst_50 [1] : vector<256x256xf32> to vector<256xf32>
    %80 = vector.shape_cast %79 : vector<256xf32> to vector<256x1xf32>
    %81 = tpu.reciprocal %80 {approx = true} : vector<256x1xf32> -> vector<256x1xf32>
    %82 = vector.broadcast %81 : vector<256x1xf32> to vector<256x256xf32>
    %83 = arith.mulf %78, %82 : vector<256x256xf32>
    %84 = arith.truncf %83 : vector<256x256xf32> to vector<256x256xbf16>
    %cst_51 = arith.constant dense<0.000000e+00> : vector<4x256xf32>
    %85 = tpu.matmul %72, %84, %cst_51 {dimension_numbers = #tpu.dot_dimension_numbers<[1], [1], [0], [0], [0, 0, 1, 0], [], []>} : vector<4x256xbf16>, vector<256x256xbf16>, vector<4x256xf32> -> vector<4x256xf32>
    %86 = arith.truncf %85 : vector<4x256xf32> to vector<4x256xbf16>
    %c0_52 = arith.constant 0 : index
    %c0_53 = arith.constant 0 : index
    %87 = vector.load %arg14[%c0_52, %c0_53] : memref<8x256xbf16, #tpu.memory_space<vmem>>, vector<4x256xbf16>
    tpu.vector_store %arg14[%c0_52, %c0_53], %86 {strides = array<i32>} : memref<8x256xbf16, #tpu.memory_space<vmem>>, vector<4x256xbf16>,
    %c4 = arith.constant 4 : index
    %88 = arith.index_cast %68 : i32 to index
    %89 = vector.load %arg11[%c4, %88] : memref<8x256xbf16, #tpu.memory_space<vmem>>, vector<4x256xbf16>
    %c4_54 = arith.constant 4 : index
    %c0_55 = arith.constant 0 : index
    %90 = vector.load %arg12[%c4_54, %c0_55] : memref<8x256xbf16, #tpu.memory_space<vmem>>, vector<4x256xbf16>
    %c4_56 = arith.constant 4 : index
    %c0_57 = arith.constant 0 : index
    %91 = vector.load %arg13[%c4_56, %c0_57] : memref<8x256xbf16, #tpu.memory_space<vmem>>, vector<4x256xbf16>
    %cst_58 = arith.constant dense<0.000000e+00> : vector<256x256xf32>
    %92 = tpu.matmul %89, %90, %cst_58 {dimension_numbers = #tpu.dot_dimension_numbers<[0], [0], [1], [1], [0, 1, 1, 1], [], []>} : vector<4x256xbf16>, vector<4x256xbf16>, vector<256x256xf32> -> vector<256x256xf32>
    %cst_59 = arith.constant dense<0xFF800000> : vector<256xf32>
    %93 = vector.multi_reduction <maximumf>, %92, %cst_59 [1] : vector<256x256xf32> to vector<256xf32>
    %94 = vector.shape_cast %93 : vector<256xf32> to vector<256x1xf32>
    %95 = vector.broadcast %94 : vector<256x1xf32> to vector<256x256xf32>
    %96 = arith.subf %92, %95 : vector<256x256xf32>
    %97 = math.exp %96 : vector<256x256xf32>
    %cst_60 = arith.constant dense<0.000000e+00> : vector<256xf32>
    %98 = vector.multi_reduction <add>, %97, %cst_60 [1] : vector<256x256xf32> to vector<256xf32>
    %99 = vector.shape_cast %98 : vector<256xf32> to vector<256x1xf32>
    %100 = tpu.reciprocal %99 {approx = true} : vector<256x1xf32> -> vector<256x1xf32>
    %101 = vector.broadcast %100 : vector<256x1xf32> to vector<256x256xf32>
    %102 = arith.mulf %97, %101 : vector<256x256xf32>
    %103 = arith.truncf %102 : vector<256x256xf32> to vector<256x256xbf16>
    %cst_61 = arith.constant dense<0.000000e+00> : vector<4x256xf32>
    %104 = tpu.matmul %91, %103, %cst_61 {dimension_numbers = #tpu.dot_dimension_numbers<[1], [1], [0], [0], [0, 0, 1, 0], [], []>} : vector<4x256xbf16>, vector<256x256xbf16>, vector<4x256xf32> -> vector<4x256xf32>
    %105 = arith.truncf %104 : vector<4x256xf32> to vector<4x256xbf16>
    %c4_62 = arith.constant 4 : index
    %c0_63 = arith.constant 0 : index
    %106 = vector.load %arg14[%c4_62, %c0_63] : memref<8x256xbf16, #tpu.memory_space<vmem>>, vector<4x256xbf16>
    tpu.vector_store %arg14[%c4_62, %c0_63], %105 {strides = array<i32>} : memref<8x256xbf16, #tpu.memory_space<vmem>>, vector<4x256xbf16>,
    %c0_64 = arith.constant 0 : index
    %c0_65 = arith.constant 0 : index
    %107 = vector.load %arg8[%c0_64, %c0_65] : memref<8x8xbf16, #tpu.memory_space<vmem>>, vector<8x8xbf16>
    %c0_66 = arith.constant 0 : index
    %c0_67 = arith.constant 0 : index
    %108 = vector.load %arg14[%c0_66, %c0_67] : memref<8x256xbf16, #tpu.memory_space<vmem>>, vector<8x256xbf16>
    %cst_68 = arith.constant dense<0.000000e+00> : vector<8x256xf32>
    %109 = tpu.matmul %107, %108, %cst_68 {dimension_numbers = #tpu.dot_dimension_numbers<[1], [0], [0], [1], [0, 0, 1, 1], [], []>} : vector<8x8xbf16>, vector<8x256xbf16>, vector<8x256xf32> -> vector<8x256xf32>
    %c0_69 = arith.constant 0 : index
    %c0_70 = arith.constant 0 : index
    %110 = vector.load %arg9[%c0_69, %c0_70] : memref<8x1xf32, #tpu.memory_space<vmem>>, vector<8x1xf32>
    %111 = vector.broadcast %110 : vector<8x1xf32> to vector<8x256xf32>
    %112 = arith.addf %109, %111 : vector<8x256xf32>
    %c0_71 = arith.constant 0 : index
    %c0_72 = arith.constant 0 : index
    %113 = arith.index_cast %68 : i32 to index
    %114 = vector.load %arg1[%c0_71, %c0_72, %113] : memref<1x8x256xf32, #tpu.memory_space<vmem>>, vector<1x8x256xf32>
    %115 = vector.shape_cast %114 : vector<1x8x256xf32> to vector<8x256xf32>
    %116 = arith.addf %115, %112 : vector<8x256xf32>
    %c0_73 = arith.constant 0 : index
    %c0_74 = arith.constant 0 : index
    %117 = arith.index_cast %68 : i32 to index
    %118 = vector.load %arg10[%c0_73, %c0_74, %117] : memref<1x8x256xf32, #tpu.memory_space<vmem>>, vector<1x8x256xf32>
    %119 = vector.shape_cast %118 : vector<1x8x256xf32> to vector<8x256xf32>
    %120 = vector.shape_cast %116 : vector<8x256xf32> to vector<1x8x256xf32>
    tpu.vector_store %arg10[%c0_73, %c0_74, %117], %120 {strides = array<i32>} : memref<1x8x256xf32, #tpu.memory_space<vmem>>, vector<1x8x256xf32>,
    %c1_i32_75 = arith.constant 1 : i32
    return
  }
  func.func @transform_0(%arg0: i32) -> (i32, i32, i32) {
    %c0_i32 = arith.constant 0 : i32
    %c0_i32_0 = arith.constant 0 : i32
    %c0_i32_1 = arith.constant 0 : i32
    return %arg0, %c0_i32, %c0_i32_0 : i32, i32, i32
  }
  func.func @transform_1(%arg0: i32) -> (i32, i32) {
    %c0_i32 = arith.constant 0 : i32
    %c0_i32_0 = arith.constant 0 : i32
    %c0_i32_1 = arith.constant 0 : i32
    return %c0_i32, %c0_i32_0 : i32, i32
  }
  func.func @transform_2(%arg0: i32) -> (i32, i32) {
    %c0_i32 = arith.constant 0 : i32
    %c0_i32_0 = arith.constant 0 : i32
    %c0_i32_1 = arith.constant 0 : i32
    return %c0_i32, %c0_i32_0 : i32, i32
  }
  func.func @transform_3(%arg0: i32) -> (i32, i32) {
    %c0_i32 = arith.constant 0 : i32
    %c0_i32_0 = arith.constant 0 : i32
    %c0_i32_1 = arith.constant 0 : i32
    return %c0_i32, %c0_i32_0 : i32, i32
  }
  func.func @transform_4(%arg0: i32) -> (i32, i32) {
    %c0_i32 = arith.constant 0 : i32
    %c0_i32_0 = arith.constant 0 : i32
    %c0_i32_1 = arith.constant 0 : i32
    return %c0_i32, %c0_i32_0 : i32, i32
  }
  func.func @transform_5(%arg0: i32) -> (i32, i32) {
    %c0_i32 = arith.constant 0 : i32
    %c0_i32_0 = arith.constant 0 : i32
    %c0_i32_1 = arith.constant 0 : i32
    return %c0_i32, %c0_i32_0 : i32, i32
  }
  func.func @transform_6(%arg0: i32) -> (i32, i32) {
    %c0_i32 = arith.constant 0 : i32
    %c0_i32_0 = arith.constant 0 : i32
    %c0_i32_1 = arith.constant 0 : i32
    return %c0_i32, %c0_i32_0 : i32, i32
  }
  func.func @transform_7(%arg0: i32) -> (i32, i32) {
    %c0_i32 = arith.constant 0 : i32
    %c0_i32_0 = arith.constant 0 : i32
    %c0_i32_1 = arith.constant 0 : i32
    return %c0_i32, %c0_i32_0 : i32, i32
  }
  func.func @transform_8(%arg0: i32) -> (i32, i32) {
    %c0_i32 = arith.constant 0 : i32
    %c0_i32_0 = arith.constant 0 : i32
    %c0_i32_1 = arith.constant 0 : i32
    return %c0_i32, %c0_i32_0 : i32, i32
  }
  func.func @transform_9(%arg0: i32) -> (i32, i32, i32) {
    %c0_i32 = arith.constant 0 : i32
    %c0_i32_0 = arith.constant 0 : i32
    %c0_i32_1 = arith.constant 0 : i32
    return %arg0, %c0_i32, %c0_i32_0 : i32, i32, i32
  }
}

</mosaic_0001>

<bundles_post_ra>
// kernel: tpu_custom_call.1
= control target key start
LH: loop header
LB: loop body
LE: loop exit
PB: predicated region body
PF: predicated region fallthrough
CT: control target
= control target key end

     0   :  { %14 = vsyncpa [#allocation7], 0  ;;  %s4574_s0 = inlined_call_operand.vmem [shape: f32[2,8,256], index: 0, kind: input, shape index: {}]   ;;  %s4575_s1 = inlined_call_operand.vmem [shape: f32[4,8], index: 1, kind: input, shape index: {}]   ;;  %s4576_s2 = inlined_call_operand.vmem [shape: f32[8,4], index: 2, kind: input, shape index: {}]   ;;  %s4577_s3 = inlined_call_operand.vmem [shape: f32[8,1], index: 3, kind: input, shape index: {}]   ;;  %s4578_s4 = inlined_call_operand.vmem [shape: f32[8,1], index: 4, kind: input, shape index: {}]   ;;  %s4579_s5 = inlined_call_operand.vmem [shape: bf16[24,8], index: 5, kind: input, shape index: {}]   ;;  %s4580_s6 = inlined_call_operand.vmem [shape: f32[24,1], index: 6, kind: input, shape index: {}]   ;;  %s4581_s7 = inlined_call_operand.vmem [shape: bf16[8,8], index: 7, kind: input, shape index: {}]   ;;  %s4582_s8 = inlined_call_operand.vmem [shape: f32[8,1], index: 8, kind: input, shape index: {}]   ;;  %s4583_s9 = inlined_call_operand.hbm [shape: f32[2,8,256], index: 9, kind: output, shape index: {}]  }
   0x1   :  { %16 = vsyncpa [#allocation7 + $0x1], 0  ;;  %s3039_s30 = smov 0   ;;  %s3041_s10 = smov 0  }
   0x2   :  { %s3043_s11 = smov 0   ;;  %s3045_s12 = smov 0  }
   0x3 LB: > { %s3060_s13 = sadd.s32 4294967295, %s2985_s12   ;;  %s2396_s14 = sadd.s32 4294967294, %s2985_s12   ;;  %s2985_s12 = sphi %s3045_s12, %s4759_s12   ;;  %s2981_s11 = sphi %s3043_s11, %s4758_s11   ;;  %s2977_s10 = sphi %s3041_s10, %s4757_s10   ;;  %s2973_s30 = sphi %s3039_s30, %s4756_s30  }
   0x4   : > { %s3064_s15 = sadd.s32 1, %s2985_s12   ;;  %s223_s16 = sadd.s32 1, %s2981_s11 }
   0x5   : > { %s220_s17 = ssub.s32 %s2985_s12, %s3064_s15  ;;  %p233_p0 = scmp.ne.s32.totalorder %s2981_s11, %s2977_s10 }
   0x6   : > { %p221_p1 = scmp.eq.s32.totalorder %s220_s17, 0  ;;  %p234_p2 = scmp.eq.s32.totalorder %s3060_s13, 1 }
   0x7   : > { %p239_p3 = scmp.ne.s32.totalorder %s2977_s10, %s2973_s30  ;;  %p240_p4 = scmp.eq.s32.totalorder %s2396_s14, 1 }
   0x8   : > { %s3075_s18 = scalar_select %p221_p1, %s2981_s11, %s223_s16  }
   0x9   : > { %p3077_p5 = por %p234_p2, %p233_p0  ;;  %p3081_p6 = por %p240_p4, %p239_p3 }
   0xa   : > { %p2399_p7 = scmp.ge.s32.totalorder %s2985_s12, 1  ;;  %p290_p8 = scmp.lt.s32.totalorder %s2985_s12, 3 }
   0xc   : > { %p291_p9 = pnand %p2399_p7, %p290_p8 }
   0xe   : > { %294 = sbr.rel (%p291_p9) target bundleno = 2750 (0xabe), region = 56 }
  0x13   : > { %p326_p10 = scmp.lt.s32.totalorder %s3060_s13, 1  ;;  %v345_v6 = vld [vmem:[%s4575_s1] sm:$0xf]  ;;  %vm346_vm0 = vcmask 64512   ;;  %vm374_vm1 = vcmask 1043456   ;;  %vm370_vm2 = vcmask 31744  }
  0x14   : > { %v344_v9 = vld [vmem:[%s4576_s2] sm:$0xff]  ;;  %v2987_v12 = vmov 512.0   ;;  %v2988_v16 = vmov 0   ;;  %v489_v41 = vld [vmem:[%s4580_s6 + $0x8] sm:$0xff]  ;;  %vm655_vm7 = vcmask 1041408   ;;  %s323_s26 = sand.u32 1, %s2977_s10  }
  0x15   : > { %s327_s21 = scalar_select %p326_p10, %s3060_s13, 1  ;;  %2535 = vrcp.f32 %v2987_v12  ;;  %2532 = vset.pattern.permute.xlu1 %v2988_v16  ;;  %2533 = vset.pattern.permute.xlu2 %v2988_v16  ;;  %v464_v34 = vld [vmem:[%s4577_s3] sm:$0xff]  ;;  %v487_v53 = vld [vmem:[%s4579_s5 + $0x8] sm:$0xf] }
  0x16   : > { %v466_v38 = vld [vmem:[%s4578_s4] sm:$0xff]  ;;  %v511_v54 = vunpack.c.l.b16 %v487_v53  ;;  %s2400_s27 = sshll.u32 %s323_s26, 4  ;;  %s2490_s28 = sshll.u32 %s3060_s13, 4 }
  0x17   : > { %s2488_s22 = sshll.u32 %s327_s21, 4  ;;  %v488_v40 = vld [vmem:[%s4580_s6] sm:$0xff]  ;;  %s2332_s16 = scalar_lea.hbm %s4583_s9, %s2490_s28 }
  0x18   : > { %s3092_s25 = scalar_lea.vmem %s4574_s0, %s2488_s22  ;;  %493 = vperm.xlu2 %2533, %v488_v40   ;;  %v2489_v52 = vld [vmem:[%s4579_s5] sm:$0xff]  ;;  %v513_v56 = vpack.c.b16 %v511_v54, %v511_v54  ;;  %s325_s17 = scalar_lea.vmem [#allocation6], %s2400_s27 }
  0x19   : > { %v3095_v0 = vld [vmem:[%s3092_s25] sm:$0xff]  ;;  %v3098_v1 = vld [vmem:[%s3092_s25 + $0x8] sm:$0xff]  ;;  %s2334_s21 = sshll.u32 %s325_s17, 4  ;;  %s2336_s22 = sshll.u32 %s2332_s16, 4  ;;  %s2335_s21 = int_to_ptr.vmem [resolvable:$true] %s2334_s21  ;;  %s2337_s22 = int_to_ptr.hbm [resolvable:$true] %s2336_s22 }
  0x1a   : > { %v338_v2 = vmul.f32 %v3095_v0, %v3095_v0  ;;  %v339_v3 = vmul.f32 %v3098_v1, %v3098_v1  ;;  %v334_v5 = vadd.f32 %v3098_v1, %v3095_v0  ;;  %s2321_s13 = scalar_lea.sflag [#allocation7], %s323_s26  ;;  %s2937_s23 = sshra.s32 %s2337_s22, 4  ;;  %s2938_s23 = int_to_ptr.hbm [resolvable:$true] %s2937_s23 }
  0x1b   : > { %v2536_v13 = vpop.eup %2535  ;;  %s2939_s24 = scalar_lea.hbm %s2938_s23, 16  ;;  %s2943_s27 = scalar_lea.hbm %s4583_s9, 32 }
  0x1c   : > { %v340_v4 = vadd.f32 %v339_v3, %v338_v2  ;;  %v399_v14 = vmul.f32 512.0, %v2536_v13  ;;  %vm403_vm3 = vweird.f32 %v2536_v13  ;;  %p2940_p11 = scmp.ne.s32.totalorder %s2938_s23, %s2939_s24  ;;  %p2944_p0 = scmp.lt.s32.totalorder %s2938_s23, %s4583_s9 }
  0x1d   : > { %p2945_p1 = scmp.lt.s32.totalorder %s2943_s27, %s2939_s24 }
  0x1e   : > { %341 = vadd.xlane.f32.xlu0 %v340_v4  ;;  %v400_v15 = vsub.f32 1.0, %v399_v14  ;;  %p2941_p12 = pnand %p2940_p11, %p3077_p5 }
  0x1f   : > { %p2946_p2 = por %p2945_p1, %p2944_p0 }
  0x20   : > { %v401_v17 = vmul.f32 %v2536_v13, %v400_v15  ;;  %498 = vperm.xlu2 %2533, %v489_v41   ;;  %p2942_p13 = pneg %p2941_p12 }
  0x22   : > { %v402_v18 = vadd.f32 %v2536_v13, %v401_v17  ;;  %p2947_p3 = pnand %p2946_p2, %p2942_p13 }
  0x24   : > { %v404_v19 = vsel %vm403_vm3, %v2536_v13, %v402_v18 }
  0x26   : > { %335 = vadd.xlane.f32.xlu0 %v334_v5 }
  0x72   : > { %v494_v55 = vpop.permute.xlu2 %493 }
  0x7a   : > { %v499_v62 = vpop.permute.xlu2 %498 }
  0x91   : > { %v342_v7 = vpop.xlane.xlu0 %341 }
  0x92   : > { %421 = vmatpush.msra.mxu2 %v342_v7 }
  0x93   : > { %2406 = vmatmul.msk.f32.vlgmr.msra.gmra.mxu2 %vm346_vm0, %v345_v6 }
  0x99   : > { %v336_v8 = vpop.xlane.xlu0 %335 }
  0x9a   : > { %365 = vmatpush.msra.mxu0 %v336_v8 }
  0x9b   : > { %2403 = vmatmul.msk.f32.vlgmr.msra.gmra.mxu0 %vm346_vm0, %v345_v6 }
 0x116   : > { %v423_v10 = vpop.f32.mrf.mxu2 }
 0x117   : > { %2407 = vmatpush.msk.msra.mxu3 %vm374_vm1, %v423_v10 }
 0x118   : > { %2408 = vmatmul.msk.f32.vlgmr.msra.gmra.mxu3 %vm370_vm2, %v344_v9  ;;  %v367_v11 = vpop.f32.mrf.mxu0 }
 0x119   : > { %2404 = vmatpush.msk.msra.mxu1 %vm374_vm1, %v367_v11 }
 0x11a   : > { %2405 = vmatmul.msk.f32.vlgmr.msra.gmra.mxu1 %vm370_vm2, %v344_v9 }
 0x197   : > { %v395_v20 = vpop.f32.mrf.mxu1 }
 0x198   : > { %v405_v21 = vmul.f32 %v404_v19, %v395_v20 }
 0x19a   : > { %v450_v22 = vmul.f32 %v405_v21, %v405_v21 }
 0x19b   : > { %v446_v23 = vpop.f32.mrf.mxu3 }
 0x19c   : > { %v449_v24 = vmul.f32 %v446_v23, %v404_v19 }
 0x19e   : > { %v451_v25 = vsub.f32 %v449_v24, %v450_v22 }
 0x1a0   : > { %v452_v26 = vmax.f32 %v451_v25, 0.0 }
 0x1a2   : > { %v453_v27 = vadd.f32 1e-05, %v452_v26 }
 0x1a4   : > { %2537 = vrsqrt.f32 %v453_v27  ;;  %vm460_vm5 = vweird.f32 %v453_v27 }
 0x1aa   : > { %v2538_v28 = vpop.eup %2537 }
 0x1ab   : > { %v455_v29 = vmul.f32 %v2538_v28, %v453_v27  ;;  %vm461_vm4 = vweird.f32 %v2538_v28 }
 0x1ac   : > { %vm462_vm6 = vmor %vm460_vm5, %vm461_vm4 }
 0x1ad   : > { %v456_v30 = vmul.f32 %v2538_v28, %v455_v29 }
 0x1af   : > { %v457_v31 = vmul.f32 0.5, %v456_v30 }
 0x1b1   : > { %v458_v32 = vsub.f32 1.5, %v457_v31 }
 0x1b3   : > { %v459_v33 = vmul.f32 %v2538_v28, %v458_v32 }
 0x1b5   : > { %v463_v35 = vsel %vm462_vm6, %v2538_v28, %v459_v33 }
 0x1b6   : > { %v465_v36 = vmul.f32 %v464_v34, %v463_v35 }
 0x1b8   : > { %471 = vperm.xlu1 %2532, %v465_v36   ;;  %v467_v37 = vmul.f32 %v465_v36, %v405_v21 }
 0x1ba   : > { %v468_v39 = vsub.f32 %v466_v38, %v467_v37 }
 0x1c0   : > { %478 = vperm.xlu1 %2532, %v468_v39  }
 0x22a   : > { %v472_v42 = vpop.permute.xlu1 %471 }
 0x22b   : > { %v474_v43 = vmul.f32 %v472_v42, %v3095_v0  ;;  %v475_v44 = vmul.f32 %v472_v42, %v3098_v1 }
 0x232   : > { %v479_v45 = vpop.permute.xlu1 %478 }
 0x233   : > { %v481_v46 = vadd.f32 %v479_v45, %v474_v43  ;;  %v482_v47 = vadd.f32 %v479_v45, %v475_v44 }
 0x235   : > { %v483_v48 = vpack.c.bf16 %v481_v46, %v481_v46  ;;  %v484_v49 = vpack.c.bf16 %v482_v47, %v482_v47 }
 0x237   : > { %v521_v50 = vsel %vm374_vm1, %v483_v48, 0  ;;  %v524_v51 = vsel %vm374_vm1, %v484_v49, 0 }
 0x238   : > { %533 = vmatpush.bf16.msrb.mxu2 %v521_v50  ;;  %551 = vmatpush.bf16.msrb.mxu3 %v524_v51 }
 0x23b   : > { %2413 = vmatmul.msk.bf16.vlgmr.msrb.gmra.mxu2 %vm346_vm0, %v2489_v52  ;;  %2415 = vmatmul.msk.bf16.vlgmr.msrb.gmra.mxu3 %vm346_vm0, %v2489_v52 }
 0x24b   : > { %2414 = vmatmul.msk.bf16.gmra.mxu2 %vm346_vm0, %v513_v56  ;;  %2416 = vmatmul.msk.bf16.gmra.mxu3 %vm346_vm0, %v513_v56 }
 0x2be   : > { %v535_v57 = vpop.f32.mrf.mxu2  ;;  %v553_v58 = vpop.f32.mrf.mxu3 }
 0x2bf   : > { %v536_v59 = vadd.f32 %v535_v57, %v494_v55  ;;  %v554_v60 = vadd.f32 %v553_v58, %v494_v55 }
 0x2c1   : > { %v562_v61 = vpack.c.bf16 %v554_v60, %v536_v59 }
 0x2c3   : > { %565 = vst [vmem:[#allocation2] sm:$0xff] %v562_v61 }
 0x2c6   : > { %v537_v63 = vpop.f32.mrf.mxu2  ;;  %v555_v0 = vpop.f32.mrf.mxu3 }
 0x2c7   : > { %v538_v1 = vadd.f32 %v537_v63, %v499_v62  ;;  %v556_v2 = vadd.f32 %v555_v0, %v499_v62 }
 0x2c9   : > { %v563_v3 = vpack.c.bf16 %v556_v2, %v538_v1 }
 0x2ca   : > { %v568_v4 = vld [vmem:[#allocation2] sm:$0x33] }
 0x2cb   : > { %566 = vst [vmem:[#allocation3] sm:$0xff] %v563_v3  ;;  %v572_v5 = vunpack.c.l.b16 %v568_v4  ;;  %v573_v6 = vunpack.c.h.b16 %v568_v4 }
 0x2cd   : > { %v574_v7 = vpack.c.b16 %v572_v5, %v572_v5  ;;  %v575_v8 = vpack.c.b16 %v573_v6, %v573_v6 }
 0x2ce   : > { %v3159_v26 = vpop.f32.mrf.mxu2  ;;  %v3161_v27 = vpop.f32.mrf.mxu3 }
 0x2cf   : > { %578 = vxpose.binary.xlu0.c.b16.start.end [1/2] (short) %v575_v8, %v574_v7, 128 }
 0x2d2   : > { %v569_v9 = vld [vmem:[#allocation3] sm:$0x33] }
 0x2d3   : > { %v603_v10 = vunpack.c.l.b16 %v569_v9  ;;  %v604_v11 = vunpack.c.h.b16 %v569_v9 }
 0x2d5   : > { %v605_v12 = vpack.c.b16 %v603_v10, %v603_v10  ;;  %v606_v13 = vpack.c.b16 %v604_v11, %v604_v11 }
 0x2d6   : > { %v542_v29 = vpop.f32.mrf.mxu2  ;;  %v560_v30 = vpop.f32.mrf.mxu3 }
 0x2d7   : > { %v657_v14 = vsel %vm655_vm7, %v605_v12, 0  ;;  %v660_v15 = vsel %vm655_vm7, %v606_v13, 0  ;;  %v490_v12 = vld [vmem:[%s4580_s6 + $0x10] sm:$0xff] }
 0x2d8   : > { %669 = vmatpush.bf16.msra.mxu2 %v657_v14  ;;  %758 = vmatpush.bf16.msra.mxu3 %v660_v15 }
 0x336   : > { %2534 = vset.pattern.permute.xlu0 %v2988_v16 }
 0x37b   : > { %v586_v17 = vpop.trf.xlu0 }
 0x37c   : > { %2417 = vmatmul.msk.bf16.vlgmr.msra.gmra.mxu2 %vm370_vm2, %v586_v17  ;;  %2433 = vmatmul.msk.bf16.vlgmr.msra.gmra.mxu3 %vm370_vm2, %v586_v17 }
 0x383   : > { %v587_v18 = vpop.trf.xlu0 }
 0x38b   : > { %v588_v19 = vpop.trf.xlu0 }
 0x38c   : > { %2418 = vmatmul.msk.bf16.gmra.mxu2 %vm370_vm2, %v588_v19  ;;  %2434 = vmatmul.msk.bf16.gmra.mxu3 %vm370_vm2, %v588_v19 }
 0x393   : > { %v589_v20 = vpop.trf.xlu0 }
 0x39b   : > { %v590_v21 = vpop.trf.xlu0 }
 0x39c   : > { %2419 = vmatmul.msk.bf16.gmra.mxu2 %vm370_vm2, %v590_v21  ;;  %2435 = vmatmul.msk.bf16.gmra.mxu3 %vm370_vm2, %v590_v21 }
 0x3a3   : > { %v591_v22 = vpop.trf.xlu0 }
 0x3ab   : > { %v592_v23 = vpop.trf.xlu0 }
 0x3ac   : > { %2420 = vmatmul.msk.bf16.gmra.mxu2 %vm370_vm2, %v592_v23  ;;  %2436 = vmatmul.msk.bf16.gmra.mxu3 %vm370_vm2, %v592_v23 }
 0x3b3   : > { %v593_v16 = vpop.trf.xlu0 }
 0x3bb   : > { %v594_v24 = vpop.trf.xlu0 }
 0x3bc   : > { %2421 = vmatmul.msk.bf16.gmra.mxu2 %vm370_vm2, %v594_v24  ;;  %2437 = vmatmul.msk.bf16.gmra.mxu3 %vm370_vm2, %v594_v24 }
 0x3c3   : > { %v595_v25 = vpop.trf.xlu0 }
 0x3cb   : > { %v596_v28 = vpop.trf.xlu0 }
 0x3cc   : > { %2422 = vmatmul.msk.bf16.gmra.mxu2 %vm370_vm2, %v596_v28  ;;  %2438 = vmatmul.msk.bf16.gmra.mxu3 %vm370_vm2, %v596_v28 }
 0x3d3   : > { %v597_v31 = vpop.trf.xlu0 }
 0x3db   : > { %v598_v32 = vpop.trf.xlu0 }
 0x3dc   : > { %2423 = vmatmul.msk.bf16.gmra.mxu2 %vm370_vm2, %v598_v32  ;;  %2439 = vmatmul.msk.bf16.gmra.mxu3 %vm370_vm2, %v598_v32 }
 0x3e3   : > { %v599_v33 = vpop.trf.xlu0 }
 0x3eb   : > { %v600_v34 = vpop.trf.xlu0 }
 0x3ec   : > { %2424 = vmatmul.msk.bf16.gmra.mxu2 %vm370_vm2, %v600_v34  ;;  %2440 = vmatmul.msk.bf16.gmra.mxu3 %vm370_vm2, %v600_v34 }
 0x3f3   : > { %v601_v7 = vpop.trf.xlu0 }
 0x3fc   : > { %2425 = vmatmul.msk.bf16.gmra.mxu2 %vm370_vm2, %v587_v18  ;;  %2441 = vmatmul.msk.bf16.gmra.mxu3 %vm370_vm2, %v587_v18 }
 0x3ff   : > { %v3171_v35 = vpop.f32.mrf.mxu2  ;;  %v3173_v36 = vpop.f32.mrf.mxu3 }
 0x400   : > { %v840_v15 = vmax.f32 %v3171_v35, %v3173_v36 }
 0x407   : > { %v3175_v37 = vpop.f32.mrf.mxu2  ;;  %v3177_v38 = vpop.f32.mrf.mxu3 }
 0x408   : > { %4642 = vst [vmem:[#allocation9_spill] sm:$0xff] %v3175_v37  ;;  %v843_v21 = vmax.f32 %v3175_v37, %v3177_v38 }
 0x409   : > { %4643 = vst [vmem:[#allocation10_spill] sm:$0xff] %v3177_v38 }
 0x40c   : > { %2426 = vmatmul.msk.bf16.gmra.mxu2 %vm370_vm2, %v589_v20  ;;  %2442 = vmatmul.msk.bf16.gmra.mxu3 %vm370_vm2, %v589_v20 }
 0x40f   : > { %v3181_v39 = vpop.f32.mrf.mxu2  ;;  %v3183_v40 = vpop.f32.mrf.mxu3 }
 0x410   : > { %v846_v10 = vmax.f32 %v3181_v39, %v3183_v40 }
 0x417   : > { %v3185_v41 = vpop.f32.mrf.mxu2  ;;  %v3187_v42 = vpop.f32.mrf.mxu3 }
 0x418   : > { %v849_v17 = vmax.f32 %v3185_v41, %v3187_v42 }
 0x41c   : > { %2427 = vmatmul.msk.bf16.gmra.mxu2 %vm370_vm2, %v591_v22  ;;  %2443 = vmatmul.msk.bf16.gmra.mxu3 %vm370_vm2, %v591_v22 }
 0x41f   : > { %v3191_v43 = vpop.f32.mrf.mxu2  ;;  %v3193_v44 = vpop.f32.mrf.mxu3 }
 0x420   : > { %v852_v5 = vmax.f32 %v3191_v43, %v3193_v44 }
 0x427   : > { %v3195_v45 = vpop.f32.mrf.mxu2  ;;  %v3197_v46 = vpop.f32.mrf.mxu3 }
 0x428   : > { %v855_v11 = vmax.f32 %v3195_v45, %v3197_v46 }
 0x42c   : > { %2428 = vmatmul.msk.bf16.gmra.mxu2 %vm370_vm2, %v593_v16  ;;  %2444 = vmatmul.msk.bf16.gmra.mxu3 %vm370_vm2, %v593_v16 }
 0x42f   : > { %v3201_v47 = vpop.f32.mrf.mxu2  ;;  %v3203_v48 = vpop.f32.mrf.mxu3 }
 0x430   : > { %v858_v0 = vmax.f32 %v3201_v47, %v3203_v48 }
 0x437   : > { %v3205_v49 = vpop.f32.mrf.mxu2  ;;  %v3207_v50 = vpop.f32.mrf.mxu3 }
 0x438   : > { %v861_v6 = vmax.f32 %v3205_v49, %v3207_v50 }
 0x43c   : > { %2429 = vmatmul.msk.bf16.gmra.mxu2 %vm370_vm2, %v595_v25  ;;  %2445 = vmatmul.msk.bf16.gmra.mxu3 %vm370_vm2, %v595_v25 }
 0x43f   : > { %v3211_v51 = vpop.f32.mrf.mxu2  ;;  %v3213_v52 = vpop.f32.mrf.mxu3 }
 0x440   : > { %v864_v60 = vmax.f32 %v3211_v51, %v3213_v52 }
 0x447   : > { %v3215_v53 = vpop.f32.mrf.mxu2  ;;  %v3217_v54 = vpop.f32.mrf.mxu3 }
 0x448   : > { %v867_v1 = vmax.f32 %v3215_v53, %v3217_v54 }
 0x44c   : > { %2430 = vmatmul.msk.bf16.gmra.mxu2 %vm370_vm2, %v597_v31  ;;  %2446 = vmatmul.msk.bf16.gmra.mxu3 %vm370_vm2, %v597_v31 }
 0x44f   : > { %v3221_v55 = vpop.f32.mrf.mxu2  ;;  %v3223_v56 = vpop.f32.mrf.mxu3 }
 0x450   : > { %v870_v57 = vmax.f32 %v3221_v55, %v3223_v56 }
 0x452   : > { %871 = vmax.xlane.f32.xlu1 %v870_v57 }
 0x457   : > { %v3227_v58 = vpop.f32.mrf.mxu2  ;;  %v3229_v59 = vpop.f32.mrf.mxu3 }
 0x458   : > { %v873_v61 = vmax.f32 %v3227_v58, %v3229_v59 }
 0x45a   : > { %865 = vmax.xlane.f32.xlu1 %v864_v60  ;;  %874 = vmax.xlane.f32.xlu2 %v873_v61 }
 0x45c   : > { %2431 = vmatmul.msk.bf16.gmra.mxu2 %vm370_vm2, %v599_v33  ;;  %2447 = vmatmul.msk.bf16.gmra.mxu3 %vm370_vm2, %v599_v33 }
 0x45f   : > { %v3237_v62 = vpop.f32.mrf.mxu2  ;;  %v3239_v63 = vpop.f32.mrf.mxu3 }
 0x460   : > { %v876_v2 = vmax.f32 %v3237_v62, %v3239_v63 }
 0x462   : > { %859 = vmax.xlane.f32.xlu1 %v858_v0  ;;  %868 = vmax.xlane.f32.xlu2 %v867_v1 }
 0x463   : > { %877 = vmax.xlane.f32.xlu0 %v876_v2 }
 0x467   : > { %v3247_v3 = vpop.f32.mrf.mxu2  ;;  %v3249_v4 = vpop.f32.mrf.mxu3 }
 0x468   : > { %v879_v16 = vmax.f32 %v3247_v3, %v3249_v4 }
 0x46a   : > { %853 = vmax.xlane.f32.xlu1 %v852_v5  ;;  %862 = vmax.xlane.f32.xlu2 %v861_v6 }
 0x46c   : > { %2432 = vmatmul.msk.bf16.gmra.mxu2 %vm370_vm2, %v601_v7  ;;  %2448 = vmatmul.msk.bf16.gmra.mxu3 %vm370_vm2, %v601_v7 }
 0x46f   : > { %v3257_v8 = vpop.f32.mrf.mxu2  ;;  %v3259_v9 = vpop.f32.mrf.mxu3 }
 0x470   : > { %v882_v18 = vmax.f32 %v3257_v8, %v3259_v9 }
 0x472   : > { %847 = vmax.xlane.f32.xlu1 %v846_v10  ;;  %856 = vmax.xlane.f32.xlu2 %v855_v11 }
 0x477   : > { %503 = vperm.xlu0 %2534, %v490_v12   ;;  %v3268_v13 = vpop.f32.mrf.mxu2  ;;  %v3270_v14 = vpop.f32.mrf.mxu3 }
 0x478   : > { %v885_v29 = vmax.f32 %v3268_v13, %v3270_v14 }
 0x47a   : > { %841 = vmax.xlane.f32.xlu1 %v840_v15  ;;  %850 = vmax.xlane.f32.xlu2 %v849_v17 }
 0x47f   : > { %v3278_v19 = vpop.f32.mrf.mxu2  ;;  %v3280_v20 = vpop.f32.mrf.mxu3 }
 0x480   : > { %4644 = vst [vmem:[#allocation11_spill] sm:$0xff] %v3278_v19  ;;  %v888_v24 = vmax.f32 %v3278_v19, %v3280_v20 }
 0x481   : > { %4645 = vst [vmem:[#allocation12_spill] sm:$0xff] %v3280_v20 }
 0x482   : > { %844 = vmax.xlane.f32.xlu2 %v843_v21  ;;  %883 = vmax.xlane.f32.xlu1 %v882_v18 }
 0x487   : > { %v3284_v22 = vpop.f32.mrf.mxu2  ;;  %v3286_v23 = vpop.f32.mrf.mxu3 }
 0x488   : > { %4646 = vst [vmem:[#allocation13_spill] sm:$0xff] %v3284_v22  ;;  %v891_v33 = vmax.f32 %v3284_v22, %v3286_v23 }
 0x489   : > { %4647 = vst [vmem:[#allocation14_spill] sm:$0xff] %v3286_v23 }
 0x48a   : > { %880 = vmax.xlane.f32.xlu2 %v879_v16  ;;  %889 = vmax.xlane.f32.xlu1 %v888_v24 }
 0x48f   : > { %v3292_v25 = vpop.f32.mrf.mxu2  ;;  %v3294_v28 = vpop.f32.mrf.mxu3 }
 0x490   : > { %4648 = vst [vmem:[#allocation15_spill] sm:$0xff] %v3292_v25  ;;  %v894_v30 = vmax.f32 %v3292_v25, %v3294_v28 }
 0x491   : > { %4649 = vst [vmem:[#allocation16_spill] sm:$0xff] %v3294_v28 }
 0x492   : > { %886 = vmax.xlane.f32.xlu2 %v885_v29  ;;  %895 = vmax.xlane.f32.xlu1 %v894_v30 }
 0x497   : > { %v3300_v31 = vpop.f32.mrf.mxu2  ;;  %v3302_v32 = vpop.f32.mrf.mxu3 }
 0x498   : > { %4650 = vst [vmem:[#allocation17_spill] sm:$0xff] %v3300_v31  ;;  %v897_v60 = vmax.f32 %v3300_v31, %v3302_v32 }
 0x499   : > { %4651 = vst [vmem:[#allocation18_spill] sm:$0xff] %v3302_v32 }
 0x49a   : > { %892 = vmax.xlane.f32.xlu2 %v891_v33 }
 0x49f   : > { %v3306_v34 = vpop.f32.mrf.mxu2  ;;  %v3308_v57 = vpop.f32.mrf.mxu3 }
 0x4a0   : > { %v900_v61 = vmax.f32 %v3306_v34, %v3308_v57 }
 0x4a2   : > { %898 = vmax.xlane.f32.xlu2 %v897_v60  ;;  %901 = vmax.xlane.f32.xlu1 %v900_v61 }
 0x4a7   : > { %v3314_v0 = vpop.f32.mrf.mxu2  ;;  %v3316_v1 = vpop.f32.mrf.mxu3 }
 0x4a8   : > { %4652 = vst [vmem:[#allocation19_spill] sm:$0xff] %v3314_v0  ;;  %v903_v2 = vmax.f32 %v3314_v0, %v3316_v1 }
 0x4a9   : > { %4653 = vst [vmem:[#allocation20_spill] sm:$0xff] %v3316_v1 }
 0x4aa   : > { %904 = vmax.xlane.f32.xlu2 %v903_v2 }
 0x4af   : > { %v3320_v5 = vpop.f32.mrf.mxu2  ;;  %v3322_v6 = vpop.f32.mrf.mxu3 }
 0x4b0   : > { %v906_v7 = vmax.f32 %v3320_v5, %v3322_v6 }
 0x4b2   : > { %907 = vmax.xlane.f32.xlu1 %v906_v7 }
 0x4b7   : > { %v3326_v10 = vpop.f32.mrf.mxu2  ;;  %v3328_v11 = vpop.f32.mrf.mxu3 }
 0x4b8   : > { %v909_v12 = vmax.f32 %v3326_v10, %v3328_v11 }
 0x4ba   : > { %910 = vmax.xlane.f32.xlu2 %v909_v12 }
 0x4bf   : > { %v3332_v15 = vpop.f32.mrf.mxu2  ;;  %v3334_v17 = vpop.f32.mrf.mxu3 }
 0x4c0   : > { %v912_v18 = vmax.f32 %v3332_v15, %v3334_v17 }
 0x4c2   : > { %913 = vmax.xlane.f32.xlu1 %v912_v18 }
 0x4c5   : > { %v872_v21 = vpop.xlane.xlu1 %871 }
 0x4c7   : > { %v3338_v16 = vpop.f32.mrf.mxu2  ;;  %v3340_v24 = vpop.f32.mrf.mxu3 }
 0x4c8   : > { %v915_v29 = vmax.f32 %v3338_v16, %v3340_v24 }
 0x4ca   : > { %916 = vmax.xlane.f32.xlu2 %v915_v29 }
 0x4cd   : > { %v866_v30 = vpop.xlane.xlu1 %865  ;;  %v875_v33 = vpop.xlane.xlu2 %874 }
 0x4ce   : > { %v952_v60 = vsub.f32 %v3211_v51, %v866_v30  ;;  %v953_v61 = vsub.f32 %v3213_v52, %v866_v30  ;;  %v958_v2 = vsub.f32 %v3227_v58, %v875_v33  ;;  %v959_v7 = vsub.f32 %v3229_v59, %v875_v33 }
 0x4cf   : > { %v3348_v12 = vpop.f32.mrf.mxu2  ;;  %v3350_v18 = vpop.f32.mrf.mxu3  ;;  %v956_v59 = vsub.f32 %v3221_v55, %v872_v21 }
 0x4d0   : > { %v1032_v23 = vmul.f32 1.442695, %v952_v60  ;;  %v1034_v22 = vmul.f32 1.442695, %v953_v61  ;;  %v1044_v32 = vmul.f32 1.442695, %v958_v2 }
 0x4d1   : > { %v1046_v29 = vmul.f32 1.442695, %v959_v7  ;;  %v1040_v60 = vmul.f32 1.442695, %v956_v59  ;;  %v918_v59 = vmax.f32 %v3348_v12, %v3350_v18 }
 0x4d2   : > { %2539 = vpow2.f32 %v1032_v23 }
 0x4d3   : > { %2541 = vpow2.f32 %v1034_v22  ;;  %v957_v22 = vsub.f32 %v3223_v56, %v872_v21 }
 0x4d4   : > { %2543 = vpow2.f32 %v1044_v32 }
 0x4d5   : > { %v3352_v31 = vpop.xlane.xlu1 %859  ;;  %v3354_v1 = vpop.xlane.xlu2 %868  ;;  %2545 = vpow2.f32 %v1046_v29  ;;  %v1042_v2 = vmul.f32 1.442695, %v957_v22 }
 0x4d6   : > { %2547 = vpow2.f32 %v1040_v60  ;;  %v878_v21 = vpop.xlane.xlu0 %877 }
 0x4d7   : > { %v3356_v51 = vpop.f32.mrf.mxu2  ;;  %v3358_v52 = vpop.f32.mrf.mxu3  ;;  %2549 = vpow2.f32 %v1042_v2  ;;  %v960_v2 = vsub.f32 %v3237_v62, %v878_v21 }
 0x4d8   : > { %v3360_v58 = vpop.eup %2539  ;;  %v921_v23 = vmax.f32 %v3356_v51, %v3358_v52 }
 0x4d9   : > { %4654 = vst [vmem:[#allocation21_spill] sm:$0xff] %v3360_v58  ;;  %v3365_v30 = vpop.eup %2541  ;;  %v1048_v28 = vmul.f32 1.442695, %v960_v2 }
 0x4da   : > { %4655 = vst [vmem:[#allocation22_spill] sm:$0xff] %v3365_v30  ;;  %922 = vmax.xlane.f32.xlu2 %v921_v23  ;;  %v1152_v32 = vadd.f32 %v3365_v30, %v3360_v58  ;;  %v3370_v33 = vpop.eup %2543 }
 0x4db   : > { %4656 = vst [vmem:[#allocation23_spill] sm:$0xff] %v3370_v33  ;;  %v3372_v61 = vpop.eup %2545  ;;  %2551 = vpow2.f32 %v1048_v28 }
 0x4dc   : > { %1153 = vadd.xlane.f32.xlu1 %v1152_v32  ;;  %4657 = vst [vmem:[#allocation24_spill] sm:$0xff] %v3372_v61  ;;  %v1161_v56 = vadd.f32 %v3372_v61, %v3370_v33  ;;  %v3390_v32 = vpop.eup %2547  ;;  %v961_v61 = vsub.f32 %v3239_v63, %v878_v21 }
 0x4dd   : > { %v3374_v7 = vpop.xlane.xlu1 %853  ;;  %v3376_v55 = vpop.xlane.xlu2 %862 }
 0x4de   : > { %v3392_v30 = vpop.eup %2549  ;;  %v1050_v38 = vmul.f32 1.442695, %v961_v61 }
 0x4df   : > { %v3378_v29 = vpop.f32.mrf.mxu2  ;;  %v3380_v0 = vpop.f32.mrf.mxu3  ;;  %4658 = vst [vmem:[#allocation25_spill] sm:$0xff] %v3392_v30  ;;  %v1158_v19 = vadd.f32 %v3392_v30, %v3390_v32 }
 0x4e0   : > { %2553 = vpow2.f32 %v1050_v38 }
 0x4e1   : > { %v3414_v21 = vpop.eup %2551 }
 0x4e2   : > { %1162 = vadd.xlane.f32.xlu2 %v1161_v56 }
 0x4e4   : > { %919 = vmax.xlane.f32.xlu1 %v918_v59 }
 0x4e5   : > { %v3386_v23 = vpop.xlane.xlu1 %847  ;;  %v3388_v22 = vpop.xlane.xlu2 %856 }
 0x4e6   : > { %v3416_v2 = vpop.eup %2553 }
 0x4e7   : > { %v3394_v58 = vpop.f32.mrf.mxu2  ;;  %v3396_v60 = vpop.f32.mrf.mxu3 }
 0x4e8   : > { %v927_v56 = vmax.f32 %v3394_v58, %v3396_v60 }
 0x4e9   : > { %v504_v59 = vpop.permute.xlu0 %503 }
 0x4ea   : > { %v541_v33 = vadd.f32 %v3159_v26, %v504_v59  ;;  %v559_v20 = vadd.f32 %v3161_v27, %v504_v59  ;;  %928 = vmax.xlane.f32.xlu2 %v927_v56  ;;  %v924_v26 = vmax.f32 %v3378_v29, %v3380_v0  ;;  %v948_v59 = vsub.f32 %v3201_v47, %v3352_v31 }
 0x4ec   : > { %v564_v25 = vpack.c.bf16 %v559_v20, %v541_v33  ;;  %1159 = vadd.xlane.f32.xlu1 %v1158_v19 }
 0x4ed   : > { %v3406_v37 = vpop.xlane.xlu1 %841  ;;  %v3408_v62 = vpop.xlane.xlu2 %850 }
 0x4ee   : > { %567 = vst [vmem:[#allocation4] sm:$0xff] %v564_v25  ;;  %v1164_v25 = vadd.f32 %v3416_v2, %v3414_v21 }
 0x4ef   : > { %v3428_v30 = vpop.f32.mrf.mxu3 }
 0x4f4   : > { %925 = vmax.xlane.f32.xlu1 %v924_v26  ;;  %v3426_v26 = vpop.f32.mrf.mxu2 }
 0x4f5   : > { %v3412_v27 = vpop.xlane.xlu2 %844  ;;  %v884_v63 = vpop.xlane.xlu1 %883 }
 0x4f6   : > { %v964_v19 = vsub.f32 %v3257_v8, %v884_v63  ;;  %v965_v20 = vsub.f32 %v3259_v9, %v884_v63  ;;  %v930_v63 = vmax.f32 %v3426_v26, %v3428_v30 }
 0x4f8   : > { %v1056_v28 = vmul.f32 1.442695, %v964_v19  ;;  %v1058_v38 = vmul.f32 1.442695, %v965_v20  ;;  %v949_v19 = vsub.f32 %v3203_v48, %v3352_v31  ;;  %v954_v20 = vsub.f32 %v3215_v53, %v3354_v1 }
 0x4f9   : > { %v944_v48 = vsub.f32 %v3191_v43, %v3374_v7 }
 0x4fa   : > { %2555 = vpow2.f32 %v1056_v28  ;;  %v955_v28 = vsub.f32 %v3217_v54, %v3354_v1 }
 0x4fb   : > { %2557 = vpow2.f32 %v1058_v38  ;;  %v945_v38 = vsub.f32 %v3193_v44, %v3374_v7  ;;  %v1016_v1 = vmul.f32 1.442695, %v944_v48  ;;  %v3460_v44 = vpop.f32.mrf.mxu3  ;;  %v950_v7 = vsub.f32 %v3205_v49, %v3376_v55 }
 0x4fc   : > { %1165 = vadd.xlane.f32.xlu1 %v1164_v25  ;;  %v1038_v54 = vmul.f32 1.442695, %v955_v28 }
 0x4fd   : > { %v881_v33 = vpop.xlane.xlu2 %880 }
 0x4fe   : > { %v962_v61 = vsub.f32 %v3247_v3, %v881_v33  ;;  %v963_v56 = vsub.f32 %v3249_v4, %v881_v33  ;;  %v1024_v3 = vmul.f32 1.442695, %v948_v59  ;;  %v1026_v4 = vmul.f32 1.442695, %v949_v19 }
 0x4ff   : > { %v1018_v59 = vmul.f32 1.442695, %v945_v38 }
 0x500   : > { %v1052_v8 = vmul.f32 1.442695, %v962_v61  ;;  %v1054_v9 = vmul.f32 1.442695, %v963_v56  ;;  %v3434_v47 = vpop.eup %2555  ;;  %v1036_v61 = vmul.f32 1.442695, %v954_v20 }
 0x501   : > { %v3438_v25 = vpop.eup %2557  ;;  %v1028_v20 = vmul.f32 1.442695, %v950_v7 }
 0x502   : > { %2559 = vpow2.f32 %v1052_v8  ;;  %v1170_v56 = vadd.f32 %v3438_v25, %v3434_v47 }
 0x503   : > { %2561 = vpow2.f32 %v1054_v9  ;;  %v3458_v9 = vpop.f32.mrf.mxu2 }
 0x504   : > { %931 = vmax.xlane.f32.xlu1 %v930_v63  ;;  %2563 = vpow2.f32 %v1024_v3  ;;  %v951_v63 = vsub.f32 %v3207_v50, %v3376_v55  ;;  %v933_v19 = vmax.f32 %v3458_v9, %v3460_v44  ;;  %v946_v50 = vsub.f32 %v3195_v45, %v3388_v22 }
 0x505   : > { %2565 = vpow2.f32 %v1026_v4  ;;  %v947_v55 = vsub.f32 %v3197_v46, %v3388_v22 }
 0x506   : > { %2567 = vpow2.f32 %v1036_v61  ;;  %v1030_v48 = vmul.f32 1.442695, %v951_v63  ;;  %v887_v61 = vpop.xlane.xlu2 %886 }
 0x507   : > { %2569 = vpow2.f32 %v1038_v54  ;;  %v1020_v54 = vmul.f32 1.442695, %v946_v50  ;;  %v966_v45 = vsub.f32 %v3268_v13, %v887_v61  ;;  %v967_v46 = vsub.f32 %v3270_v14, %v887_v61 }
 0x508   : > { %v3442_v33 = vpop.eup %2559  ;;  %2571 = vpow2.f32 %v1016_v1  ;;  %v1022_v1 = vmul.f32 1.442695, %v947_v55 }
 0x509   : > { %v3446_v31 = vpop.eup %2561  ;;  %2573 = vpow2.f32 %v1018_v59 }
 0x50a   : > { %v1167_v53 = vadd.f32 %v3446_v31, %v3442_v33  ;;  %v3454_v8 = vpop.eup %2563  ;;  %2575 = vpow2.f32 %v1028_v20  ;;  %v1062_v20 = vmul.f32 1.442695, %v967_v46 }
 0x50b   : > { %4659 = vst [vmem:[#allocation26_spill] sm:$0xff] %v3454_v8  ;;  %v3456_v43 = vpop.eup %2565  ;;  %2577 = vpow2.f32 %v1030_v48 }
 0x50c   : > { %1168 = vadd.xlane.f32.xlu2 %v1167_v53  ;;  %1171 = vadd.xlane.f32.xlu1 %v1170_v56  ;;  %4660 = vst [vmem:[#allocation27_spill] sm:$0xff] %v3456_v43  ;;  %v1146_v3 = vadd.f32 %v3456_v43, %v3454_v8  ;;  %v3470_v4 = vpop.eup %2567  ;;  %2579 = vpow2.f32 %v1020_v54 }
 0x50d   : > { %4661 = vst [vmem:[#allocation28_spill] sm:$0xff] %v3470_v4  ;;  %v3472_v28 = vpop.eup %2569  ;;  %2581 = vpow2.f32 %v1022_v1 }
 0x50e   : > { %4662 = vst [vmem:[#allocation29_spill] sm:$0xff] %v3472_v28  ;;  %v3474_v38 = vpop.eup %2571  ;;  %v1155_v53 = vadd.f32 %v3472_v28, %v3470_v4  ;;  %v3492_v22 = vpop.xlane.xlu2 %892 }
 0x50f   : > { %4663 = vst [vmem:[#allocation30_spill] sm:$0xff] %v3474_v38  ;;  %v3476_v49 = vpop.eup %2573 }
 0x510   : > { %4664 = vst [vmem:[#allocation31_spill] sm:$0xff] %v3476_v49  ;;  %v1140_v56 = vadd.f32 %v3476_v49, %v3474_v38  ;;  %v3486_v59 = vpop.eup %2575 }
 0x511   : > { %4665 = vst [vmem:[#allocation32_spill] sm:$0xff] %v3486_v59  ;;  %v3488_v7 = vpop.eup %2577 }
 0x512   : > { %4666 = vst [vmem:[#allocation33_spill] sm:$0xff] %v3488_v7  ;;  %v1149_v63 = vadd.f32 %v3488_v7, %v3486_v59  ;;  %v3498_v48 = vpop.eup %2579 }
 0x513   : > { %4667 = vst [vmem:[#allocation34_spill] sm:$0xff] %v3498_v48  ;;  %v3500_v50 = vpop.eup %2581 }
 0x514   : > { %934 = vmax.xlane.f32.xlu2 %v933_v19  ;;  %1147 = vadd.xlane.f32.xlu1 %v1146_v3  ;;  %v1060_v19 = vmul.f32 1.442695, %v966_v45  ;;  %v3496_v3 = vpop.xlane.xlu1 %889  ;;  %4668 = vst [vmem:[#allocation35_spill] sm:$0xff] %v3500_v50  ;;  %v1143_v13 = vadd.f32 %v3500_v50, %v3498_v48 }
 0x516   : > { %2583 = vpow2.f32 %v1060_v19  ;;  %v3504_v14 = vpop.xlane.xlu2 %898 }
 0x517   : > { %2585 = vpow2.f32 %v1062_v20 }
 0x51c   : > { %1156 = vadd.xlane.f32.xlu2 %v1155_v53  ;;  %1141 = vadd.xlane.f32.xlu1 %v1140_v56  ;;  %v3506_v61 = vpop.eup %2583  ;;  %v3510_v53 = vpop.xlane.xlu1 %895 }
 0x51d   : > { %v3508_v55 = vpop.eup %2585 }
 0x51e   : > { %v1173_v56 = vadd.f32 %v3508_v55, %v3506_v61  ;;  %v3514_v54 = vpop.xlane.xlu2 %904 }
 0x524   : > { %1150 = vadd.xlane.f32.xlu2 %v1149_v63  ;;  %v3516_v1 = vpop.xlane.xlu1 %901 }
 0x52c   : > { %1144 = vadd.xlane.f32.xlu2 %v1143_v13  ;;  %v3520_v46 = vpop.xlane.xlu1 %907 }
 0x52d   : > { %v3518_v45 = vpop.xlane.xlu2 %910 }
 0x534   : > { %1174 = vadd.xlane.f32.xlu2 %v1173_v56 }
 0x535   : > { %v914_v19 = vpop.xlane.xlu1 %913 }
 0x53d   : > { %v3522_v63 = vpop.xlane.xlu2 %916 }
 0x54d   : > { %v923_v20 = vpop.xlane.xlu2 %922 }
 0x54e   : > { %v990_v13 = vsub.f32 %v3356_v51, %v923_v20  ;;  %v991_v49 = vsub.f32 %v3358_v52, %v923_v20 }
 0x54f   : > { %v3526_v38 = vpop.xlane.xlu1 %1153 }
 0x550   : > { %v1108_v50 = vmul.f32 1.442695, %v990_v13  ;;  %v1110_v56 = vmul.f32 1.442695, %v991_v49 }
 0x552   : > { %2587 = vpow2.f32 %v1108_v50 }
 0x553   : > { %2589 = vpow2.f32 %v1110_v56 }
 0x555   : > { %v3528_v48 = vpop.xlane.xlu2 %1162 }
 0x557   : > { %v920_v43 = vpop.xlane.xlu1 %919 }
 0x558   : > { %v3530_v8 = vpop.eup %2587  ;;  %v988_v7 = vsub.f32 %v3348_v12, %v920_v43  ;;  %v989_v59 = vsub.f32 %v3350_v18, %v920_v43 }
 0x559   : > { %v3534_v28 = vpop.eup %2589 }
 0x55a   : > { %4669 = vst [vmem:[#allocation36_spill] sm:$0xff] %v3534_v28  ;;  %v1104_v51 = vmul.f32 1.442695, %v988_v7  ;;  %v1106_v4 = vmul.f32 1.442695, %v989_v59  ;;  %v1209_v52 = vadd.f32 %v3534_v28, %v3530_v8 }
 0x55c   : > { %2591 = vpow2.f32 %v1104_v51  ;;  %1210 = vadd.xlane.f32.xlu2 %v1209_v52 }
 0x55d   : > { %2593 = vpow2.f32 %v1106_v4  ;;  %v929_v49 = vpop.xlane.xlu2 %928 }
 0x55e   : > { %v994_v50 = vsub.f32 %v3394_v58, %v929_v49  ;;  %v995_v20 = vsub.f32 %v3396_v60, %v929_v49 }
 0x55f   : > { %v3540_v13 = vpop.xlane.xlu1 %1159 }
 0x560   : > { %v1116_v12 = vmul.f32 1.442695, %v994_v50  ;;  %v1118_v56 = vmul.f32 1.442695, %v995_v20 }
 0x562   : > { %v3542_v18 = vpop.eup %2591  ;;  %2595 = vpow2.f32 %v1116_v12 }
 0x563   : > { %v3544_v43 = vpop.eup %2593  ;;  %2597 = vpow2.f32 %v1118_v56 }
 0x564   : > { %v1206_v59 = vadd.f32 %v3544_v43, %v3542_v18 }
 0x566   : > { %1207 = vadd.xlane.f32.xlu1 %v1206_v59 }
 0x567   : > { %v926_v4 = vpop.xlane.xlu1 %925 }
 0x568   : > { %v3548_v7 = vpop.eup %2595  ;;  %v992_v58 = vsub.f32 %v3378_v29, %v926_v4  ;;  %v993_v60 = vsub.f32 %v3380_v0, %v926_v4 }
 0x569   : > { %4670 = vst [vmem:[#allocation37_spill] sm:$0xff] %v3548_v7  ;;  %v3552_v51 = vpop.eup %2597 }
 0x56a   : > { %4671 = vst [vmem:[#allocation38_spill] sm:$0xff] %v3552_v51  ;;  %v1112_v52 = vmul.f32 1.442695, %v992_v58  ;;  %v1114_v49 = vmul.f32 1.442695, %v993_v60  ;;  %v1215_v50 = vadd.f32 %v3552_v51, %v3548_v7  ;;  %v984_v58 = vsub.f32 %v3332_v15, %v914_v19 }
 0x56b   : > { %v941_v15 = vsub.f32 %v3183_v40, %v3386_v23  ;;  %v981_v40 = vsub.f32 %v3322_v6, %v3520_v46 }
 0x56c   : > { %2599 = vpow2.f32 %v1112_v52  ;;  %1216 = vadd.xlane.f32.xlu2 %v1215_v50  ;;  %v1096_v50 = vmul.f32 1.442695, %v984_v58 }
 0x56d   : > { %2601 = vpow2.f32 %v1114_v49  ;;  %v985_v49 = vsub.f32 %v3334_v17, %v914_v19  ;;  %v1010_v19 = vmul.f32 1.442695, %v941_v15 }
 0x56f   : > { %v3556_v20 = vpop.xlane.xlu1 %1165  ;;  %v1098_v51 = vmul.f32 1.442695, %v985_v49  ;;  %v987_v49 = vsub.f32 %v3340_v24, %v3522_v63  ;;  %v937_v24 = vsub.f32 %v3173_v36, %v3406_v37 }
 0x571   : > { %v1102_v6 = vmul.f32 1.442695, %v987_v49  ;;  %v983_v49 = vsub.f32 %v3328_v11, %v3518_v45 }
 0x572   : > { %v3558_v12 = vpop.eup %2599 }
 0x573   : > { %v3560_v56 = vpop.eup %2601 }
 0x574   : > { %v1212_v29 = vadd.f32 %v3560_v56, %v3558_v12 }
 0x576   : > { %1213 = vadd.xlane.f32.xlu1 %v1212_v29  ;;  %v940_v29 = vsub.f32 %v3181_v39, %v3386_v23  ;;  %v986_v23 = vsub.f32 %v3338_v16, %v3522_v63  ;;  %v936_v16 = vsub.f32 %v3171_v35, %v3406_v37  ;;  %v1002_v37 = vmul.f32 1.442695, %v937_v24 }
 0x577   : > { %v932_v0 = vpop.xlane.xlu1 %931 }
 0x578   : > { %v996_v59 = vsub.f32 %v3426_v26, %v932_v0  ;;  %v997_v4 = vsub.f32 %v3428_v30, %v932_v0  ;;  %v1008_v30 = vmul.f32 1.442695, %v940_v29  ;;  %v1000_v35 = vmul.f32 1.442695, %v936_v16 }
 0x579   : > { %v1094_v16 = vmul.f32 1.442695, %v983_v49 }
 0x57a   : > { %v1120_v60 = vmul.f32 1.442695, %v996_v59  ;;  %v1122_v52 = vmul.f32 1.442695, %v997_v4  ;;  %v980_v4 = vsub.f32 %v3320_v5, %v3520_v46 }
 0x57c   : > { %2603 = vpow2.f32 %v1120_v60  ;;  %v1088_v5 = vmul.f32 1.442695, %v980_v4 }
 0x57d   : > { %2605 = vpow2.f32 %v1122_v52 }
 0x57e   : > { %2607 = vpow2.f32 %v1096_v50  ;;  %v1100_v50 = vmul.f32 1.442695, %v986_v23 }
 0x57f   : > { %v3568_v7 = vpop.xlane.xlu2 %1168  ;;  %2609 = vpow2.f32 %v1098_v51 }
 0x580   : > { %2611 = vpow2.f32 %v1008_v30 }
 0x581   : > { %2613 = vpow2.f32 %v1010_v19  ;;  %v943_v19 = vsub.f32 %v3187_v42, %v3408_v62 }
 0x582   : > { %v3570_v28 = vpop.eup %2603 }
 0x583   : > { %v3574_v26 = vpop.eup %2605 }
 0x584   : > { %v1218_v17 = vadd.f32 %v3574_v26, %v3570_v28  ;;  %v3580_v59 = vpop.eup %2607 }
 0x585   : > { %v3586_v60 = vpop.eup %2609 }
 0x586   : > { %1219 = vadd.xlane.f32.xlu1 %v1218_v17  ;;  %v3598_v29 = vpop.eup %2611  ;;  %v942_v17 = vsub.f32 %v3185_v41, %v3408_v62  ;;  %v976_v62 = vsub.f32 %v3306_v34, %v3516_v1 }
 0x587   : > { %v935_v0 = vpop.xlane.xlu2 %934  ;;  %v3602_v15 = vpop.eup %2613 }
 0x588   : > { %v998_v39 = vsub.f32 %v3458_v9, %v935_v0  ;;  %v999_v58 = vsub.f32 %v3460_v44, %v935_v0  ;;  %v1200_v9 = vadd.f32 %v3586_v60, %v3580_v59  ;;  %v1090_v44 = vmul.f32 1.442695, %v981_v40 }
 0x589   : > { %v1134_v36 = vadd.f32 %v3602_v15, %v3598_v29 }
 0x58a   : > { %v1124_v51 = vmul.f32 1.442695, %v998_v39  ;;  %v1126_v52 = vmul.f32 1.442695, %v999_v58  ;;  %v1012_v39 = vmul.f32 1.442695, %v942_v17 }
 0x58b   : > { %v1014_v58 = vmul.f32 1.442695, %v943_v19  ;;  %v4673_v17 = vld [vmem:[#allocation10_spill] sm:$0xff] }
 0x58c   : > { %2615 = vpow2.f32 %v1124_v51  ;;  %v977_v51 = vsub.f32 %v3308_v57, %v3516_v1  ;;  %v939_v19 = vsub.f32 %v4673_v17, %v3412_v27  ;;  %v4678_v17 = vld [vmem:[#allocation19_spill] sm:$0xff] }
 0x58d   : > { %2617 = vpow2.f32 %v1126_v52  ;;  %v982_v52 = vsub.f32 %v3326_v10, %v3518_v45  ;;  %v4672_v10 = vld [vmem:[#allocation9_spill] sm:$0xff] }
 0x58e   : > { %1201 = vadd.xlane.f32.xlu1 %v1200_v9  ;;  %2619 = vpow2.f32 %v1088_v5  ;;  %v1080_v5 = vmul.f32 1.442695, %v976_v62  ;;  %v938_v1 = vsub.f32 %v4672_v10, %v3412_v27 }
 0x58f   : > { %v3596_v46 = vpop.xlane.xlu2 %1156  ;;  %2621 = vpow2.f32 %v1090_v44  ;;  %v1082_v44 = vmul.f32 1.442695, %v977_v51 }
 0x590   : > { %2623 = vpow2.f32 %v1100_v50 }
 0x591   : > { %2625 = vpow2.f32 %v1102_v6  ;;  %v1092_v6 = vmul.f32 1.442695, %v982_v52  ;;  %v1006_v52 = vmul.f32 1.442695, %v939_v19  ;;  %v978_v19 = vsub.f32 %v4678_v17, %v3514_v54 }
 0x592   : > { %v3606_v63 = vpop.eup %2615  ;;  %2627 = vpow2.f32 %v1000_v35  ;;  %v4674_v35 = vld [vmem:[#allocation15_spill] sm:$0xff] }
 0x593   : > { %v3610_v30 = vpop.eup %2617  ;;  %2629 = vpow2.f32 %v1002_v37  ;;  %v4675_v37 = vld [vmem:[#allocation16_spill] sm:$0xff] }
 0x594   : > { %v1221_v0 = vadd.f32 %v3610_v30, %v3606_v63  ;;  %v3618_v4 = vpop.eup %2619  ;;  %2631 = vpow2.f32 %v1012_v39  ;;  %v973_v39 = vsub.f32 %v4675_v37, %v3510_v53 }
 0x595   : > { %v3620_v41 = vpop.eup %2621  ;;  %2633 = vpow2.f32 %v1014_v58  ;;  %v1172_v58 = vpop.xlane.xlu1 %1171 }
 0x596   : > { %1222 = vadd.xlane.f32.xlu2 %v1221_v0  ;;  %1135 = vadd.xlane.f32.xlu1 %v1134_v36  ;;  %v3624_v42 = vpop.eup %2623  ;;  %v1194_v34 = vadd.f32 %v3620_v41, %v3618_v4  ;;  %2635 = vpow2.f32 %v1080_v5  ;;  %v972_v0 = vsub.f32 %v4674_v35, %v3510_v53  ;;  %v1004_v36 = vmul.f32 1.442695, %v938_v1  ;;  %v4677_v1 = vld [vmem:[#allocation12_spill] sm:$0xff] }
 0x597   : > { %v3622_v40 = vpop.xlane.xlu2 %1150  ;;  %v3628_v23 = vpop.eup %2625  ;;  %2637 = vpow2.f32 %v1082_v44  ;;  %v4676_v44 = vld [vmem:[#allocation11_spill] sm:$0xff]  ;;  %v4679_v35 = vld [vmem:[#allocation20_spill] sm:$0xff] }
 0x598   : > { %v1203_v9 = vadd.f32 %v3628_v23, %v3624_v42  ;;  %v3640_v50 = vpop.eup %2627  ;;  %2639 = vpow2.f32 %v1092_v6  ;;  %v1072_v27 = vmul.f32 1.442695, %v972_v0  ;;  %v968_v6 = vsub.f32 %v4676_v44, %v3496_v3 }
 0x599   : > { %v3642_v57 = vpop.eup %2629  ;;  %2641 = vpow2.f32 %v1094_v16  ;;  %v969_v16 = vsub.f32 %v4677_v1, %v3496_v3  ;;  %v979_v0 = vsub.f32 %v4679_v35, %v3514_v54 }
 0x59a   : > { %v3648_v45 = vpop.eup %2631  ;;  %v1128_v51 = vadd.f32 %v3642_v57, %v3640_v50  ;;  %2643 = vrcp.f32 %v1172_v58  ;;  %v1064_v37 = vmul.f32 1.442695, %v968_v6 }
 0x59b   : > { %v3650_v24 = vpop.eup %2633  ;;  %2645 = vpow2.f32 %v1004_v36  ;;  %v1066_v3 = vmul.f32 1.442695, %v969_v16 }
 0x59c   : > { %v1137_v62 = vadd.f32 %v3650_v24, %v3648_v45  ;;  %v3662_v49 = vpop.eup %2635 }
 0x59d   : > { %v3664_v5 = vpop.eup %2637 }
 0x59e   : > { %1204 = vadd.xlane.f32.xlu2 %v1203_v9  ;;  %1195 = vadd.xlane.f32.xlu1 %v1194_v34  ;;  %v1074_v9 = vmul.f32 1.442695, %v973_v39  ;;  %v3666_v34 = vpop.eup %2639  ;;  %v1188_v58 = vadd.f32 %v3664_v5, %v3662_v49 }
 0x59f   : > { %v3646_v11 = vpop.xlane.xlu2 %1144  ;;  %v3670_v10 = vpop.eup %2641 }
 0x5a0   : > { %v2644_v36 = vpop.eup %2643  ;;  %v1197_v39 = vadd.f32 %v3670_v10, %v3666_v34 }
 0x5a6   : > { %1138 = vadd.xlane.f32.xlu2 %v1137_v62  ;;  %1129 = vadd.xlane.f32.xlu1 %v1128_v51  ;;  %v3683_v62 = vpop.eup %2645 }
 0x5a7   : > { %v1175_v53 = vpop.xlane.xlu2 %1174 }
 0x5a8   : > { %2647 = vrcp.f32 %v1175_v53  ;;  %v1285_v53 = vmul.f32 %v2644_v36, %v3438_v25 }
 0x5a9   : > { %2649 = vpow2.f32 %v1006_v52  ;;  %v1084_v52 = vmul.f32 1.442695, %v978_v19  ;;  %v4680_v19 = vld [vmem:[#allocation17_spill] sm:$0xff] }
 0x5aa   : > { %2651 = vpow2.f32 %v1072_v27  ;;  %v1086_v27 = vmul.f32 1.442695, %v979_v0  ;;  %v974_v35 = vsub.f32 %v4680_v19, %v3504_v14 }
 0x5ab   : > { %2653 = vpow2.f32 %v1074_v9 }
 0x5ac   : > { %2655 = vrcp.f32 %v3568_v7  ;;  %v1284_v7 = vmul.f32 %v2644_v36, %v3434_v47  ;;  %v4681_v47 = vld [vmem:[#allocation18_spill] sm:$0xff] }
 0x5ad   : > { %2657 = vrcp.f32 %v3556_v20 }
 0x5ae   : > { %v2648_v51 = vpop.eup %2647  ;;  %1198 = vadd.xlane.f32.xlu2 %v1197_v39  ;;  %1189 = vadd.xlane.f32.xlu1 %v1188_v58  ;;  %2659 = vpow2.f32 %v1064_v37  ;;  %v1076_v58 = vmul.f32 1.442695, %v974_v35 }
 0x5af   : > { %v3686_v54 = vpop.eup %2649  ;;  %v1286_v9 = vmul.f32 %v2648_v51, %v3506_v61  ;;  %v1287_v44 = vmul.f32 %v2648_v51, %v3508_v55  ;;  %2661 = vpow2.f32 %v1066_v3  ;;  %v975_v61 = vsub.f32 %v4681_v47, %v3504_v14  ;;  %v4685_v47 = vld [vmem:[#allocation23_spill] sm:$0xff] }
 0x5b0   : > { %v3692_v6 = vpop.eup %2651  ;;  %2663 = vpow2.f32 %v1084_v52  ;;  %v1131_v55 = vadd.f32 %v3686_v54, %v3683_v62 }
 0x5b1   : > { %v3694_v1 = vpop.eup %2653  ;;  %v1334_v16 = vpack.c.bf16 %v1286_v9, %v1284_v7  ;;  %v1335_v20 = vpack.c.bf16 %v1287_v44, %v1285_v53  ;;  %2665 = vpow2.f32 %v1086_v27  ;;  %v4682_v9 = vld [vmem:[#allocation13_spill] sm:$0xff] }
 0x5b2   : > { %v2656_v17 = vpop.eup %2655  ;;  %2667 = vrcp.f32 %v3540_v13  ;;  %v1182_v0 = vadd.f32 %v3694_v1, %v3692_v6  ;;  %v1078_v13 = vmul.f32 1.442695, %v975_v61  ;;  %v970_v53 = vsub.f32 %v4682_v9, %v3492_v22 }
 0x5b3   : > { %1359 = vmatpush.bf16.xpose.msrb.mxu0 %v1334_v16  ;;  %1372 = vmatpush.bf16.xpose.msrb.mxu1 %v1335_v20  ;;  %v2658_v25 = vpop.eup %2657  ;;  %v1282_v36 = vmul.f32 %v2656_v17, %v3442_v33  ;;  %v1283_v37 = vmul.f32 %v2656_v17, %v3446_v31  ;;  %2669 = vrcp.f32 %v3528_v48  ;;  %v4683_v48 = vld [vmem:[#allocation14_spill] sm:$0xff]  ;;  %v4684_v17 = vld [vmem:[#allocation25_spill] sm:$0xff] }
 0x5b4   : > { %v3707_v39 = vpop.eup %2659  ;;  %v1280_v3 = vmul.f32 %v2658_v25, %v3414_v21  ;;  %v1281_v51 = vmul.f32 %v2658_v25, %v3416_v2  ;;  %2671 = vpow2.f32 %v1076_v58  ;;  %v971_v44 = vsub.f32 %v4683_v48, %v3492_v22  ;;  %v4686_v25 = vld [vmem:[#allocation24_spill] sm:$0xff] }
 0x5b5   : > { %v3710_v14 = vpop.eup %2661  ;;  %2673 = vpow2.f32 %v1078_v13  ;;  %v1068_v35 = vmul.f32 1.442695, %v970_v53  ;;  %v4690_v53 = vld [vmem:[#allocation22_spill] sm:$0xff] }
 0x5b6   : > { %1132 = vadd.xlane.f32.xlu2 %v1131_v55  ;;  %1183 = vadd.xlane.f32.xlu1 %v1182_v0  ;;  %v3714_v52 = vpop.eup %2663  ;;  %v1332_v33 = vpack.c.bf16 %v1282_v36, %v1280_v3  ;;  %v1333_v31 = vpack.c.bf16 %v1283_v37, %v1281_v51  ;;  %2675 = vrcp.f32 %v3596_v46  ;;  %v1176_v16 = vadd.f32 %v3710_v14, %v3707_v39  ;;  %v1148_v36 = vpop.xlane.xlu1 %1147  ;;  %v4687_v3 = vld [vmem:[#allocation28_spill] sm:$0xff] }
 0x5b7   : > { %v3716_v27 = vpop.eup %2665  ;;  %2677 = vrcp.f32 %v3526_v38  ;;  %v1070_v22 = vmul.f32 1.442695, %v971_v44 }
 0x5b8   : > { %v2668_v7 = vpop.eup %2667  ;;  %v1191_v2 = vadd.f32 %v3716_v27, %v3714_v52  ;;  %2679 = vpow2.f32 %v1068_v35  ;;  %v4691_v35 = vld [vmem:[#allocation32_spill] sm:$0xff] }
 0x5b9   : > { %v2670_v21 = vpop.eup %2669  ;;  %v1276_v20 = vmul.f32 %v2668_v7, %v3390_v32  ;;  %v1277_v19 = vmul.f32 %v2668_v7, %v4684_v17  ;;  %2681 = vpow2.f32 %v1070_v22  ;;  %v4689_v7 = vld [vmem:[#allocation21_spill] sm:$0xff] }
 0x5ba   : > { %v1278_v61 = vmul.f32 %v2670_v21, %v4685_v47  ;;  %v1279_v46 = vmul.f32 %v2670_v21, %v4686_v25  ;;  %v3732_v55 = vpop.eup %2671  ;;  %2683 = vrcp.f32 %v3622_v40  ;;  %v4692_v47 = vld [vmem:[#allocation33_spill] sm:$0xff]  ;;  %v4693_v25 = vld [vmem:[#allocation26_spill] sm:$0xff] }
 0x5bb   : > { %1360 = vmatpush.bf16.xpose.msrb.mxu0 %v1332_v33  ;;  %1373 = vmatpush.bf16.xpose.msrb.mxu1 %v1333_v31  ;;  %v3734_v0 = vpop.eup %2673  ;;  %v4688_v33 = vld [vmem:[#allocation29_spill] sm:$0xff]  ;;  %2685 = vrcp.f32 %v1148_v36  ;;  %v4694_v36 = vld [vmem:[#allocation27_spill] sm:$0xff] }
 0x5bc   : > { %v1330_v37 = vpack.c.bf16 %v1278_v61, %v1276_v20  ;;  %v1331_v58 = vpack.c.bf16 %v1279_v46, %v1277_v19  ;;  %v2676_v32 = vpop.eup %2675  ;;  %v1185_v13 = vadd.f32 %v3734_v0, %v3732_v55  ;;  %2687 = vrcp.f32 %v3646_v11 }
 0x5bd   : > { %v2678_v38 = vpop.eup %2677  ;;  %v1274_v51 = vmul.f32 %v2676_v32, %v4687_v3  ;;  %v1275_v31 = vmul.f32 %v2676_v32, %v4688_v33  ;;  %v4695_v3 = vld [vmem:[#allocation34_spill] sm:$0xff]  ;;  %v4696_v33 = vld [vmem:[#allocation35_spill] sm:$0xff] }
 0x5be   : > { %1192 = vadd.xlane.f32.xlu2 %v1191_v2  ;;  %1177 = vadd.xlane.f32.xlu1 %v1176_v16  ;;  %v1272_v9 = vmul.f32 %v2678_v38, %v4689_v7  ;;  %v1273_v48 = vmul.f32 %v2678_v38, %v4690_v53  ;;  %v3743_v44 = vpop.eup %2679  ;;  %v1142_v20 = vpop.xlane.xlu1 %1141  ;;  %v4697_v7 = vld [vmem:[#allocation30_spill] sm:$0xff]  ;;  %v4698_v53 = vld [vmem:[#allocation31_spill] sm:$0xff] }
 0x5bf   : > { %v3745_v21 = vpop.eup %2681  ;;  %2689 = vrcp.f32 %v1142_v20 }
 0x5c0   : > { %v1328_v2 = vpack.c.bf16 %v1274_v51, %v1272_v9  ;;  %v1329_v16 = vpack.c.bf16 %v1275_v31, %v1273_v48  ;;  %v2684_v40 = vpop.eup %2683  ;;  %v1179_v19 = vadd.f32 %v3745_v21, %v3743_v44 }
 0x5c1   : > { %v2686_v17 = vpop.eup %2685  ;;  %v1270_v22 = vmul.f32 %v2684_v40, %v4691_v35  ;;  %v1271_v61 = vmul.f32 %v2684_v40, %v4692_v47  ;;  %v4699_v47 = vld [vmem:[#allocation36_spill] sm:$0xff] }
 0x5c2   : > { %v1268_v46 = vmul.f32 %v2686_v17, %v4693_v25  ;;  %v2688_v38 = vpop.eup %2687 }
 0x5c3   : > { %1361 = vmatpush.bf16.xpose.msrb.mxu0 %v1330_v37  ;;  %1374 = vmatpush.bf16.xpose.msrb.mxu1 %v1331_v58  ;;  %v1269_v37 = vmul.f32 %v2686_v17, %v4694_v36  ;;  %v1266_v51 = vmul.f32 %v2688_v38, %v4695_v3  ;;  %v1267_v31 = vmul.f32 %v2688_v38, %v4696_v33  ;;  %v1413_v36 = vld [vmem:[#allocation2] sm:$0xcc] }
 0x5c4   : > { %v1326_v58 = vpack.c.bf16 %v1270_v22, %v1268_v46 }
 0x5c5   : > { %v1327_v32 = vpack.c.bf16 %v1271_v61, %v1269_v37  ;;  %v1417_v37 = vunpack.c.l.b16 %v1413_v36 }
 0x5c6   : > { %1186 = vadd.xlane.f32.xlu2 %v1185_v13  ;;  %v2690_v13 = vpop.eup %2689 }
 0x5c7   : > { %v1264_v9 = vmul.f32 %v2690_v13, %v4697_v7  ;;  %v1265_v48 = vmul.f32 %v2690_v13, %v4698_v53 }
 0x5c9   : > { %v1325_v40 = vpack.c.bf16 %v1267_v31, %v1265_v48 }
 0x5cb   : > { %1362 = vmatpush.bf16.xpose.msrb.mxu0 %v1328_v2  ;;  %1375 = vmatpush.bf16.xpose.msrb.mxu1 %v1329_v16  ;;  %v1324_v16 = vpack.c.bf16 %v1266_v51, %v1264_v9 }
 0x5ce   : > { %1180 = vadd.xlane.f32.xlu2 %v1179_v19 }
 0x5cf   : > { %v1211_v11 = vpop.xlane.xlu2 %1210 }
 0x5d0   : > { %2691 = vrcp.f32 %v1211_v11 }
 0x5d3   : > { %1363 = vmatpush.bf16.xpose.msrb.mxu0 %v1326_v58  ;;  %1376 = vmatpush.bf16.xpose.msrb.mxu1 %v1327_v32  ;;  %v1418_v58 = vunpack.c.h.b16 %v1413_v36 }
 0x5d5   : > { %v1420_v32 = vpack.c.b16 %v1418_v58, %v1418_v58 }
 0x5d6   : > { %v2692_v20 = vpop.eup %2691 }
 0x5d7   : > { %v3762_v35 = vmul.f32 %v2692_v20, %v3530_v8  ;;  %v3768_v61 = vmul.f32 %v2692_v20, %v4699_v47  ;;  %v1422_v13 = vrot.slane %v1420_v32, 2 }
 0x5d9   : > { %v1208_v2 = vpop.xlane.xlu1 %1207 }
 0x5da   : > { %2693 = vrcp.f32 %v1208_v2 }
 0x5db   : > { %1364 = vmatpush.bf16.xpose.msrb.mxu0 %v1324_v16  ;;  %1377 = vmatpush.bf16.xpose.msrb.mxu1 %v1325_v40 }
 0x5df   : > { %v1217_v11 = vpop.xlane.xlu2 %1216 }
 0x5e0   : > { %v2694_v17 = vpop.eup %2693 }
 0x5e1   : > { %v3759_v19 = vmul.f32 %v2694_v17, %v3542_v18  ;;  %v3765_v22 = vmul.f32 %v2694_v17, %v3544_v43  ;;  %v1419_v18 = vpack.c.b16 %v1417_v37, %v1417_v37 }
 0x5e3   : > { %v1346_v25 = vpack.c.bf16 %v3762_v35, %v3759_v19  ;;  %v1347_v46 = vpack.c.bf16 %v3768_v61, %v3765_v22  ;;  %v1421_v8 = vrot.slane %v1419_v18, 2 }
 0x5e9   : > { %v1214_v38 = vpop.xlane.xlu1 %1213 }
 0x5f8   : > { %1425 = vxpose.binary.xlu1.c.b16.start.end [1/2] (short) %v1422_v13, %v1421_v8, 128 }
 0x5f9   : > { %v1220_v43 = vpop.xlane.xlu1 %1219 }
 0x601   : > { %v3774_v3 = vpop.xlane.xlu1 %1201 }
 0x609   : > { %v1223_v51 = vpop.xlane.xlu2 %1222  ;;  %v1136_v33 = vpop.xlane.xlu1 %1135 }
 0x60a   : > { %2695 = vrcp.f32 %v1136_v33 }
 0x610   : > { %v2696_v53 = vpop.eup %2695 }
 0x611   : > { %v1205_v31 = vpop.xlane.xlu2 %1204  ;;  %v3776_v9 = vpop.xlane.xlu1 %1195  ;;  %v1260_v16 = vmul.f32 %v2696_v53, %v3598_v29  ;;  %v1261_v20 = vmul.f32 %v2696_v53, %v3602_v15 }
 0x619   : > { %v1139_v7 = vpop.xlane.xlu2 %1138  ;;  %v1130_v37 = vpop.xlane.xlu1 %1129 }
 0x61a   : > { %2697 = vrcp.f32 %v1139_v7 }
 0x61b   : > { %2699 = vrcp.f32 %v1223_v51 }
 0x61c   : > { %2701 = vrcp.f32 %v1130_v37 }
 0x61d   : > { %2703 = vrcp.f32 %v1220_v43 }
 0x620   : > { %v2698_v48 = vpop.eup %2697 }
 0x621   : > { %v1199_v2 = vpop.xlane.xlu2 %1198  ;;  %v1262_v40 = vmul.f32 %v2698_v48, %v3648_v45  ;;  %v1263_v17 = vmul.f32 %v2698_v48, %v3650_v24  ;;  %v2700_v18 = vpop.eup %2699  ;;  %v570_v48 = vld [vmem:[#allocation4] sm:$0x33] }
 0x622   : > { %v2702_v32 = vpop.eup %2701  ;;  %v1318_v15 = vmul.f32 %v2700_v18, %v3606_v63  ;;  %v1319_v45 = vmul.f32 %v2700_v18, %v3610_v30 }
 0x623   : > { %v1322_v47 = vpack.c.bf16 %v1262_v40, %v1260_v16  ;;  %v1323_v36 = vpack.c.bf16 %v1263_v17, %v1261_v20  ;;  %v2704_v8 = vpop.eup %2703  ;;  %v1256_v24 = vmul.f32 %v2702_v32, %v3640_v50  ;;  %v1257_v51 = vmul.f32 %v2702_v32, %v3642_v57  ;;  %v4700_v40 = vld [vmem:[#allocation37_spill] sm:$0xff]  ;;  %v4701_v17 = vld [vmem:[#allocation38_spill] sm:$0xff] }
 0x624   : > { %v1316_v33 = vmul.f32 %v2704_v8, %v3570_v28  ;;  %v1317_v7 = vmul.f32 %v2704_v8, %v3574_v26  ;;  %v1353_v50 = vunpack.c.l.b16 %v570_v48 }
 0x625   : > { %1365 = vmatpush.bf16.xpose.msrb.mxu0 %v1322_v47  ;;  %1378 = vmatpush.bf16.xpose.msrb.mxu1 %v1323_v36 }
 0x626   : > { %v1351_v16 = vpack.c.bf16 %v1319_v45, %v1317_v7  ;;  %v3792_v28 = vpack.c.b16 %v1353_v50, %v1353_v50  ;;  %v1414_v7 = vld [vmem:[#allocation3] sm:$0xcc] }
 0x629   : > { %v1133_v58 = vpop.xlane.xlu2 %1132 }
 0x62a   : > { %2705 = vrcp.f32 %v1133_v58 }
 0x62b   : > { %2707 = vrcp.f32 %v1214_v38 }
 0x62c   : > { %2709 = vrcp.f32 %v1217_v11  ;;  %v1350_v11 = vpack.c.bf16 %v1318_v15, %v1316_v33 }
 0x62d   : > { %2711 = vrcp.f32 %v1205_v31  ;;  %v1190_v31 = vpop.xlane.xlu1 %1189 }
 0x62e   : > { %2713 = vrcp.f32 %v3774_v3 }
 0x62f   : > { %2715 = vrcp.f32 %v1199_v2 }
 0x630   : > { %v2706_v29 = vpop.eup %2705  ;;  %2717 = vrcp.f32 %v3776_v9 }
 0x631   : > { %v1258_v13 = vmul.f32 %v2706_v29, %v3683_v62  ;;  %v1259_v43 = vmul.f32 %v2706_v29, %v3686_v54  ;;  %v2708_v63 = vpop.eup %2707  ;;  %v1354_v62 = vunpack.c.h.b16 %v570_v48  ;;  %v1193_v58 = vpop.xlane.xlu2 %1192 }
 0x632   : > { %v2710_v30 = vpop.eup %2709  ;;  %v1312_v57 = vmul.f32 %v2708_v63, %v3558_v12  ;;  %v1313_v54 = vmul.f32 %v2708_v63, %v3560_v56  ;;  %2719 = vrcp.f32 %v1193_v58 }
 0x633   : > { %v1320_v53 = vpack.c.bf16 %v1258_v13, %v1256_v24  ;;  %v1321_v38 = vpack.c.bf16 %v1259_v43, %v1257_v51  ;;  %v3794_v26 = vpack.c.b16 %v1354_v62, %v1354_v62  ;;  %v1314_v20 = vmul.f32 %v2710_v30, %v4700_v40  ;;  %v2712_v12 = vpop.eup %2711 }
 0x634   : > { %v1315_v47 = vmul.f32 %v2710_v30, %v4701_v17  ;;  %v2714_v56 = vpop.eup %2713  ;;  %v1306_v18 = vmul.f32 %v2712_v12, %v3624_v42  ;;  %v1307_v32 = vmul.f32 %v2712_v12, %v3628_v23  ;;  %2721 = vrcp.f32 %v1190_v31 }
 0x635   : > { %1366 = vmatpush.bf16.xpose.msrb.mxu0 %v1320_v53  ;;  %1379 = vmatpush.bf16.xpose.msrb.mxu1 %v1321_v38  ;;  %v1348_v36 = vpack.c.bf16 %v1314_v20, %v1312_v57  ;;  %v1304_v3 = vmul.f32 %v2714_v56, %v3580_v59  ;;  %v1305_v8 = vmul.f32 %v2714_v56, %v3586_v60  ;;  %v1184_v59 = vpop.xlane.xlu1 %1183  ;;  %v1451_v38 = vunpack.c.h.b16 %v1414_v7 }
 0x636   : > { %v1349_v37 = vpack.c.bf16 %v1315_v47, %v1313_v54 }
 0x637   : > { %v1344_v19 = vpack.c.bf16 %v1306_v18, %v1304_v3  ;;  %v1345_v35 = vpack.c.bf16 %v1307_v32, %v1305_v8  ;;  %v1453_v30 = vpack.c.b16 %v1451_v38, %v1451_v38 }
 0x639   : > { %v1187_v23 = vpop.xlane.xlu2 %1186 }
 0x63a   : > { %2723 = vrcp.f32 %v1187_v23 }
 0x63b   : > { %2725 = vrcp.f32 %v1184_v59 }
 0x63c   : > { %1367 = vmatmul.bf16.vlgmr.msrb.gmra.mxu0 %v3792_v28  ;;  %1380 = vmatmul.bf16.vlgmr.msrb.gmra.mxu1 %v3794_v26 }
 0x63d   : > { %1385 = vmatpush.bf16.xpose.msra.mxu0 %v1350_v11  ;;  %1398 = vmatpush.bf16.xpose.msra.mxu1 %v1351_v16  ;;  %v1178_v43 = vpop.xlane.xlu1 %1177 }
 0x645   : > { %1386 = vmatpush.bf16.xpose.msra.mxu0 %v1348_v36  ;;  %1399 = vmatpush.bf16.xpose.msra.mxu1 %v1349_v37 }
 0x64d   : > { %1387 = vmatpush.bf16.xpose.msra.mxu0 %v1346_v25  ;;  %1400 = vmatpush.bf16.xpose.msra.mxu1 %v1347_v46  ;;  %v2716_v25 = vpop.eup %2715 }
 0x64e   : > { %v2718_v22 = vpop.eup %2717  ;;  %v1302_v61 = vmul.f32 %v2716_v25, %v3666_v34  ;;  %v1303_v42 = vmul.f32 %v2716_v25, %v3670_v10 }
 0x64f   : > { %v1300_v46 = vmul.f32 %v2718_v22, %v3618_v4  ;;  %v1301_v9 = vmul.f32 %v2718_v22, %v3620_v41  ;;  %v2720_v29 = vpop.eup %2719  ;;  %v1181_v4 = vpop.xlane.xlu2 %1180 }
 0x650   : > { %v2722_v15 = vpop.eup %2721  ;;  %v1298_v45 = vmul.f32 %v2720_v29, %v3714_v52  ;;  %v1299_v34 = vmul.f32 %v2720_v29, %v3716_v27  ;;  %2727 = vrcp.f32 %v1181_v4 }
 0x651   : > { %v1342_v2 = vpack.c.bf16 %v1302_v61, %v1300_v46  ;;  %v1343_v60 = vpack.c.bf16 %v1303_v42, %v1301_v9  ;;  %v1296_v10 = vmul.f32 %v2722_v15, %v3662_v49  ;;  %v1297_v24 = vmul.f32 %v2722_v15, %v3664_v5  ;;  %v2724_v51 = vpop.eup %2723 }
 0x652   : > { %v2726_v33 = vpop.eup %2725  ;;  %v1294_v53 = vmul.f32 %v2724_v51, %v3732_v55  ;;  %v1295_v52 = vmul.f32 %v2724_v51, %v3734_v0  ;;  %2729 = vrcp.f32 %v1178_v43  ;;  %v1450_v5 = vunpack.c.l.b16 %v1414_v7 }
 0x653   : > { %v1340_v13 = vpack.c.bf16 %v1298_v45, %v1296_v10  ;;  %v1341_v41 = vpack.c.bf16 %v1299_v34, %v1297_v24  ;;  %v1292_v27 = vmul.f32 %v2726_v33, %v3692_v6  ;;  %v1293_v49 = vmul.f32 %v2726_v33, %v3694_v1 }
 0x654   : > { %v1452_v63 = vpack.c.b16 %v1450_v5, %v1450_v5  ;;  %v1455_v1 = vrot.slane %v1453_v30, 2 }
 0x655   : > { %1388 = vmatpush.bf16.xpose.msra.mxu0 %v1344_v19  ;;  %1401 = vmatpush.bf16.xpose.msra.mxu1 %v1345_v35  ;;  %v1338_v48 = vpack.c.bf16 %v1294_v53, %v1292_v27  ;;  %v1339_v11 = vpack.c.bf16 %v1295_v52, %v1293_v49 }
 0x656   : > { %v2728_v16 = vpop.eup %2727  ;;  %v1454_v57 = vrot.slane %v1452_v63, 2  ;;  %v1508_v17 = vsel %vm655_vm7, %v1455_v1, 0 }
 0x657   : > { %v1290_v62 = vmul.f32 %v2728_v16, %v3743_v44  ;;  %v1291_v55 = vmul.f32 %v2728_v16, %v3745_v21 }
 0x658   : > { %v2730_v50 = vpop.eup %2729  ;;  %v1505_v20 = vsel %vm655_vm7, %v1454_v57, 0 }
 0x659   : > { %v1288_v0 = vmul.f32 %v2730_v50, %v3707_v39  ;;  %v1289_v6 = vmul.f32 %v2730_v50, %v3710_v14 }
 0x65b   : > { %v1336_v54 = vpack.c.bf16 %v1290_v62, %v1288_v0  ;;  %v1337_v40 = vpack.c.bf16 %v1291_v55, %v1289_v6 }
 0x65d   : > { %1389 = vmatpush.bf16.xpose.msra.mxu0 %v1342_v2  ;;  %1402 = vmatpush.bf16.xpose.msra.mxu1 %v1343_v60 }
 0x665   : > { %1390 = vmatpush.bf16.xpose.msra.mxu0 %v1340_v13  ;;  %1403 = vmatpush.bf16.xpose.msra.mxu1 %v1341_v41 }
 0x66d   : > { %1391 = vmatpush.bf16.xpose.msra.mxu0 %v1338_v48  ;;  %1404 = vmatpush.bf16.xpose.msra.mxu1 %v1339_v11 }
 0x675   : > { %1392 = vmatpush.bf16.xpose.msra.mxu0 %v1336_v54  ;;  %1405 = vmatpush.bf16.xpose.msra.mxu1 %v1337_v40 }
 0x67c   : > { %1393 = vmatmul.bf16.vlgmr.msra.gmra.mxu0 %v3792_v28  ;;  %1406 = vmatmul.bf16.vlgmr.msra.gmra.mxu1 %v3794_v26 }
 0x67d   : > { %1517 = vmatpush.bf16.msrb.mxu0 %v1505_v20  ;;  %1606 = vmatpush.bf16.msrb.mxu1 %v1508_v17 }
 0x6a4   : > { %v1433_v44 = vpop.trf.xlu1 }
 0x6a5   : > { %2449 = vmatmul.msk.bf16.vlgmr.msrb.gmra.mxu0 %vm370_vm2, %v1433_v44  ;;  %2465 = vmatmul.msk.bf16.vlgmr.msrb.gmra.mxu1 %vm370_vm2, %v1433_v44 }
 0x6ac   : > { %v1434_v39 = vpop.trf.xlu1 }
 0x6b4   : > { %v1435_v14 = vpop.trf.xlu1 }
 0x6b5   : > { %2450 = vmatmul.msk.bf16.gmra.mxu0 %vm370_vm2, %v1435_v14  ;;  %2466 = vmatmul.msk.bf16.gmra.mxu1 %vm370_vm2, %v1435_v14 }
 0x6b9   : > { %v1368_v21 = vpop.f32.mrf.mxu0  ;;  %v1381_v47 = vpop.f32.mrf.mxu1 }
 0x6ba   : > { %v1382_v8 = vadd.f32 %v1381_v47, %v1368_v21 }
 0x6bc   : > { %v1436_v36 = vpop.trf.xlu1 }
 0x6c1   : > { %v1370_v37 = vpop.f32.mrf.mxu0  ;;  %v1383_v12 = vpop.f32.mrf.mxu1 }
 0x6c4   : > { %v1437_v56 = vpop.trf.xlu1 }
 0x6c5   : > { %2451 = vmatmul.msk.bf16.gmra.mxu0 %vm370_vm2, %v1437_v56  ;;  %2467 = vmatmul.msk.bf16.gmra.mxu1 %vm370_vm2, %v1437_v56 }
 0x6cc   : > { %v1438_v28 = vpop.trf.xlu1 }
 0x6d4   : > { %v1439_v26 = vpop.trf.xlu1 }
 0x6d5   : > { %2452 = vmatmul.msk.bf16.gmra.mxu0 %vm370_vm2, %v1439_v26  ;;  %2468 = vmatmul.msk.bf16.gmra.mxu1 %vm370_vm2, %v1439_v26 }
 0x6dc   : > { %v1440_v58 = vpop.trf.xlu1 }
 0x6e4   : > { %v1441_v18 = vpop.trf.xlu1 }
 0x6e5   : > { %2453 = vmatmul.msk.bf16.gmra.mxu0 %vm370_vm2, %v1441_v18  ;;  %2469 = vmatmul.msk.bf16.gmra.mxu1 %vm370_vm2, %v1441_v18 }
 0x6ec   : > { %v1442_v32 = vpop.trf.xlu1 }
 0x6f4   : > { %v1443_v35 = vpop.trf.xlu1 }
 0x6f5   : > { %2454 = vmatmul.msk.bf16.gmra.mxu0 %vm370_vm2, %v1443_v35  ;;  %2470 = vmatmul.msk.bf16.gmra.mxu1 %vm370_vm2, %v1443_v35 }
 0x6f9   : > { %v1394_v31 = vpop.f32.mrf.mxu0  ;;  %v1407_v3 = vpop.f32.mrf.mxu1 }
 0x6fa   : > { %v1408_v19 = vadd.f32 %v1407_v3, %v1394_v31 }
 0x6fc   : > { %v1411_v25 = vpack.c.bf16 %v1408_v19, %v1382_v8  ;;  %v1444_v42 = vpop.trf.xlu1 }
 0x6fe   : > { %1412 = vst [vmem:[#allocation5] sm:$0x33] %v1411_v25 }
 0x701   : > { %v1396_v22 = vpop.f32.mrf.mxu0  ;;  %v1409_v61 = vpop.f32.mrf.mxu1 }
 0x704   : > { %v1445_v23 = vpop.trf.xlu1 }
 0x705   : > { %2455 = vmatmul.msk.bf16.gmra.mxu0 %vm370_vm2, %v1445_v23  ;;  %2471 = vmatmul.msk.bf16.gmra.mxu1 %vm370_vm2, %v1445_v23 }
 0x70c   : > { %v3846_v46 = vpop.trf.xlu1 }
 0x714   : > { %v1447_v9 = vpop.trf.xlu1 }
 0x715   : > { %2456 = vmatmul.msk.bf16.gmra.mxu0 %vm370_vm2, %v1447_v9  ;;  %2472 = vmatmul.msk.bf16.gmra.mxu1 %vm370_vm2, %v1447_v9 }
 0x71c   : > { %v1448_v21 = vpop.trf.xlu1 }
 0x722   : > { %v3850_v59 = vpop.f32.mrf.mxu0  ;;  %v3852_v2 = vpop.f32.mrf.mxu1 }
 0x723   : > { %v1688_v30 = vmax.f32 %v3850_v59, %v3852_v2 }
 0x725   : > { %2457 = vmatmul.msk.bf16.gmra.mxu0 %vm370_vm2, %v1434_v39  ;;  %2473 = vmatmul.msk.bf16.gmra.mxu1 %vm370_vm2, %v1434_v39 }
 0x72a   : > { %v3856_v60 = vpop.f32.mrf.mxu0  ;;  %v3858_v29 = vpop.f32.mrf.mxu1 }
 0x72b   : > { %4702 = vst [vmem:[#allocation9_spill] sm:$0xff] %v3858_v29  ;;  %v1691_v0 = vmax.f32 %v3856_v60, %v3858_v29 }
 0x732   : > { %v3860_v15 = vpop.f32.mrf.mxu0  ;;  %v3862_v45 = vpop.f32.mrf.mxu1 }
 0x733   : > { %v1694_v48 = vmax.f32 %v3860_v15, %v3862_v45 }
 0x735   : > { %2458 = vmatmul.msk.bf16.gmra.mxu0 %vm370_vm2, %v1436_v36  ;;  %2474 = vmatmul.msk.bf16.gmra.mxu1 %vm370_vm2, %v1436_v36 }
 0x73a   : > { %v3866_v34 = vpop.f32.mrf.mxu0  ;;  %v3868_v10 = vpop.f32.mrf.mxu1 }
 0x73b   : > { %v1697_v50 = vmax.f32 %v3866_v34, %v3868_v10 }
 0x742   : > { %v3870_v24 = vpop.f32.mrf.mxu0  ;;  %v3872_v4 = vpop.f32.mrf.mxu1 }
 0x743   : > { %v1700_v27 = vmax.f32 %v3870_v24, %v3872_v4 }
 0x745   : > { %2459 = vmatmul.msk.bf16.gmra.mxu0 %vm370_vm2, %v1438_v28  ;;  %2475 = vmatmul.msk.bf16.gmra.mxu1 %vm370_vm2, %v1438_v28 }
 0x74a   : > { %v3876_v13 = vpop.f32.mrf.mxu0  ;;  %v3878_v41 = vpop.f32.mrf.mxu1 }
 0x74b   : > { %v1703_v11 = vmax.f32 %v3876_v13, %v3878_v41 }
 0x752   : > { %v3880_v51 = vpop.f32.mrf.mxu0  ;;  %v3882_v43 = vpop.f32.mrf.mxu1 }
 0x753   : > { %v1706_v33 = vmax.f32 %v3880_v51, %v3882_v43 }
 0x755   : > { %2460 = vmatmul.msk.bf16.gmra.mxu0 %vm370_vm2, %v1440_v58  ;;  %2476 = vmatmul.msk.bf16.gmra.mxu1 %vm370_vm2, %v1440_v58 }
 0x756   : > { %1707 = vmax.xlane.f32.xlu0 %v1706_v33 }
 0x75a   : > { %v3888_v7 = vpop.f32.mrf.mxu0  ;;  %v3890_v53 = vpop.f32.mrf.mxu1 }
 0x75b   : > { %v1709_v52 = vmax.f32 %v3888_v7, %v3890_v53 }
 0x75d   : > { %1710 = vmax.xlane.f32.xlu2 %v1709_v52 }
 0x75e   : > { %1701 = vmax.xlane.f32.xlu0 %v1700_v27 }
 0x762   : > { %v3896_v49 = vpop.f32.mrf.mxu0  ;;  %v3898_v5 = vpop.f32.mrf.mxu1 }
 0x763   : > { %v1712_v38 = vmax.f32 %v3896_v49, %v3898_v5 }
 0x765   : > { %2461 = vmatmul.msk.bf16.gmra.mxu0 %vm370_vm2, %v1442_v32  ;;  %2477 = vmatmul.msk.bf16.gmra.mxu1 %vm370_vm2, %v1442_v32 }
 0x766   : > { %1695 = vmax.xlane.f32.xlu0 %v1694_v48  ;;  %1704 = vmax.xlane.f32.xlu2 %v1703_v11 }
 0x767   : > { %1713 = vmax.xlane.f32.xlu1 %v1712_v38 }
 0x76a   : > { %v3908_v16 = vpop.f32.mrf.mxu0  ;;  %v3910_v63 = vpop.f32.mrf.mxu1 }
 0x76b   : > { %v1715_v1 = vmax.f32 %v3908_v16, %v3910_v63 }
 0x76e   : > { %1689 = vmax.xlane.f32.xlu0 %v1688_v30  ;;  %1698 = vmax.xlane.f32.xlu2 %v1697_v50 }
 0x772   : > { %v3916_v62 = vpop.f32.mrf.mxu0  ;;  %v3918_v55 = vpop.f32.mrf.mxu1 }
 0x773   : > { %v1718_v20 = vmax.f32 %v3916_v62, %v3918_v55 }
 0x775   : > { %2462 = vmatmul.msk.bf16.gmra.mxu0 %vm370_vm2, %v1444_v42  ;;  %2478 = vmatmul.msk.bf16.gmra.mxu1 %vm370_vm2, %v1444_v42 }
 0x776   : > { %1692 = vmax.xlane.f32.xlu2 %v1691_v0 }
 0x77a   : > { %v3924_v6 = vpop.f32.mrf.mxu0  ;;  %v3926_v57 = vpop.f32.mrf.mxu1 }
 0x77b   : > { %v1721_v14 = vmax.f32 %v3924_v6, %v3926_v57 }
 0x77e   : > { %1716 = vmax.xlane.f32.xlu2 %v1715_v1 }
 0x782   : > { %v3930_v54 = vpop.f32.mrf.mxu0  ;;  %v3932_v40 = vpop.f32.mrf.mxu1 }
 0x783   : > { %v1724_v37 = vmax.f32 %v3930_v54, %v3932_v40 }
 0x785   : > { %2463 = vmatmul.msk.bf16.gmra.mxu0 %vm370_vm2, %v3846_v46  ;;  %2479 = vmatmul.msk.bf16.gmra.mxu1 %vm370_vm2, %v3846_v46 }
 0x786   : > { %1719 = vmax.xlane.f32.xlu2 %v1718_v20 }
 0x78a   : > { %v3940_v17 = vpop.f32.mrf.mxu0  ;;  %v3942_v44 = vpop.f32.mrf.mxu1 }
 0x78b   : > { %v1727_v39 = vmax.f32 %v3940_v17, %v3942_v44 }
 0x78d   : > { %1728 = vmax.xlane.f32.xlu0 %v1727_v39 }
 0x78e   : > { %1722 = vmax.xlane.f32.xlu2 %v1721_v14 }
 0x792   : > { %v3948_v47 = vpop.f32.mrf.mxu0  ;;  %v3950_v36 = vpop.f32.mrf.mxu1 }
 0x793   : > { %v1730_v28 = vmax.f32 %v3948_v47, %v3950_v36 }
 0x795   : > { %2464 = vmatmul.msk.bf16.gmra.mxu0 %vm370_vm2, %v1448_v21  ;;  %2480 = vmatmul.msk.bf16.gmra.mxu1 %vm370_vm2, %v1448_v21 }
 0x796   : > { %1725 = vmax.xlane.f32.xlu2 %v1724_v37 }
 0x79a   : > { %v3956_v12 = vpop.f32.mrf.mxu0  ;;  %v3958_v56 = vpop.f32.mrf.mxu1 }
 0x79b   : > { %v1733_v32 = vmax.f32 %v3956_v12, %v3958_v56 }
 0x79e   : > { %1731 = vmax.xlane.f32.xlu2 %v1730_v28 }
 0x7a2   : > { %v3962_v26 = vpop.f32.mrf.mxu0  ;;  %v3964_v58 = vpop.f32.mrf.mxu1 }
 0x7a3   : > { %4703 = vst [vmem:[#allocation10_spill] sm:$0xff] %v3962_v26  ;;  %v1736_v18 = vmax.f32 %v3962_v26, %v3964_v58 }
 0x7a4   : > { %4704 = vst [vmem:[#allocation15_spill] sm:$0xff] %v3964_v58 }
 0x7a5   : > { %1737 = vmax.xlane.f32.xlu0 %v1736_v18 }
 0x7a6   : > { %1734 = vmax.xlane.f32.xlu2 %v1733_v32 }
 0x7aa   : > { %v3970_v31 = vpop.f32.mrf.mxu0  ;;  %v3972_v3 = vpop.f32.mrf.mxu1 }
 0x7ab   : > { %4705 = vst [vmem:[#allocation16_spill] sm:$0xff] %v3970_v31  ;;  %v1739_v8 = vmax.f32 %v3970_v31, %v3972_v3 }
 0x7ac   : > { %4706 = vst [vmem:[#allocation11_spill] sm:$0xff] %v3972_v3 }
 0x7ae   : > { %1740 = vmax.xlane.f32.xlu2 %v1739_v8 }
 0x7b2   : > { %v3976_v19 = vpop.f32.mrf.mxu0  ;;  %v3978_v35 = vpop.f32.mrf.mxu1 }
 0x7b3   : > { %4707 = vst [vmem:[#allocation12_spill] sm:$0xff] %v3976_v19  ;;  %v1742_v25 = vmax.f32 %v3976_v19, %v3978_v35 }
 0x7b4   : > { %4708 = vst [vmem:[#allocation19_spill] sm:$0xff] %v3978_v35 }
 0x7b5   : > { %1743 = vmax.xlane.f32.xlu0 %v1742_v25 }
 0x7ba   : > { %v3982_v22 = vpop.f32.mrf.mxu0  ;;  %v3984_v61 = vpop.f32.mrf.mxu1 }
 0x7bb   : > { %v1745_v42 = vmax.f32 %v3982_v22, %v3984_v61 }
 0x7bd   : > { %1746 = vmax.xlane.f32.xlu2 %v1745_v42 }
 0x7c2   : > { %v3988_v23 = vpop.f32.mrf.mxu0  ;;  %v3990_v46 = vpop.f32.mrf.mxu1 }
 0x7c3   : > { %4709 = vst [vmem:[#allocation20_spill] sm:$0xff] %v3988_v23  ;;  %v1748_v9 = vmax.f32 %v3988_v23, %v3990_v46 }
 0x7c4   : > { %4710 = vst [vmem:[#allocation17_spill] sm:$0xff] %v3990_v46 }
 0x7c5   : > { %1749 = vmax.xlane.f32.xlu0 %v1748_v9 }
 0x7c9   : > { %v4020_v32 = vpop.xlane.xlu0 %1707 }
 0x7ca   : > { %v3994_v33 = vpop.f32.mrf.mxu0  ;;  %v3996_v52 = vpop.f32.mrf.mxu1 }
 0x7cb   : > { %4711 = vst [vmem:[#allocation18_spill] sm:$0xff] %v3994_v33  ;;  %v1751_v27 = vmax.f32 %v3994_v33, %v3996_v52 }
 0x7cc   : > { %4712 = vst [vmem:[#allocation13_spill] sm:$0xff] %v3996_v52 }
 0x7cd   : > { %1752 = vmax.xlane.f32.xlu2 %v1751_v27 }
 0x7d0   : > { %v4000_v38 = vpop.xlane.xlu2 %1710 }
 0x7d2   : > { %v4002_v48 = vpop.f32.mrf.mxu0  ;;  %v4004_v11 = vpop.f32.mrf.mxu1 }
 0x7d3   : > { %v1754_v30 = vmax.f32 %v4002_v48, %v4004_v11 }
 0x7d5   : > { %1755 = vmax.xlane.f32.xlu0 %v1754_v30 }
 0x7d9   : > { %v4008_v50 = vpop.xlane.xlu2 %1704 }
 0x7da   : > { %v1714_v0 = vpop.xlane.xlu1 %1713  ;;  %v4010_v1 = vpop.f32.mrf.mxu0 }
 0x7db   : > { %v1800_v20 = vsub.f32 %v3896_v49, %v1714_v0  ;;  %v1801_v39 = vsub.f32 %v3898_v5, %v1714_v0  ;;  %v4014_v14 = vpop.f32.mrf.mxu1  ;;  %v4038_v0 = vpop.xlane.xlu0 %1701 }
 0x7dc   : > { %v1757_v21 = vmax.f32 %v4010_v1, %v4014_v14 }
 0x7dd   : > { %v1880_v37 = vmul.f32 1.442695, %v1800_v20  ;;  %v1882_v28 = vmul.f32 1.442695, %v1801_v39 }
 0x7de   : > { %1758 = vmax.xlane.f32.xlu2 %v1757_v21 }
 0x7df   : > { %2731 = vpow2.f32 %v1880_v37 }
 0x7e0   : > { %2733 = vpow2.f32 %v1882_v28 }
 0x7e1   : > { %v4018_v18 = vpop.xlane.xlu2 %1698 }
 0x7e2   : > { %v4022_v8 = vpop.f32.mrf.mxu0 }
 0x7e3   : > { %v4024_v25 = vpop.f32.mrf.mxu1  ;;  %v4052_v3 = vpop.xlane.xlu0 %1695 }
 0x7e4   : > { %v1760_v49 = vmax.f32 %v4022_v8, %v4024_v25 }
 0x7e5   : > { %v4028_v5 = vpop.eup %2731 }
 0x7e6   : > { %1761 = vmax.xlane.f32.xlu0 %v1760_v49  ;;  %4713 = vst [vmem:[#allocation14_spill] sm:$0xff] %v4028_v5  ;;  %v4030_v42 = vpop.eup %2733 }
 0x7e7   : > { %4714 = vst [vmem:[#allocation25_spill] sm:$0xff] %v4030_v42  ;;  %v2000_v20 = vadd.f32 %v4030_v42, %v4028_v5 }
 0x7e9   : > { %v4032_v9 = vpop.xlane.xlu2 %1692 }
 0x7ea   : > { %v4034_v27 = vpop.f32.mrf.mxu0 }
 0x7eb   : > { %v4036_v30 = vpop.f32.mrf.mxu1  ;;  %v4062_v33 = vpop.xlane.xlu0 %1689 }
 0x7ec   : > { %v1763_v39 = vmax.f32 %v4034_v27, %v4036_v30 }
 0x7ee   : > { %2001 = vadd.xlane.f32.xlu0 %v2000_v20  ;;  %1764 = vmax.xlane.f32.xlu2 %v1763_v39 }
 0x7f1   : > { %v4044_v21 = vpop.xlane.xlu2 %1716 }
 0x7f2   : > { %v4046_v37 = vpop.f32.mrf.mxu0 }
 0x7f3   : > { %v4048_v28 = vpop.f32.mrf.mxu1 }
 0x7f4   : > { %v1766_v49 = vmax.f32 %v4046_v37, %v4048_v28 }
 0x7f6   : > { %1767 = vmax.xlane.f32.xlu0 %v1766_v49 }
 0x7f9   : > { %v1720_v31 = vpop.xlane.xlu2 %1719 }
 0x7fa   : > { %v1804_v42 = vsub.f32 %v3916_v62, %v1720_v31  ;;  %v1805_v5 = vsub.f32 %v3918_v55, %v1720_v31  ;;  %v4056_v58 = vpop.f32.mrf.mxu0 }
 0x7fb   : > { %v4058_v20 = vpop.f32.mrf.mxu1 }
 0x7fc   : > { %v1888_v39 = vmul.f32 1.442695, %v1804_v42  ;;  %v1890_v26 = vmul.f32 1.442695, %v1805_v5  ;;  %v1769_v52 = vmax.f32 %v4056_v58, %v4058_v20 }
 0x7fe   : > { %2735 = vpow2.f32 %v1888_v39  ;;  %1770 = vmax.xlane.f32.xlu2 %v1769_v52 }
 0x7ff   : > { %2737 = vpow2.f32 %v1890_v26 }
 0x800   : > { %v1729_v52 = vpop.xlane.xlu0 %1728 }
 0x801   : > { %v1723_v49 = vpop.xlane.xlu2 %1722 }
 0x802   : > { %v1806_v35 = vsub.f32 %v3924_v6, %v1723_v49  ;;  %v1807_v62 = vsub.f32 %v3926_v57, %v1723_v49  ;;  %v4072_v26 = vpop.f32.mrf.mxu0  ;;  %v1810_v49 = vsub.f32 %v3940_v17, %v1729_v52 }
 0x803   : > { %v4074_v42 = vpop.f32.mrf.mxu1 }
 0x804   : > { %v4066_v55 = vpop.eup %2735  ;;  %v1892_v31 = vmul.f32 1.442695, %v1806_v35  ;;  %v1894_v19 = vmul.f32 1.442695, %v1807_v62  ;;  %v1772_v29 = vmax.f32 %v4072_v26, %v4074_v42 }
 0x805   : > { %v4068_v46 = vpop.eup %2737 }
 0x806   : > { %2739 = vpow2.f32 %v1892_v31  ;;  %v2006_v5 = vadd.f32 %v4068_v46, %v4066_v55 }
 0x807   : > { %2741 = vpow2.f32 %v1894_v19  ;;  %v1811_v19 = vsub.f32 %v3942_v44, %v1729_v52 }
 0x808   : > { %2007 = vadd.xlane.f32.xlu0 %v2006_v5 }
 0x809   : > { %v1726_v6 = vpop.xlane.xlu2 %1725 }
 0x80a   : > { %v1808_v57 = vsub.f32 %v3930_v54, %v1726_v6  ;;  %v1809_v39 = vsub.f32 %v3932_v40, %v1726_v6  ;;  %v1900_v54 = vmul.f32 1.442695, %v1810_v49  ;;  %v1902_v40 = vmul.f32 1.442695, %v1811_v19 }
 0x80b   : > { %v4092_v44 = vpop.f32.mrf.mxu1 }
 0x80c   : > { %v4078_v35 = vpop.eup %2739  ;;  %v1896_v62 = vmul.f32 1.442695, %v1808_v57  ;;  %v1898_v31 = vmul.f32 1.442695, %v1809_v39  ;;  %v4090_v39 = vpop.f32.mrf.mxu0 }
 0x80d   : > { %v4081_v23 = vpop.eup %2741 }
 0x80e   : > { %2743 = vpow2.f32 %v1896_v62  ;;  %v2009_v5 = vadd.f32 %v4081_v23, %v4078_v35  ;;  %v1796_v62 = vsub.f32 %v3880_v51, %v4020_v32 }
 0x80f   : > { %2745 = vpow2.f32 %v1898_v31 }
 0x810   : > { %2010 = vadd.xlane.f32.xlu2 %v2009_v5  ;;  %1773 = vmax.xlane.f32.xlu0 %v1772_v29  ;;  %2747 = vpow2.f32 %v1900_v54  ;;  %v1797_v29 = vsub.f32 %v3882_v43, %v4020_v32  ;;  %v1872_v19 = vmul.f32 1.442695, %v1796_v62  ;;  %v1792_v43 = vsub.f32 %v3870_v24, %v4038_v0 }
 0x811   : > { %v1732_v6 = vpop.xlane.xlu2 %1731  ;;  %2749 = vpow2.f32 %v1902_v40  ;;  %v1793_v40 = vsub.f32 %v3872_v4, %v4038_v0  ;;  %v1802_v4 = vsub.f32 %v3908_v16, %v4044_v21  ;;  %v1798_v16 = vsub.f32 %v3888_v7, %v4000_v38 }
 0x812   : > { %v1812_v17 = vsub.f32 %v3948_v47, %v1732_v6  ;;  %v1813_v57 = vsub.f32 %v3950_v36, %v1732_v6  ;;  %v1775_v47 = vmax.f32 %v4090_v39, %v4092_v44  ;;  %v1874_v51 = vmul.f32 1.442695, %v1797_v29 }
 0x813   : > { %v1866_v29 = vmul.f32 1.442695, %v1793_v40  ;;  %v4126_v24 = vpop.f32.mrf.mxu1  ;;  %v1884_v40 = vmul.f32 1.442695, %v1802_v4 }
 0x814   : > { %v4094_v52 = vpop.eup %2743  ;;  %v1904_v31 = vmul.f32 1.442695, %v1812_v17  ;;  %v1906_v49 = vmul.f32 1.442695, %v1813_v57 }
 0x815   : > { %4715 = vst [vmem:[#allocation23_spill] sm:$0xff] %v4094_v52  ;;  %v4098_v5 = vpop.eup %2745 }
 0x816   : > { %4716 = vst [vmem:[#allocation24_spill] sm:$0xff] %v4098_v5  ;;  %2751 = vpow2.f32 %v1904_v31  ;;  %v2012_v36 = vadd.f32 %v4098_v5, %v4094_v52  ;;  %v4106_v54 = vpop.eup %2747 }
 0x817   : > { %2753 = vpow2.f32 %v1906_v49  ;;  %v4108_v6 = vpop.eup %2749  ;;  %v1864_v49 = vmul.f32 1.442695, %v1792_v43 }
 0x818   : > { %2013 = vadd.xlane.f32.xlu0 %v2012_v36  ;;  %1776 = vmax.xlane.f32.xlu2 %v1775_v47  ;;  %2755 = vpow2.f32 %v1872_v19  ;;  %v2015_v31 = vadd.f32 %v4108_v6, %v4106_v54  ;;  %v4124_v47 = vpop.f32.mrf.mxu0 }
 0x819   : > { %2757 = vpow2.f32 %v1874_v51  ;;  %v4118_v57 = vpop.xlane.xlu2 %1734  ;;  %v1778_v0 = vmax.f32 %v4124_v47, %v4126_v24  ;;  %v1803_v51 = vsub.f32 %v3910_v63, %v4044_v21  ;;  %v1799_v63 = vsub.f32 %v3890_v53, %v4000_v38 }
 0x81a   : > { %2759 = vpow2.f32 %v1864_v49 }
 0x81b   : > { %2761 = vpow2.f32 %v1866_v29  ;;  %v4150_v52 = vpop.f32.mrf.mxu1 }
 0x81c   : > { %v4110_v17 = vpop.eup %2751  ;;  %2763 = vpow2.f32 %v1884_v40 }
 0x81d   : > { %v4114_v32 = vpop.eup %2753 }
 0x81e   : > { %v2018_v62 = vadd.f32 %v4114_v32, %v4110_v17  ;;  %v4128_v36 = vpop.eup %2755 }
 0x81f   : > { %4717 = vst [vmem:[#allocation28_spill] sm:$0xff] %v4128_v36  ;;  %v4130_v19 = vpop.eup %2757 }
 0x820   : > { %2019 = vadd.xlane.f32.xlu0 %v2018_v62  ;;  %2016 = vadd.xlane.f32.xlu2 %v2015_v31  ;;  %4718 = vst [vmem:[#allocation29_spill] sm:$0xff] %v4130_v19  ;;  %v1994_v43 = vadd.f32 %v4130_v19, %v4128_v36  ;;  %v1886_v31 = vmul.f32 1.442695, %v1803_v51  ;;  %v4142_v49 = vpop.eup %2759  ;;  %v4148_v29 = vpop.f32.mrf.mxu0  ;;  %v1878_v51 = vmul.f32 1.442695, %v1799_v63 }
 0x821   : > { %v4140_v62 = vpop.xlane.xlu2 %1740  ;;  %4719 = vst [vmem:[#allocation21_spill] sm:$0xff] %v4142_v49  ;;  %v4144_v5 = vpop.eup %2761  ;;  %v1781_v21 = vmax.f32 %v4148_v29, %v4150_v52 }
 0x822   : > { %4720 = vst [vmem:[#allocation22_spill] sm:$0xff] %v4144_v5  ;;  %2765 = vpow2.f32 %v1886_v31  ;;  %v1988_v4 = vadd.f32 %v4144_v5, %v4142_v49  ;;  %v4160_v36 = vpop.eup %2763  ;;  %v1794_v31 = vsub.f32 %v3876_v13, %v4008_v50 }
 0x828   : > { %1995 = vadd.xlane.f32.xlu0 %v1994_v43  ;;  %1779 = vmax.xlane.f32.xlu2 %v1778_v0  ;;  %v1876_v0 = vmul.f32 1.442695, %v1798_v16  ;;  %v4162_v53 = vpop.eup %2765  ;;  %v1795_v16 = vsub.f32 %v3878_v41, %v4008_v50  ;;  %v1814_v41 = vsub.f32 %v3956_v12, %v4118_v57  ;;  %v1815_v50 = vsub.f32 %v3958_v56, %v4118_v57 }
 0x829   : > { %4721 = vst [vmem:[#allocation32_spill] sm:$0xff] %v4162_v53 }
 0x82a   : > { %2767 = vpow2.f32 %v1876_v0 }
 0x82b   : > { %2769 = vpow2.f32 %v1878_v51 }
 0x830   : > { %1989 = vadd.xlane.f32.xlu0 %v1988_v4  ;;  %1782 = vmax.xlane.f32.xlu2 %v1781_v21  ;;  %v1747_v7 = vpop.xlane.xlu2 %1746  ;;  %v4170_v63 = vpop.eup %2767  ;;  %v1870_v21 = vmul.f32 1.442695, %v1795_v16 }
 0x831   : > { %v1822_v43 = vsub.f32 %v3982_v22, %v1747_v7  ;;  %v1823_v19 = vsub.f32 %v3984_v61, %v1747_v7  ;;  %v2003_v22 = vadd.f32 %v4162_v53, %v4160_v36  ;;  %v1868_v61 = vmul.f32 1.442695, %v1794_v31  ;;  %4722 = vst [vmem:[#allocation33_spill] sm:$0xff] %v4170_v63  ;;  %v4172_v4 = vpop.xlane.xlu0 %1737 }
 0x833   : > { %v1924_v38 = vmul.f32 1.442695, %v1822_v43  ;;  %v1926_v40 = vmul.f32 1.442695, %v1823_v19  ;;  %v4174_v19 = vpop.eup %2769  ;;  %v1908_v43 = vmul.f32 1.442695, %v1814_v41 }
 0x834   : > { %4723 = vst [vmem:[#allocation26_spill] sm:$0xff] %v4174_v19  ;;  %v1997_v7 = vadd.f32 %v4174_v19, %v4170_v63  ;;  %v2268_v41 = vld [vmem:[%s4582_s8] sm:$0xff] }
 0x835   : > { %2771 = vpow2.f32 %v1924_v38  ;;  %v1910_v38 = vmul.f32 1.442695, %v1815_v50 }
 0x836   : > { %2773 = vpow2.f32 %v1926_v40 }
 0x837   : > { %2775 = vpow2.f32 %v1868_v61 }
 0x838   : > { %2004 = vadd.xlane.f32.xlu2 %v2003_v22  ;;  %2777 = vpow2.f32 %v1870_v21 }
 0x839   : > { %v4188_v40 = vpop.xlane.xlu0 %1743  ;;  %2779 = vpow2.f32 %v1908_v43 }
 0x83a   : > { %2781 = vpow2.f32 %v1910_v38 }
 0x83b   : > { %v4176_v0 = vpop.eup %2771 }
 0x83c   : > { %4724 = vst [vmem:[#allocation27_spill] sm:$0xff] %v4176_v0  ;;  %v4178_v13 = vpop.eup %2773 }
 0x83d   : > { %4725 = vst [vmem:[#allocation34_spill] sm:$0xff] %v4178_v13  ;;  %v2033_v51 = vadd.f32 %v4178_v13, %v4176_v0  ;;  %v4190_v31 = vpop.eup %2775 }
 0x83e   : > { %4726 = vst [vmem:[#allocation35_spill] sm:$0xff] %v4190_v31  ;;  %v4192_v16 = vpop.eup %2777 }
 0x83f   : > { %2034 = vadd.xlane.f32.xlu1 %v2033_v51  ;;  %4727 = vst [vmem:[#allocation30_spill] sm:$0xff] %v4192_v16  ;;  %v1991_v12 = vadd.f32 %v4192_v16, %v4190_v31  ;;  %v4198_v57 = vpop.eup %2779 }
 0x840   : > { %1998 = vadd.xlane.f32.xlu2 %v1997_v7  ;;  %v4200_v22 = vpop.eup %2781  ;;  %v4209_v50 = vpop.xlane.xlu2 %1752 }
 0x841   : > { %v4196_v56 = vpop.xlane.xlu0 %1749  ;;  %v2021_v61 = vadd.f32 %v4200_v22, %v4198_v57 }
 0x848   : > { %1992 = vadd.xlane.f32.xlu2 %v1991_v12 }
 0x849   : > { %v4204_v21 = vpop.xlane.xlu0 %1755 }
 0x850   : > { %2022 = vadd.xlane.f32.xlu2 %v2021_v61 }
 0x851   : > { %v4213_v7 = vpop.xlane.xlu2 %1758 }
 0x858   : > { %2271 = vperm.xlu1 %2532, %v2268_v41  }
 0x859   : > { %v4211_v51 = vpop.xlane.xlu0 %1761 }
 0x861   : > { %v4215_v43 = vpop.xlane.xlu0 %2001  ;;  %v4217_v38 = vpop.xlane.xlu2 %1764 }
 0x869   : > { %v1768_v12 = vpop.xlane.xlu0 %1767 }
 0x86a   : > { %v1836_v61 = vsub.f32 %v4046_v37, %v1768_v12  ;;  %v1837_v13 = vsub.f32 %v4048_v28, %v1768_v12 }
 0x86c   : > { %v1952_v0 = vmul.f32 1.442695, %v1836_v61  ;;  %v1954_v5 = vmul.f32 1.442695, %v1837_v13 }
 0x86e   : > { %2783 = vpow2.f32 %v1952_v0 }
 0x86f   : > { %2785 = vpow2.f32 %v1954_v5 }
 0x871   : > { %v1771_v41 = vpop.xlane.xlu2 %1770 }
 0x872   : > { %v1838_v49 = vsub.f32 %v4056_v58, %v1771_v41  ;;  %v1839_v16 = vsub.f32 %v4058_v20, %v1771_v41 }
 0x874   : > { %v4223_v31 = vpop.eup %2783  ;;  %v1956_v19 = vmul.f32 1.442695, %v1838_v49  ;;  %v1958_v63 = vmul.f32 1.442695, %v1839_v16 }
 0x875   : > { %v4225_v53 = vpop.eup %2785 }
 0x876   : > { %2787 = vpow2.f32 %v1956_v19  ;;  %v2054_v37 = vadd.f32 %v4225_v53, %v4223_v31 }
 0x877   : > { %2789 = vpow2.f32 %v1958_v63 }
 0x878   : > { %2055 = vadd.xlane.f32.xlu0 %v2054_v37 }
 0x87b   : > { %v2008_v28 = vpop.xlane.xlu0 %2007 }
 0x87c   : > { %v4229_v0 = vpop.eup %2787  ;;  %2791 = vrcp.f32 %v2008_v28 }
 0x87d   : > { %v4231_v5 = vpop.eup %2789 }
 0x87e   : > { %v2057_v58 = vadd.f32 %v4231_v5, %v4229_v0 }
 0x880   : > { %2058 = vadd.xlane.f32.xlu2 %v2057_v58 }
 0x882   : > { %v2792_v12 = vpop.eup %2791 }
 0x883   : > { %v2011_v20 = vpop.xlane.xlu2 %2010  ;;  %v1774_v49 = vpop.xlane.xlu0 %1773  ;;  %v4238_v37 = vmul.f32 %v2792_v12, %v4066_v55  ;;  %v4244_v28 = vmul.f32 %v2792_v12, %v4068_v46 }
 0x884   : > { %2793 = vrcp.f32 %v2011_v20  ;;  %v1840_v19 = vsub.f32 %v4072_v26, %v1774_v49  ;;  %v1841_v13 = vsub.f32 %v4074_v42, %v1774_v49 }
 0x886   : > { %v1960_v16 = vmul.f32 1.442695, %v1840_v19  ;;  %v1962_v63 = vmul.f32 1.442695, %v1841_v13 }
 0x888   : > { %2795 = vpow2.f32 %v1960_v16 }
 0x889   : > { %2797 = vpow2.f32 %v1962_v63 }
 0x88a   : > { %v2794_v61 = vpop.eup %2793 }
 0x88b   : > { %v1777_v41 = vpop.xlane.xlu2 %1776  ;;  %v4241_v58 = vmul.f32 %v2794_v61, %v4078_v35  ;;  %v4247_v26 = vmul.f32 %v2794_v61, %v4081_v23 }
 0x88c   : > { %v1842_v42 = vsub.f32 %v4090_v39, %v1777_v41  ;;  %v1843_v20 = vsub.f32 %v4092_v44, %v1777_v41 }
 0x88e   : > { %v4255_v19 = vpop.eup %2795  ;;  %v1964_v35 = vmul.f32 1.442695, %v1842_v42  ;;  %v1966_v13 = vmul.f32 1.442695, %v1843_v20  ;;  %v1832_v42 = vsub.f32 %v4022_v8, %v4211_v51  ;;  %v1789_v8 = vsub.f32 %v3862_v45, %v4052_v3 }
 0x88f   : > { %v4257_v16 = vpop.eup %2797 }
 0x890   : > { %2799 = vpow2.f32 %v1964_v35  ;;  %v2060_v23 = vadd.f32 %v4257_v16, %v4255_v19  ;;  %v1858_v45 = vmul.f32 1.442695, %v1789_v8 }
 0x891   : > { %2801 = vpow2.f32 %v1966_v13  ;;  %v1833_v13 = vsub.f32 %v4024_v25, %v4211_v51  ;;  %v1834_v25 = vsub.f32 %v4034_v27, %v4217_v38 }
 0x892   : > { %2061 = vadd.xlane.f32.xlu0 %v2060_v23  ;;  %v1944_v23 = vmul.f32 1.442695, %v1832_v42 }
 0x893   : > { %v4261_v46 = vpop.xlane.xlu2 %2016  ;;  %v1946_v55 = vmul.f32 1.442695, %v1833_v13 }
 0x896   : > { %v4263_v39 = vpop.eup %2799 }
 0x897   : > { %v4265_v44 = vpop.eup %2801 }
 0x898   : > { %v2063_v63 = vadd.f32 %v4265_v44, %v4263_v39 }
 0x89a   : > { %2064 = vadd.xlane.f32.xlu2 %v2063_v63  ;;  %v1788_v63 = vsub.f32 %v3860_v15, %v4052_v3  ;;  %v1835_v15 = vsub.f32 %v4036_v30, %v4217_v38  ;;  %v1948_v3 = vmul.f32 1.442695, %v1834_v25  ;;  %v1791_v30 = vsub.f32 %v3868_v10, %v4018_v18 }
 0x89b   : > { %v1780_v12 = vpop.xlane.xlu2 %1779 }
 0x89c   : > { %v1844_v61 = vsub.f32 %v4124_v47, %v1780_v12  ;;  %v1845_v41 = vsub.f32 %v4126_v24, %v1780_v12  ;;  %v1862_v10 = vmul.f32 1.442695, %v1791_v30 }
 0x89e   : > { %v1968_v20 = vmul.f32 1.442695, %v1844_v61  ;;  %v1970_v35 = vmul.f32 1.442695, %v1845_v41 }
 0x8a0   : > { %2803 = vpow2.f32 %v1968_v20 }
 0x8a1   : > { %2805 = vpow2.f32 %v1970_v35  ;;  %v1828_v35 = vsub.f32 %v4002_v48, %v4204_v21 }
 0x8a2   : > { %2807 = vpow2.f32 %v1944_v23  ;;  %v1829_v23 = vsub.f32 %v4004_v11, %v4204_v21  ;;  %v1784_v21 = vsub.f32 %v3850_v59, %v4062_v33 }
 0x8a3   : > { %v1783_v49 = vpop.xlane.xlu2 %1782  ;;  %2809 = vpow2.f32 %v1946_v55  ;;  %v1790_v55 = vsub.f32 %v3866_v34, %v4018_v18 }
 0x8a4   : > { %v1846_v47 = vsub.f32 %v4148_v29, %v1783_v49  ;;  %v1847_v24 = vsub.f32 %v4150_v52, %v1783_v49  ;;  %v1856_v29 = vmul.f32 1.442695, %v1788_v63  ;;  %v1950_v49 = vmul.f32 1.442695, %v1835_v15  ;;  %v2014_v15 = vpop.xlane.xlu0 %2013 }
 0x8a5   : > { %v1860_v63 = vmul.f32 1.442695, %v1790_v55  ;;  %v1938_v8 = vmul.f32 1.442695, %v1829_v23  ;;  %v4728_v23 = vld [vmem:[#allocation9_spill] sm:$0xff] }
 0x8a6   : > { %v4281_v12 = vpop.eup %2803  ;;  %v1972_v51 = vmul.f32 1.442695, %v1846_v47  ;;  %v1974_v61 = vmul.f32 1.442695, %v1847_v24  ;;  %v1936_v24 = vmul.f32 1.442695, %v1828_v35 }
 0x8a7   : > { %v4285_v41 = vpop.eup %2805 }
 0x8a8   : > { %2811 = vpow2.f32 %v1972_v51  ;;  %v2066_v52 = vadd.f32 %v4285_v41, %v4281_v12  ;;  %v4293_v27 = vpop.eup %2807 }
 0x8a9   : > { %2813 = vpow2.f32 %v1974_v61  ;;  %v4297_v20 = vpop.eup %2809  ;;  %v1785_v61 = vsub.f32 %v3852_v2, %v4062_v33 }
 0x8aa   : > { %2067 = vadd.xlane.f32.xlu0 %v2066_v52  ;;  %2815 = vpow2.f32 %v1856_v29  ;;  %v2048_v34 = vadd.f32 %v4297_v20, %v4293_v27  ;;  %v1830_v29 = vsub.f32 %v4010_v1, %v4213_v7  ;;  %v1831_v52 = vsub.f32 %v4014_v14, %v4213_v7 }
 0x8ab   : > { %v4291_v42 = vpop.xlane.xlu2 %2004  ;;  %2817 = vpow2.f32 %v1858_v45  ;;  %v1848_v45 = vmul.f32 1.442695, %v1784_v21  ;;  %v1786_v1 = vsub.f32 %v3856_v60, %v4032_v9 }
 0x8ac   : > { %2819 = vpow2.f32 %v1948_v3  ;;  %v1940_v2 = vmul.f32 1.442695, %v1830_v29  ;;  %v1942_v30 = vmul.f32 1.442695, %v1831_v52 }
 0x8ad   : > { %2821 = vpow2.f32 %v1950_v49  ;;  %v1850_v49 = vmul.f32 1.442695, %v1785_v61 }
 0x8ae   : > { %v4301_v38 = vpop.eup %2811  ;;  %2823 = vpow2.f32 %v1860_v63  ;;  %v1787_v63 = vsub.f32 %v4728_v23, %v4032_v9 }
 0x8af   : > { %v4305_v13 = vpop.eup %2813  ;;  %2825 = vpow2.f32 %v1862_v10  ;;  %v1852_v10 = vmul.f32 1.442695, %v1786_v1 }
 0x8b0   : > { %v2069_v47 = vadd.f32 %v4305_v13, %v4301_v38  ;;  %v4313_v18 = vpop.eup %2815  ;;  %2827 = vpow2.f32 %v1936_v24  ;;  %v4730_v24 = vld [vmem:[#allocation17_spill] sm:$0xff]  ;;  %v1854_v29 = vmul.f32 1.442695, %v1787_v63  ;;  %v4733_v63 = vld [vmem:[#allocation18_spill] sm:$0xff] }
 0x8b1   : > { %v4315_v48 = vpop.eup %2817  ;;  %2829 = vpow2.f32 %v1938_v8  ;;  %v1825_v60 = vsub.f32 %v4730_v24, %v4196_v56  ;;  %v2020_v8 = vpop.xlane.xlu0 %2019 }
 0x8b2   : > { %2049 = vadd.xlane.f32.xlu0 %v2048_v34  ;;  %2070 = vadd.xlane.f32.xlu2 %v2069_v47  ;;  %v4319_v11 = vpop.eup %2819  ;;  %v1982_v59 = vadd.f32 %v4315_v48, %v4313_v18  ;;  %2831 = vpow2.f32 %v1848_v45  ;;  %v4729_v34 = vld [vmem:[#allocation20_spill] sm:$0xff] }
 0x8b3   : > { %v4317_v25 = vpop.xlane.xlu2 %1998  ;;  %v4323_v51 = vpop.eup %2821  ;;  %2833 = vpow2.f32 %v1850_v49  ;;  %v1824_v47 = vsub.f32 %v4729_v34, %v4196_v56  ;;  %v4731_v49 = vld [vmem:[#allocation12_spill] sm:$0xff]  ;;  %v1826_v34 = vsub.f32 %v4733_v63, %v4209_v50 }
 0x8b4   : > { %v2051_v3 = vadd.f32 %v4323_v51, %v4319_v11  ;;  %v4335_v55 = vpop.eup %2823  ;;  %2835 = vpow2.f32 %v1940_v2  ;;  %v1820_v2 = vsub.f32 %v4731_v49, %v4188_v40 }
 0x8b5   : > { %v4337_v33 = vpop.eup %2825  ;;  %2837 = vpow2.f32 %v1942_v30  ;;  %v1928_v9 = vmul.f32 1.442695, %v1824_v47  ;;  %v4732_v30 = vld [vmem:[#allocation19_spill] sm:$0xff]  ;;  %v4734_v47 = vld [vmem:[#allocation13_spill] sm:$0xff] }
 0x8b6   : > { %v4343_v7 = vpop.eup %2827  ;;  %v1985_v61 = vadd.f32 %v4337_v33, %v4335_v55  ;;  %2839 = vrcp.f32 %v2020_v8  ;;  %v1821_v23 = vsub.f32 %v4732_v30, %v4188_v40 }
 0x8b7   : > { %v4345_v35 = vpop.eup %2829  ;;  %2841 = vpow2.f32 %v1852_v10  ;;  %v1827_v10 = vsub.f32 %v4734_v47, %v4209_v50 }
 0x8b8   : > { %v2042_v21 = vadd.f32 %v4345_v35, %v4343_v7  ;;  %v4357_v52 = vpop.eup %2831  ;;  %v1922_v40 = vmul.f32 1.442695, %v1821_v23  ;;  %v4735_v23 = vld [vmem:[#allocation10_spill] sm:$0xff] }
 0x8b9   : > { %v4359_v45 = vpop.eup %2833  ;;  %v1816_v63 = vsub.f32 %v4735_v23, %v4172_v4 }
 0x8ba   : > { %1983 = vadd.xlane.f32.xlu0 %v1982_v59  ;;  %2052 = vadd.xlane.f32.xlu2 %v2051_v3  ;;  %v1930_v59 = vmul.f32 1.442695, %v1825_v60  ;;  %v4361_v3 = vpop.eup %2835  ;;  %v1920_v60 = vmul.f32 1.442695, %v1820_v2  ;;  %v1976_v8 = vadd.f32 %v4359_v45, %v4357_v52 }
 0x8bb   : > { %v4341_v14 = vpop.xlane.xlu2 %1992  ;;  %v4365_v1 = vpop.eup %2837 }
 0x8bc   : > { %v2840_v24 = vpop.eup %2839 }
 0x8c2   : > { %2043 = vadd.xlane.f32.xlu0 %v2042_v21  ;;  %1986 = vadd.xlane.f32.xlu2 %v1985_v61  ;;  %v2045_v21 = vadd.f32 %v4365_v1, %v4361_v3  ;;  %v4378_v61 = vpop.eup %2841 }
 0x8c3   : > { %v2023_v56 = vpop.xlane.xlu2 %2022 }
 0x8c4   : > { %2843 = vrcp.f32 %v2023_v56  ;;  %v1934_v56 = vmul.f32 1.442695, %v1827_v10 }
 0x8c5   : > { %2845 = vpow2.f32 %v1854_v29 }
 0x8c6   : > { %2847 = vpow2.f32 %v1928_v9  ;;  %v1932_v9 = vmul.f32 1.442695, %v1826_v34 }
 0x8c7   : > { %2849 = vpow2.f32 %v1930_v59  ;;  %v2132_v59 = vmul.f32 %v2840_v24, %v4110_v17 }
 0x8c8   : > { %2851 = vrcp.f32 %v4261_v46  ;;  %v2133_v46 = vmul.f32 %v2840_v24, %v4114_v32  ;;  %v4737_v32 = vld [vmem:[#allocation16_spill] sm:$0xff] }
 0x8c9   : > { %2853 = vrcp.f32 %v2014_v15  ;;  %v4736_v15 = vld [vmem:[#allocation15_spill] sm:$0xff] }
 0x8ca   : > { %v2844_v29 = vpop.eup %2843  ;;  %1977 = vadd.xlane.f32.xlu0 %v1976_v8  ;;  %2046 = vadd.xlane.f32.xlu2 %v2045_v21  ;;  %2855 = vpow2.f32 %v1920_v60  ;;  %v1817_v47 = vsub.f32 %v4736_v15, %v4172_v4  ;;  %v1912_v21 = vmul.f32 1.442695, %v1816_v63  ;;  %v4740_v63 = vld [vmem:[#allocation24_spill] sm:$0xff] }
 0x8cb   : > { %v4380_v50 = vpop.eup %2845  ;;  %v2134_v49 = vmul.f32 %v2844_v29, %v4198_v57  ;;  %v2135_v2 = vmul.f32 %v2844_v29, %v4200_v22  ;;  %2857 = vpow2.f32 %v1922_v40  ;;  %v1818_v57 = vsub.f32 %v4737_v32, %v4140_v62  ;;  %v4738_v22 = vld [vmem:[#allocation11_spill] sm:$0xff] }
 0x8cc   : > { %v4386_v30 = vpop.eup %2847  ;;  %2859 = vpow2.f32 %v1932_v9  ;;  %v1819_v24 = vsub.f32 %v4738_v22, %v4140_v62  ;;  %v1979_v4 = vadd.f32 %v4380_v50, %v4378_v61  ;;  %v1914_v40 = vmul.f32 1.442695, %v1817_v47 }
 0x8cd   : > { %v4390_v34 = vpop.eup %2849  ;;  %v2182_v10 = vpack.c.bf16 %v2134_v49, %v2132_v59  ;;  %v2183_v17 = vpack.c.bf16 %v2135_v2, %v2133_v46  ;;  %2861 = vpow2.f32 %v1934_v56  ;;  %v1916_v49 = vmul.f32 1.442695, %v1818_v57  ;;  %v4739_v2 = vld [vmem:[#allocation23_spill] sm:$0xff] }
 0x8ce   : > { %v2852_v8 = vpop.eup %2851  ;;  %v2036_v29 = vadd.f32 %v4390_v34, %v4386_v30  ;;  %v1918_v56 = vmul.f32 1.442695, %v1819_v24  ;;  %2863 = vpow2.f32 %v1912_v21  ;;  %v4741_v21 = vpack.c.bf16 %v4241_v58, %v4238_v37  ;;  %v4744_v37 = vld [vmem:[#allocation14_spill] sm:$0xff] }
 0x8cf   : > { %2209 = vmatpush.bf16.xpose.msrb.mxu2 %v2182_v10  ;;  %2222 = vmatpush.bf16.xpose.msrb.mxu3 %v2183_v17  ;;  %v2854_v60 = vpop.eup %2853  ;;  %v2130_v59 = vmul.f32 %v2852_v8, %v4106_v54  ;;  %v2131_v46 = vmul.f32 %v2852_v8, %v4108_v6  ;;  %2865 = vpow2.f32 %v1914_v40 }
 0x8d0   : > { %v4404_v9 = vpop.eup %2855  ;;  %v2128_v23 = vmul.f32 %v2854_v60, %v4739_v2  ;;  %v2129_v15 = vmul.f32 %v2854_v60, %v4740_v63  ;;  %2867 = vpow2.f32 %v1916_v49  ;;  %v1996_v60 = vpop.xlane.xlu0 %1995 }
 0x8d1   : > { %v4406_v62 = vpop.eup %2857  ;;  %2869 = vpow2.f32 %v1918_v56 }
 0x8d2   : > { %2037 = vadd.xlane.f32.xlu0 %v2036_v29  ;;  %1980 = vadd.xlane.f32.xlu2 %v1979_v4  ;;  %v4410_v10 = vpop.eup %2859  ;;  %v2180_v54 = vpack.c.bf16 %v2130_v59, %v2128_v23  ;;  %v2181_v6 = vpack.c.bf16 %v2131_v46, %v2129_v15  ;;  %2871 = vrcp.f32 %v4291_v42  ;;  %v2030_v17 = vadd.f32 %v4406_v62, %v4404_v9  ;;  %v4743_v46 = vld [vmem:[#allocation32_spill] sm:$0xff]  ;;  %v4746_v15 = vld [vmem:[#allocation33_spill] sm:$0xff] }
 0x8d3   : > { %v4412_v47 = vpop.eup %2861  ;;  %2873 = vrcp.f32 %v4215_v43  ;;  %v4742_v29 = vpack.c.bf16 %v4247_v26, %v4244_v28  ;;  %v4745_v28 = vld [vmem:[#allocation25_spill] sm:$0xff] }
 0x8d4   : > { %v2039_v8 = vadd.f32 %v4412_v47, %v4410_v10  ;;  %v4419_v32 = vpop.eup %2863  ;;  %2875 = vrcp.f32 %v4317_v25 }
 0x8d5   : > { %v4422_v57 = vpop.eup %2865  ;;  %2877 = vrcp.f32 %v1996_v60  ;;  %v4749_v60 = vld [vmem:[#allocation29_spill] sm:$0xff] }
 0x8d6   : > { %v4424_v22 = vpop.eup %2867  ;;  %v2024_v40 = vadd.f32 %v4422_v57, %v4419_v32  ;;  %2879 = vrcp.f32 %v4341_v14 }
 0x8d7   : > { %2210 = vmatpush.bf16.xpose.msrb.mxu2 %v2180_v54  ;;  %2223 = vmatpush.bf16.xpose.msrb.mxu3 %v2181_v6  ;;  %v4426_v24 = vpop.eup %2869  ;;  %v4747_v54 = vld [vmem:[#allocation26_spill] sm:$0xff] }
 0x8d8   : > { %v2872_v42 = vpop.eup %2871  ;;  %v2027_v43 = vadd.f32 %v4426_v24, %v4424_v22  ;;  %v1990_v23 = vpop.xlane.xlu0 %1989 }
 0x8d9   : > { %v2874_v4 = vpop.eup %2873  ;;  %v2122_v59 = vmul.f32 %v2872_v42, %v4160_v36  ;;  %v2123_v49 = vmul.f32 %v2872_v42, %v4743_v46  ;;  %2881 = vrcp.f32 %v1990_v23 }
 0x8da   : > { %2031 = vadd.xlane.f32.xlu0 %v2030_v17  ;;  %2040 = vadd.xlane.f32.xlu2 %v2039_v8  ;;  %v2120_v58 = vmul.f32 %v2874_v4, %v4744_v37  ;;  %v2121_v26 = vmul.f32 %v2874_v4, %v4745_v28  ;;  %v2876_v25 = vpop.eup %2875  ;;  %v4748_v17 = vld [vmem:[#allocation28_spill] sm:$0xff] }
 0x8db   : > { %v2878_v63 = vpop.eup %2877  ;;  %v2118_v36 = vmul.f32 %v2876_v25, %v4746_v15  ;;  %v2119_v6 = vmul.f32 %v2876_v25, %v4747_v54 }
 0x8dc   : > { %v2176_v56 = vpack.c.bf16 %v2122_v59, %v2120_v58  ;;  %v2177_v2 = vpack.c.bf16 %v2123_v49, %v2121_v26  ;;  %v2116_v8 = vmul.f32 %v2878_v63, %v4748_v17  ;;  %v2117_v42 = vmul.f32 %v2878_v63, %v4749_v60  ;;  %v2880_v4 = vpop.eup %2879  ;;  %v4750_v59 = vld [vmem:[#allocation35_spill] sm:$0xff]  ;;  %v4751_v49 = vld [vmem:[#allocation30_spill] sm:$0xff]  ;;  %v4752_v58 = vld [vmem:[#allocation21_spill] sm:$0xff] }
 0x8dd   : > { %v2114_v46 = vmul.f32 %v2880_v4, %v4750_v59  ;;  %v2115_v14 = vmul.f32 %v2880_v4, %v4751_v49  ;;  %v4753_v26 = vld [vmem:[#allocation22_spill] sm:$0xff] }
 0x8df   : > { %2211 = vmatpush.bf16.xpose.msrb.mxu2 %v4741_v21  ;;  %2224 = vmatpush.bf16.xpose.msrb.mxu3 %v4742_v29  ;;  %v2174_v21 = vpack.c.bf16 %v2118_v36, %v2116_v8  ;;  %v2175_v29 = vpack.c.bf16 %v2119_v6, %v2117_v42 }
 0x8e2   : > { %2028 = vadd.xlane.f32.xlu0 %v2027_v43  ;;  %2025 = vadd.xlane.f32.xlu2 %v2024_v40  ;;  %v2882_v40 = vpop.eup %2881 }
 0x8e3   : > { %v2112_v28 = vmul.f32 %v2882_v40, %v4752_v58 }
 0x8e7   : > { %2212 = vmatpush.bf16.xpose.msrb.mxu2 %v2176_v56  ;;  %2225 = vmatpush.bf16.xpose.msrb.mxu3 %v2177_v2  ;;  %v2113_v56 = vmul.f32 %v2882_v40, %v4753_v26  ;;  %v2172_v2 = vpack.c.bf16 %v2114_v46, %v2112_v28 }
 0x8e9   : > { %v2173_v25 = vpack.c.bf16 %v2115_v14, %v2113_v56 }
 0x8eb   : > { %v2056_v43 = vpop.xlane.xlu0 %2055 }
 0x8ec   : > { %2883 = vrcp.f32 %v2056_v43 }
 0x8ef   : > { %2213 = vmatpush.bf16.xpose.msrb.mxu2 %v2174_v21  ;;  %2226 = vmatpush.bf16.xpose.msrb.mxu3 %v2175_v29 }
 0x8f2   : > { %v2884_v23 = vpop.eup %2883 }
 0x8f3   : > { %v2059_v37 = vpop.xlane.xlu2 %2058  ;;  %v4453_v15 = vmul.f32 %v2884_v23, %v4223_v31  ;;  %v4459_v54 = vmul.f32 %v2884_v23, %v4225_v53 }
 0x8f4   : > { %2885 = vrcp.f32 %v2059_v37 }
 0x8f7   : > { %2214 = vmatpush.bf16.xpose.msrb.mxu2 %v2172_v2  ;;  %2227 = vmatpush.bf16.xpose.msrb.mxu3 %v2173_v25 }
 0x8fa   : > { %v2886_v63 = vpop.eup %2885 }
 0x8fb   : > { %v4456_v36 = vmul.f32 %v2886_v63, %v4229_v0  ;;  %v4462_v6 = vmul.f32 %v2886_v63, %v4231_v5 }
 0x8fd   : > { %v2194_v17 = vpack.c.bf16 %v4456_v36, %v4453_v15  ;;  %v2195_v8 = vpack.c.bf16 %v4462_v6, %v4459_v54 }
 0x905   : > { %v2062_v60 = vpop.xlane.xlu0 %2061 }
 0x90d   : > { %v2065_v42 = vpop.xlane.xlu2 %2064 }
 0x91d   : > { %v2068_v21 = vpop.xlane.xlu0 %2067 }
 0x925   : > { %v4468_v31 = vpop.xlane.xlu0 %2049  ;;  %v2071_v29 = vpop.xlane.xlu2 %2070 }
 0x92d   : > { %v4470_v0 = vpop.xlane.xlu2 %2052  ;;  %v1984_v4 = vpop.xlane.xlu0 %1983 }
 0x92e   : > { %2887 = vrcp.f32 %v1984_v4 }
 0x934   : > { %v2888_v43 = vpop.eup %2887 }
 0x935   : > { %v1987_v53 = vpop.xlane.xlu2 %1986  ;;  %v4472_v5 = vpop.xlane.xlu0 %2043  ;;  %v2108_v46 = vmul.f32 %v2888_v43, %v4313_v18  ;;  %v2109_v14 = vmul.f32 %v2888_v43, %v4315_v48  ;;  %v1415_v18 = vld [vmem:[#allocation4] sm:$0xcc] }
 0x936   : > { %2889 = vrcp.f32 %v1987_v53 }
 0x937   : > { %2891 = vrcp.f32 %v2071_v29 }
 0x93c   : > { %v2890_v40 = vpop.eup %2889 }
 0x93d   : > { %v2047_v59 = vpop.xlane.xlu2 %2046  ;;  %v2110_v49 = vmul.f32 %v2890_v40, %v4335_v55  ;;  %v2111_v37 = vmul.f32 %v2890_v40, %v4337_v33  ;;  %v1978_v26 = vpop.xlane.xlu0 %1977  ;;  %v2202_v40 = vunpack.c.h.b16 %v1415_v18 }
 0x93e   : > { %2893 = vrcp.f32 %v1978_v26  ;;  %v2892_v2 = vpop.eup %2891 }
 0x93f   : > { %v2170_v58 = vpack.c.bf16 %v2110_v49, %v2108_v46  ;;  %v2171_v28 = vpack.c.bf16 %v2111_v37, %v2109_v14  ;;  %2895 = vrcp.f32 %v2068_v21  ;;  %v2166_v48 = vmul.f32 %v2892_v2, %v4301_v38 }
 0x940   : > { %v2167_v33 = vmul.f32 %v2892_v2, %v4305_v13 }
 0x941   : > { %2215 = vmatpush.bf16.xpose.msrb.mxu2 %v2170_v58  ;;  %2228 = vmatpush.bf16.xpose.msrb.mxu3 %v2171_v28 }
 0x944   : > { %v2894_v25 = vpop.eup %2893 }
 0x945   : > { %v1981_v56 = vpop.xlane.xlu2 %1980  ;;  %v2896_v23 = vpop.eup %2895  ;;  %v2104_v63 = vmul.f32 %v2894_v25, %v4357_v52  ;;  %v2105_v29 = vmul.f32 %v2894_v25, %v4359_v45  ;;  %v4488_v45 = vpack.c.b16 %v2202_v40, %v2202_v40 }
 0x946   : > { %2897 = vrcp.f32 %v1981_v56  ;;  %v2164_v53 = vmul.f32 %v2896_v23, %v4281_v12  ;;  %v2165_v43 = vmul.f32 %v2896_v23, %v4285_v41  ;;  %v2035_v25 = vpop.xlane.xlu1 %2034 }
 0x947   : > { %2899 = vrcp.f32 %v2065_v42  ;;  %v2201_v42 = vunpack.c.l.b16 %v1415_v18 }
 0x948   : > { %2901 = vrcp.f32 %v2062_v60  ;;  %v2198_v49 = vpack.c.bf16 %v2166_v48, %v2164_v53  ;;  %v2199_v38 = vpack.c.bf16 %v2167_v33, %v2165_v43  ;;  %v4755_v53 = vld [vmem:[#allocation34_spill] sm:$0xff] }
 0x949   : > { %v4486_v52 = vpack.c.b16 %v2201_v42, %v2201_v42  ;;  %2903 = vrcp.f32 %v4470_v0 }
 0x94a   : > { %2905 = vrcp.f32 %v4468_v31 }
 0x94b   : > { %2907 = vrcp.f32 %v2047_v59 }
 0x94c   : > { %v2898_v55 = vpop.eup %2897  ;;  %2909 = vrcp.f32 %v4472_v5 }
 0x94d   : > { %v2106_v4 = vmul.f32 %v2898_v55, %v4378_v61  ;;  %v2107_v21 = vmul.f32 %v2898_v55, %v4380_v50  ;;  %v2900_v14 = vpop.eup %2899  ;;  %v2205_v61 = vrot.slane %v4486_v52, 2  ;;  %v2206_v50 = vrot.slane %v4488_v45, 2  ;;  %v2041_v2 = vpop.xlane.xlu2 %2040 }
 0x94e   : > { %v2902_v13 = vpop.eup %2901  ;;  %v2162_v12 = vmul.f32 %v2900_v14, %v4263_v39  ;;  %v2163_v41 = vmul.f32 %v2900_v14, %v4265_v44  ;;  %2911 = vrcp.f32 %v2041_v2 }
 0x94f   : > { %v2168_v46 = vpack.c.bf16 %v2106_v4, %v2104_v63  ;;  %v2169_v60 = vpack.c.bf16 %v2107_v21, %v2105_v29  ;;  %v2160_v37 = vmul.f32 %v2902_v13, %v4255_v19  ;;  %v2161_v58 = vmul.f32 %v2902_v13, %v4257_v16  ;;  %v2904_v39 = vpop.eup %2903  ;;  %v2038_v16 = vpop.xlane.xlu0 %2037 }
 0x950   : > { %v2906_v19 = vpop.eup %2905  ;;  %v2154_v44 = vmul.f32 %v2904_v39, %v4319_v11  ;;  %v2155_v56 = vmul.f32 %v2904_v39, %v4323_v51  ;;  %2913 = vrcp.f32 %v2038_v16 }
 0x951   : > { %2216 = vmatpush.bf16.xpose.msrb.mxu2 %v2168_v46  ;;  %2229 = vmatpush.bf16.xpose.msrb.mxu3 %v2169_v60  ;;  %v2196_v28 = vpack.c.bf16 %v2162_v12, %v2160_v37  ;;  %v2197_v26 = vpack.c.bf16 %v2163_v41, %v2161_v58  ;;  %v2152_v31 = vmul.f32 %v2906_v19, %v4293_v27 }
 0x952   : > { %v2153_v0 = vmul.f32 %v2906_v19, %v4297_v20 }
 0x953   : > { %v2192_v15 = vpack.c.bf16 %v2154_v44, %v2152_v31  ;;  %v2266_v44 = vld [vmem:[%s4581_s7] sm:$0xf] }
 0x954   : > { %v2193_v36 = vpack.c.bf16 %v2155_v56, %v2153_v0  ;;  %v2272_v56 = vpop.permute.xlu1 %2271  ;;  %v2314_v0 = vld [vmem:[%s3092_s25] sm:$0xff] }
 0x955   : > { %v2026_v48 = vpop.xlane.xlu2 %2025 }
 0x957   : > { %v2032_v51 = vpop.xlane.xlu0 %2031 }
 0x958   : > { %2217 = vmatmul.bf16.vlgmr.msrb.gmra.mxu2 %v2205_v61  ;;  %2230 = vmatmul.bf16.vlgmr.msrb.gmra.mxu3 %v2206_v50  ;;  %2915 = vrcp.f32 %v2032_v51 }
 0x959   : > { %2235 = vmatpush.bf16.xpose.msra.mxu2 %v2198_v49  ;;  %2248 = vmatpush.bf16.xpose.msra.mxu3 %v2199_v38  ;;  %2917 = vrcp.f32 %v2035_v25 }
 0x961   : > { %2236 = vmatpush.bf16.xpose.msra.mxu2 %v2196_v28  ;;  %2249 = vmatpush.bf16.xpose.msra.mxu3 %v2197_v26 }
 0x969   : > { %2237 = vmatpush.bf16.xpose.msra.mxu2 %v2194_v17  ;;  %2250 = vmatpush.bf16.xpose.msra.mxu3 %v2195_v8  ;;  %v2908_v17 = vpop.eup %2907 }
 0x96a   : > { %v2910_v54 = vpop.eup %2909  ;;  %v2150_v6 = vmul.f32 %v2908_v17, %v4361_v3  ;;  %v2151_v11 = vmul.f32 %v2908_v17, %v4365_v1 }
 0x96b   : > { %v2148_v8 = vmul.f32 %v2910_v54, %v4343_v7  ;;  %v2149_v27 = vmul.f32 %v2910_v54, %v4345_v35  ;;  %v2912_v59 = vpop.eup %2911  ;;  %v2029_v7 = vpop.xlane.xlu0 %2028 }
 0x96c   : > { %v2914_v23 = vpop.eup %2913  ;;  %v2146_v18 = vmul.f32 %v2912_v59, %v4410_v10  ;;  %v2147_v3 = vmul.f32 %v2912_v59, %v4412_v47  ;;  %2919 = vrcp.f32 %v2029_v7  ;;  %v4754_v47 = vld [vmem:[#allocation27_spill] sm:$0xff] }
 0x96d   : > { %v2190_v5 = vpack.c.bf16 %v2150_v6, %v2148_v8  ;;  %v2191_v20 = vpack.c.bf16 %v2151_v11, %v2149_v27  ;;  %v2144_v1 = vmul.f32 %v2914_v23, %v4386_v30  ;;  %v2145_v55 = vmul.f32 %v2914_v23, %v4390_v34  ;;  %v2916_v63 = vpop.eup %2915 }
 0x96e   : > { %v2918_v4 = vpop.eup %2917  ;;  %2921 = vrcp.f32 %v2026_v48  ;;  %v2140_v29 = vmul.f32 %v2916_v63, %v4404_v9  ;;  %v2141_v10 = vmul.f32 %v2916_v63, %v4406_v62 }
 0x96f   : > { %v2188_v35 = vpack.c.bf16 %v2146_v18, %v2144_v1  ;;  %v2189_v33 = vpack.c.bf16 %v2147_v3, %v2145_v55  ;;  %v2142_v21 = vmul.f32 %v2918_v4, %v4754_v47  ;;  %v2143_v30 = vmul.f32 %v2918_v4, %v4755_v53 }
 0x971   : > { %2238 = vmatpush.bf16.xpose.msra.mxu2 %v2192_v15  ;;  %2251 = vmatpush.bf16.xpose.msra.mxu3 %v2193_v36  ;;  %v2186_v34 = vpack.c.bf16 %v2142_v21, %v2140_v29  ;;  %v2187_v42 = vpack.c.bf16 %v2143_v30, %v2141_v10  ;;  %v2315_v15 = vld [vmem:[%s3092_s25 + $0x8] sm:$0xff] }
 0x972   : > { %v2920_v43 = vpop.eup %2919 }
 0x973   : > { %v2138_v60 = vmul.f32 %v2920_v43, %v4424_v22  ;;  %v2139_v9 = vmul.f32 %v2920_v43, %v4426_v24 }
 0x974   : > { %v2922_v40 = vpop.eup %2921 }
 0x975   : > { %v2136_v46 = vmul.f32 %v2922_v40, %v4419_v32  ;;  %v2137_v49 = vmul.f32 %v2922_v40, %v4422_v57 }
 0x977   : > { %v2184_v38 = vpack.c.bf16 %v2138_v60, %v2136_v46  ;;  %v2185_v62 = vpack.c.bf16 %v2139_v9, %v2137_v49 }
 0x979   : > { %2239 = vmatpush.bf16.xpose.msra.mxu2 %v2190_v5  ;;  %2252 = vmatpush.bf16.xpose.msra.mxu3 %v2191_v20 }
 0x981   : > { %2240 = vmatpush.bf16.xpose.msra.mxu2 %v2188_v35  ;;  %2253 = vmatpush.bf16.xpose.msra.mxu3 %v2189_v33 }
 0x989   : > { %2241 = vmatpush.bf16.xpose.msra.mxu2 %v2186_v34  ;;  %2254 = vmatpush.bf16.xpose.msra.mxu3 %v2187_v42 }
 0x991   : > { %2242 = vmatpush.bf16.xpose.msra.mxu2 %v2184_v38  ;;  %2255 = vmatpush.bf16.xpose.msra.mxu3 %v2185_v62 }
 0x998   : > { %2243 = vmatmul.bf16.vlgmr.msra.gmra.mxu2 %v2205_v61  ;;  %2256 = vmatmul.bf16.vlgmr.msra.gmra.mxu3 %v2206_v50 }
 0x9db   : > { %v2218_v14 = vpop.f32.mrf.mxu2  ;;  %v2231_v13 = vpop.f32.mrf.mxu3 }
 0x9dc   : > { %v2232_v37 = vadd.f32 %v2231_v13, %v2218_v14 }
 0x9e3   : > { %v2220_v12 = vpop.f32.mrf.mxu2  ;;  %v2233_v32 = vpop.f32.mrf.mxu3 }
 0xa1b   : > { %v2244_v41 = vpop.f32.mrf.mxu2  ;;  %v2257_v22 = vpop.f32.mrf.mxu3 }
 0xa1c   : > { %v2258_v57 = vadd.f32 %v2257_v22, %v2244_v41 }
 0xa1e   : > { %v2261_v58 = vpack.c.bf16 %v2258_v57, %v2232_v37 }
 0xa20   : > { %v2263_v24 = vrot.slane %v2261_v58, 6 }
 0xa22   : > { %2265 = vst [vmem:[#allocation5] sm:$0xcc] %v2263_v24 }
 0xa23   : > { %v2246_v28 = vpop.f32.mrf.mxu2  ;;  %v2259_v26 = vpop.f32.mrf.mxu3 }
 0xa29   : > { %v2267_v52 = vld [vmem:[#allocation5] sm:$0xff] }
 0xa2a   : > { %v2275_v61 = vunpack.c.l.b16 %v2267_v52  ;;  %v2276_v39 = vunpack.c.h.b16 %v2267_v52 }
 0xa2c   : > { %v2277_v45 = vpack.c.b16 %v2275_v61, %v2275_v61  ;;  %v2278_v50 = vpack.c.b16 %v2276_v39, %v2276_v39 }
 0xa2e   : > { %v2283_v19 = vsel %vm374_vm1, %v2277_v45, 0  ;;  %v2286_v16 = vsel %vm374_vm1, %v2278_v50, 0 }
 0xa2f   : > { %2295 = vmatpush.bf16.msrb.mxu2 %v2283_v19  ;;  %2308 = vmatpush.bf16.msrb.mxu3 %v2286_v16 }
 0xa32   : > { %2481 = vmatmul.msk.bf16.vlgmr.msrb.gmra.mxu2 %vm346_vm0, %v2266_v44  ;;  %2482 = vmatmul.msk.bf16.vlgmr.msrb.gmra.mxu3 %vm346_vm0, %v2266_v44 }
 0xab5   : > { %v2297_v31 = vpop.f32.mrf.mxu2  ;;  %v2310_v2 = vpop.f32.mrf.mxu3 }
 0xab6   : > { %v2298_v36 = vadd.f32 %v2297_v31, %v2272_v56  ;;  %v2311_v17 = vadd.f32 %v2310_v2, %v2272_v56 }
 0xab8   : > { %v2316_v54 = vadd.f32 %v2314_v0, %v2298_v36  ;;  %v2317_v6 = vadd.f32 %v2315_v15, %v2311_v17 }
 0xaba   : > { %2318 = vst [vmem:[%s325_s17] sm:$0xff] %v2316_v54 }
 0xabb   : > { %2319 = vst [vmem:[%s325_s17 + $0x8] sm:$0xff] %v2317_v6 }
 0xabc   : > { %2950 = shalt.err (!%p2947_p3)
}
 0xabd   : > { %2491 = dma.vmem_to_hbm [thread:$0]  (%p3077_p5), %s2335_s21, 256, %s2337_s22, %s2321_s13   ;;  %v2299_v11 = vpop.f32.mrf.mxu2  ;;  %v2312_v51 = vpop.f32.mrf.mxu3 }
 0xabe PF: > { %p2497_p4 = scmp.ge.s32.totalorder %s2985_s12, 2  ;;  %s2348_s26 = sand.u32 1, %s2973_s30  }
 0xabf   : > { %s2349_s16 = scalar_lea.sflag [#allocation7], %s2348_s26 }
 0xac0   : > { %p2494_p7 = pnand %p2497_p4, %p3081_p6 }
 0xac2   : > { %p2495_p8 = pneg %p2494_p7 }
 0xac4   : > { %2968 = dma.done.wait (%p2495_p8), %s2349_s16, 256  }
 0xac5   : > { %2970 = vsyncadd (%p2495_p8), %s2349_s16, 4294967040  ;;  %p19_p5 = scmp.ge.s32.totalorder %s3064_s15, 4   ;;  %s4756_s30 = smov %s2977_s10 }
 0xac6   : > { %s4757_s10 = smov %s2981_s11  ;;  %s4758_s11 = smov %s3075_s18 }
 0xac7   : > { %s4759_s12 = smov %s3064_s15  ;;  %21 = sbr.rel (!%p19_p5) target bundleno = 3 (0x3), region = 91 }
 0xacc   :  { %2355 = vsyncpa [#allocation7], 1 }
 0xacd   :  { %2357 = vsyncpa [#allocation7 + $0x1], 1 }

</bundles_post_ra>
